<compile_context>
chip_gen: v7x
topology: tpu7x:2x2x1
jax: 0.10.0
libtpu: 0.0.40
codegen_flags: <defaults>
</compile_context>

<pallas_src>
import functools

import jax
import jax.numpy as jnp
from jax import lax
from jax.experimental import pallas as pl
from jax.experimental.pallas import tpu as pltpu


def _round_up(x, m):
    return (x + m - 1) // m * m


# ============================================================================
# Fused WSMLayer kernel (Bt lane-batched elements per grid step)
# ============================================================================
def _wsm_kernel(x_ref, wadj_ref, badj_ref, wdecf_ref, bfus_ref, scat_ref,
                w21_ref, b21_ref, w22_ref, b22_ref,
                wwx3_ref, bwx3_ref, w3xh_ref, b3xh_ref,
                rrow_ref, brow_ref, rcol_ref, bcol_ref, mask_ref,
                o_ref, *, ki, wi, kp, wp, H, W, Bt):
    """Internal layout: channel-first, (channels, Bt * H2*W2) with batch-major lanes."""
    H2, W2 = 2 * H, 2 * W
    P = H2 * W2
    L = Bt * P
    Cbr = 3 * kp + 2 * wp
    f32, bf16 = jnp.float32, jnp.bfloat16

    def shift(x, dh, dw):
        """y[:, b*P + h*W2 + w] = x[:, b*P + (h+dh)*W2 + (w+dw)], zero outside image."""
        if dh == 0 and dw == 0:
            return x
        d = dh * W2 + dw
        y = pltpu.roll(x, shift=(-d) % L, axis=1)          # lane rotate (XLU)
        return y * mask_ref[(dh + 2) * 5 + (dw + 2)]       # (1, L) validity mask

    # ---- input_adjustment_layer (1x1 conv): raw -> C -------------------------
    x = x_ref[0]                                                     # (raw, Bt*HW)
    a = jnp.dot(wadj_ref[...], x.astype(bf16),
                preferred_element_type=f32) + badj_ref[...]          # (C, Bt*HW)

    # ---- deconv1 (k=2,s=2) with conv1_1..conv1_5 pre-folded into each tap ----
    y_all = jnp.dot(wdecf_ref[...], a.astype(bf16),
                    preferred_element_type=f32)                      # (4*Cbr, Bt*HW)

    # exact 0/1 depth-to-space scatter, bf16 operands, one accumulation chain
    acc = jnp.dot(y_all[0:Cbr].astype(bf16), scat_ref[0],
                  preferred_element_type=f32)
    for t in range(1, 4):
        acc = acc + jnp.dot(y_all[t * Cbr:(t + 1) * Cbr].astype(bf16),
                            scat_ref[t], preferred_element_type=f32)
    branch = acc + bfus_ref[...]                                     # (Cbr, L)

    o11 = branch[0:kp]                       # sublane-aligned padded segments
    o12 = branch[kp:2 * kp]
    o13 = branch[2 * kp:3 * kp]
    o14 = branch[3 * kp:3 * kp + wp]
    o15 = branch[3 * kp + wp:3 * kp + 2 * wp]

    # ---- conv2_1: 3x3, pad 1 (roll-based im2col, single K = 9*kp matmul) -----
    cols21 = jnp.concatenate([shift(o12, dh, dw) for dh in (-1, 0, 1)
                              for dw in (-1, 0, 1)], axis=0)
    out21 = jnp.dot(w21_ref[...], cols21.astype(bf16),
                    preferred_element_type=f32) + b21_ref[...]       # (kp, L)

    # ---- conv2_2: 5x5, pad 2 (roll-based im2col, single K = 25*kp matmul) ----
    cols22 = jnp.concatenate([shift(o13, dh, dw) for dh in (-2, -1, 0, 1, 2)
                              for dw in (-2, -1, 0, 1, 2)], axis=0)
    out22 = jnp.dot(w22_ref[...], cols22.astype(bf16),
                    preferred_element_type=f32) + b22_ref[...]       # (kp, L)

    # ---- wsm_wx3 (3 x W2 kernel) -> per-row feature, broadcast over width ----
    #   eh[o, (h,w)] = sum_{i,dh} Wwx3[o,i,dh,w] * o14[i, h+dh-1, w]
    #   comp_h = broadcast_row( rowsum_w(eh) ) via factored 0/1 matmuls
    eh = jnp.zeros((wi, L), f32)
    for dh in range(3):
        xs = shift(o14, dh - 1, 0)
        wt = wwx3_ref[dh]                                            # (wi, wi, L)
        for i in range(wi):
            eh = eh + wt[:, i, :] * xs[i:i + 1, :]
    eh_c = jnp.dot(eh.astype(bf16), rrow_ref[...],
                   preferred_element_type=f32)                       # (wi, Bt*H2)
    comp_h = jnp.dot(eh_c.astype(bf16), brow_ref[...],
                     preferred_element_type=f32) + bwx3_ref[...]     # (wi, L)

    # ---- wsm_3xh (H2 x 3 kernel) -> per-column feature, broadcast over height
    ev = jnp.zeros((wi, L), f32)
    for dw in range(3):
        xs = shift(o15, 0, dw - 1)
        wt = w3xh_ref[dw]
        for i in range(wi):
            ev = ev + wt[:, i, :] * xs[i:i + 1, :]
    ev_c = jnp.dot(ev.astype(bf16), rcol_ref[...],
                   preferred_element_type=f32)                       # (wi, Bt*W2)
    comp_v = jnp.dot(ev_c.astype(bf16), bcol_ref[...],
                     preferred_element_type=f32) + b3xh_ref[...]     # (wi, L)

    # ---- store (torch channel order), dropping sublane-padding rows ----------
    dt = o_ref.dtype
    o_ref[0, 0:ki, :] = o11[0:ki].astype(dt)
    o_ref[0, ki:2 * ki, :] = out21[0:ki].astype(dt)
    o_ref[0, 2 * ki:3 * ki, :] = out22[0:ki].astype(dt)
    o_ref[0, 3 * ki:3 * ki + wi, :] = comp_v.astype(dt)
    o_ref[0, 3 * ki + wi:3 * ki + 2 * wi, :] = comp_h.astype(dt)


def _const_spec(arr):
    nd = arr.ndim
    # index_map constant across the grid -> single-buffer the operand.
    return pl.BlockSpec(arr.shape, lambda g, _nd=nd: (0,) * _nd,
                        pipeline_mode=pl.Buffered(1))


# ============================================================================
# Host-side wrapper: weight preparation + pallas_call
# ============================================================================
def wsm_layer_forward(x_nchw, params, *, kernel_size, stride, batch_tile=None):
    """WSMLayer.forward.  x_nchw: (N, raw, H, W) f32 -> (N, 3*ki+2*wi, 2H, 2W)."""
    N, raw, H, W = x_nchw.shape
    H2, W2 = 2 * H, 2 * W
    HW, P = H * W, 4 * H * W
    C = params["adj_w"].shape[0]
    ki = params["c11_w"].shape[0]
    wi = params["c14_w"].shape[0]
    Ctot = 3 * ki + 2 * wi
    kp, wp = _round_up(ki, 8), _round_up(wi, 8)
    Cbr = 3 * kp + 2 * wp
    f32, bf16 = jnp.float32, jnp.bfloat16

    # WSM convs are single-window "compressed feature" convs (kernel spans the
    # full deconv width/height); the torch stride argument is then irrelevant.
    assert kernel_size == W2 and kernel_size == H2, \
        "WSM convs require kernel_size == 2*H == 2*W (single-window)"
    del stride

    # ---- lane-batching: fold Bt batch elements into the lane dimension ------
    if batch_tile is None:
        batch_tile = 1
        while (batch_tile * HW < 128 and batch_tile < N
               and N % (batch_tile * 2) == 0):
            batch_tile *= 2
    Bt = batch_tile
    assert N % Bt == 0
    G = N // Bt
    L = Bt * P

    # ---- weight preparation (tiny, runs once under jit) ---------------------
    wadj = params["adj_w"].reshape(C, raw).astype(bf16)
    badj = params["adj_b"].reshape(C, 1).astype(f32)

    # branch 1x1 weights / biases, zero-padded to 8-sublane segments
    def wseg(key, rows, pad_to):
        return jnp.pad(params[key].reshape(-1, C), ((0, pad_to - rows), (0, 0)))

    def bseg(key, rows, pad_to):
        return jnp.pad(params[key], (0, pad_to - rows))

    wbr_pad = jnp.concatenate([
        wseg("c11_w", ki, kp), wseg("c12_w", ki, kp), wseg("c13_w", ki, kp),
        wseg("c14_w", wi, wp), wseg("c15_w", wi, wp)], axis=0)        # (Cbr, C)
    bbr_pad = jnp.concatenate([
        bseg("c11_b", ki, kp), bseg("c12_b", ki, kp), bseg("c13_b", ki, kp),
        bseg("c14_b", wi, wp), bseg("c15_b", wi, wp)], axis=0)        # (Cbr,)

    # fold the 1x1 branch convs into the ConvTranspose2d taps:
    #   Wf[di,dj,o,ci] = sum_co Wbr[o,co] * Wdec[ci,co,di,dj]
    wdecf = jnp.einsum("oc,icuv->uvoi", wbr_pad, params["dec_w"])
    wdecf = wdecf.reshape(4 * Cbr, C).astype(bf16)                    # (4*Cbr, C)
    bfus = (wbr_pad @ params["dec_b"] + bbr_pad).reshape(Cbr, 1).astype(f32)

    # exact 0/1 depth-to-space scatter (block-diagonal over the lane batch)
    eyeb = jnp.eye(Bt, dtype=f32)
    hw = jnp.arange(HW)
    hh, ww = hw // W, hw % W
    taps = []
    for di in range(2):
        for dj in range(2):
            tgt = (2 * hh + di) * W2 + (2 * ww + dj)                  # (HW,)
            core = jax.nn.one_hot(tgt, P, dtype=f32)                  # (HW, P)
            taps.append(jnp.kron(eyeb, core))                         # (Bt*HW, L)
    scat = jnp.stack(taps, axis=0).astype(bf16)                       # (4,Bt*HW,L)

    # conv2_1 / conv2_2 im2col weights (output rows and K-blocks padded to kp)
    def im2col_w(key, k):
        w = jnp.transpose(params[key], (0, 2, 3, 1))                  # (ki,k,k,ki)
        w = jnp.pad(w, ((0, kp - ki), (0, 0), (0, 0), (0, kp - ki)))
        return w.reshape(kp, k * k * kp).astype(bf16)

    w21 = im2col_w("c21_w", 3)
    b21 = jnp.pad(params["c21_b"], (0, kp - ki)).reshape(kp, 1).astype(f32)
    w22 = im2col_w("c22_w", 5)
    b22 = jnp.pad(params["c22_b"], (0, kp - ki)).reshape(kp, 1).astype(f32)

    # WSM per-lane weight tiles aligned with the flattened (Bt*P) lane layout
    wx3_base = jnp.transpose(params["wx3_w"], (2, 0, 1, 3))           # (3,wi,wi,W2)
    wwx3 = jnp.tile(wx3_base, (1, 1, 1, H2 * Bt)).astype(f32)         # (3,wi,wi,L)
    bwx3 = params["wx3_b"].reshape(wi, 1).astype(f32)
    h3_base = jnp.transpose(params["h3_w"], (3, 0, 1, 2))             # (3,wi,wi,H2)
    w3xh = jnp.tile(jnp.repeat(h3_base, W2, axis=-1),
                    (1, 1, 1, Bt)).astype(f32)                        # (3,wi,wi,L)
    b3xh = params["h3_b"].reshape(wi, 1).astype(f32)

    # factored row/col sum + broadcast matrices (exact 0/1, bf16, O(P*H2) mem)
    p_idx = jnp.arange(P)
    row_core = jax.nn.one_hot(p_idx // W2, H2, dtype=f32)             # (P, H2)
    col_core = jax.nn.one_hot(p_idx % W2, W2, dtype=f32)              # (P, W2)
    rrow = jnp.kron(eyeb, row_core).astype(bf16)                      # (L, Bt*H2)
    brow = jnp.transpose(rrow)                                        # (Bt*H2, L)
    rcol = jnp.kron(eyeb, col_core).astype(bf16)                      # (L, Bt*W2)
    bcol = jnp.transpose(rcol)                                        # (Bt*W2, L)

    # combined (dh, dw) validity masks for roll-based shifts, dh,dw in [-2,2]
    h_of, w_of = p_idx // W2, p_idx % W2
    masks = []
    for dh in range(-2, 3):
        for dw in range(-2, 3):
            m = ((h_of + dh >= 0) & (h_of + dh < H2) &
                 (w_of + dw >= 0) & (w_of + dw < W2)).astype(f32)
            masks.append(jnp.tile(m, (Bt,)))
    masks = jnp.stack(masks, axis=0).reshape(25, 1, L)

    # input relayout: (N, raw, H, W) -> (G, raw, Bt*HW), lane = b*HW + hw
    x_g = (x_nchw.reshape(G, Bt, raw, HW).transpose(0, 2, 1, 3)
           .reshape(G, raw, Bt * HW))

    consts = (wadj, badj, wdecf, bfus, scat, w21, b21, w22, b22,
              wwx3, bwx3, w3xh, b3xh, rrow, brow, rcol, bcol, masks)

    kernel = functools.partial(_wsm_kernel, ki=ki, wi=wi, kp=kp, wp=wp,
                               H=H, W=W, Bt=Bt)

    out_g = pl.pallas_call(
        kernel,
        out_shape=jax.ShapeDtypeStruct((G, Ctot, L), x_nchw.dtype),
        grid=(G,),
        in_specs=[pl.BlockSpec((1, raw, Bt * HW), lambda g: (g, 0, 0))]
                 + [_const_spec(a) for a in consts],
        out_specs=pl.BlockSpec((1, Ctot, L), lambda g: (g, 0, 0)),
        compiler_params=pltpu.CompilerParams(
            dimension_semantics=("parallel",)),
    )(x_g, *consts)

    # undo the lane batching; (Ctot, P) -> (Ctot, H2, W2) is a free reshape
    return (out_g.reshape(G, Ctot, Bt, P).transpose(0, 2, 1, 3)
            .reshape(N, Ctot, H2, W2))


# ============================================================================
# Deterministic parameter construction (PyTorch weight conventions)
# ============================================================================
def init_wsm_params(key, in_channels, kernel_size, layer_id):
    C = in_channels
    ki = C // 4
    wi = C // 8
    raw = 2208 if layer_id == 1 else 2 * C
    ks = jax.random.split(key, 22)
    g = lambda k, s: 0.25 * jax.random.normal(k, s, jnp.float32)
    return {
        "adj_w": g(ks[0], (C, raw, 1, 1)),  "adj_b": g(ks[1], (C,)),
        "dec_w": g(ks[2], (C, C, 2, 2)),    "dec_b": g(ks[3], (C,)),   # (Cin,Cout,kh,kw)
        "c11_w": g(ks[4], (ki, C, 1, 1)),   "c11_b": g(ks[5], (ki,)),
        "c12_w": g(ks[6], (ki, C, 1, 1)),   "c12_b": g(ks[7], (ki,)),
        "c13_w": g(ks[8], (ki, C, 1, 1)),   "c13_b": g(ks[9], (ki,)),
        "c14_w": g(ks[10], (wi, C, 1, 1)),  "c14_b": g(ks[11], (wi,)),
        "c15_w": g(ks[12], (wi, C, 1, 1)),  "c15_b": g(ks[13], (wi,)),
        "c21_w": g(ks[14], (ki, ki, 3, 3)), "c21_b": g(ks[15], (ki,)),
        "c22_w": g(ks[16], (ki, ki, 5, 5)), "c22_b": g(ks[17], (ki,)),
        "wx3_w": g(ks[18], (wi, wi, 3, kernel_size)), "wx3_b": g(ks[19], (wi,)),
        "h3_w":  g(ks[20], (wi, wi, kernel_size, 3)), "h3_b":  g(ks[21], (wi,)),
    }


# ============================================================================
# Pure-XLA reference (mirrors the PyTorch module literally)
# ============================================================================
def wsm_layer_reference(x, p, *, kernel_size, stride):
    def conv(x, w, b, padding, strides=(1, 1)):
        y = lax.conv_general_dilated(
            x, w, window_strides=strides, padding=padding,
            dimension_numbers=("NCHW", "OIHW", "NCHW"))
        return y + b[None, :, None, None]

    x = conv(x, p["adj_w"], p["adj_b"], [(0, 0), (0, 0)])
    N, C, H, W = x.shape
    # ConvTranspose2d(C, C, 2, 2): out[n,co,2h+i,2w+j] = sum_ci x[n,ci,h,w]*Wd[ci,co,i,j]
    taps = jnp.einsum("nchw,cdij->ndijhw", x, p["dec_w"])
    out1 = jnp.transpose(taps, (0, 1, 4, 2, 5, 3)).reshape(N, C, 2 * H, 2 * W)
    out1 = out1 + p["dec_b"][None, :, None, None]

    o11 = conv(out1, p["c11_w"], p["c11_b"], [(0, 0), (0, 0)])
    o12 = conv(out1, p["c12_w"], p["c12_b"], [(0, 0), (0, 0)])
    o13 = conv(out1, p["c13_w"], p["c13_b"], [(0, 0), (0, 0)])
    o14 = conv(out1, p["c14_w"], p["c14_b"], [(0, 0), (0, 0)])
    o15 = conv(out1, p["c15_w"], p["c15_b"], [(0, 0), (0, 0)])
    o21 = conv(o12, p["c21_w"], p["c21_b"], [(1, 1), (1, 1)])
    o22 = conv(o13, p["c22_w"], p["c22_b"], [(2, 2), (2, 2)])
    wx3 = conv(o14, p["wx3_w"], p["wx3_b"], [(1, 1), (0, 0)], strides=(1, stride))
    h3 = conv(o15, p["h3_w"], p["h3_b"], [(0, 0), (1, 1)], strides=(stride, 1))
    # torch .repeat reproduced literally (repeat counts taken from shape[2]/shape[3])
    comp_h = jnp.tile(wx3, (1, 1, 1, wx3.shape[2]))
    comp_v = jnp.tile(h3, (1, 1, h3.shape[3], 1))
    return jnp.concatenate([o11, o21, o22, comp_v, comp_h], axis=1)


# ============================================================================
if __name__ == "__main__":
    # in_channels=16 (divisible by 8), layer_id=2 -> raw = 32 input channels.
    # Input spatial 8x8 -> deconv output 16x16; kernel_size=16, stride=16 make
    # the WSM convs produce a single compressed column / row.
    in_channels, kernel_size, stride, layer_id = 16, 16, 16, 2
    raw = 2208 if layer_id == 1 else 2 * in_channels

    key = jax.random.PRNGKey(0)
    k_x, k_p = jax.random.split(key)
    x = jax.random.normal(k_x, (2, raw, 8, 8), jnp.float32)      # NCHW, like PyTorch
    params = init_wsm_params(k_p, in_channels, kernel_size, layer_id)

    fwd = jax.jit(functools.partial(wsm_layer_forward,
                                    kernel_size=kernel_size, stride=stride))
    out = jax.block_until_ready(fwd(x, params))

    assert out.shape == (2, in_channels, 16, 16), out.shape
    assert bool(jnp.isfinite(out).all())

    # Correctness check vs. pure-XLA reference (tolerance covers bf16 operands).
    ref = jax.jit(functools.partial(wsm_layer_reference,
                                    kernel_size=kernel_size, stride=stride))(x, params)
    max_err = float(jnp.max(jnp.abs(out - ref)))
    scale = float(jnp.max(jnp.abs(ref)))
    assert max_err <= 0.05 * scale + 1e-3, (max_err, scale)

    print("KERNEL_OK")
</pallas_src>

<mosaic_0001>
module attributes {stable_mosaic.version = 11 : i64} {
  func.func @_wsm_kernel(%arg0: i32, %arg1: memref<1x32x128xf32, #tpu.memory_space<vmem>>, %arg2: memref<16x32xbf16, #tpu.memory_space<vmem>>, %arg3: memref<16x1xf32, #tpu.memory_space<vmem>>, %arg4: memref<160x16xbf16, #tpu.memory_space<vmem>>, %arg5: memref<40x1xf32, #tpu.memory_space<vmem>>, %arg6: memref<4x128x512xbf16, #tpu.memory_space<vmem>>, %arg7: memref<8x72xbf16, #tpu.memory_space<vmem>>, %arg8: memref<8x1xf32, #tpu.memory_space<vmem>>, %arg9: memref<8x200xbf16, #tpu.memory_space<vmem>>, %arg10: memref<8x1xf32, #tpu.memory_space<vmem>>, %arg11: memref<3x2x2x512xf32, #tpu.memory_space<vmem>>, %arg12: memref<2x1xf32, #tpu.memory_space<vmem>>, %arg13: memref<3x2x2x512xf32, #tpu.memory_space<vmem>>, %arg14: memref<2x1xf32, #tpu.memory_space<vmem>>, %arg15: memref<512x32xbf16, #tpu.memory_space<vmem>>, %arg16: memref<32x512xbf16, #tpu.memory_space<vmem>>, %arg17: memref<512x32xbf16, #tpu.memory_space<vmem>>, %arg18: memref<32x512xbf16, #tpu.memory_space<vmem>>, %arg19: memref<25x1x512xf32, #tpu.memory_space<vmem>>, %arg20: memref<1x16x512xf32, #tpu.memory_space<vmem>>) attributes {dimension_semantics = [#tpu.dimension_semantics<parallel>], iteration_bounds = array<i64: 1>, scalar_prefetch = 0 : i64, scratch_operands = 0 : i64, tpu.core_type = #tpu.core_type<tc>, window_params = [{transform_indices = @transform_0, window_bounds = array<i64: 1, 32, 128>}, {pipeline_mode = #tpu.pipeline_mode<synchronous>, transform_indices = @transform_1, window_bounds = array<i64: 16, 32>}, {pipeline_mode = #tpu.pipeline_mode<synchronous>, transform_indices = @transform_2, window_bounds = array<i64: 16, 1>}, {pipeline_mode = #tpu.pipeline_mode<synchronous>, transform_indices = @transform_3, window_bounds = array<i64: 160, 16>}, {pipeline_mode = #tpu.pipeline_mode<synchronous>, transform_indices = @transform_4, window_bounds = array<i64: 40, 1>}, {pipeline_mode = #tpu.pipeline_mode<synchronous>, transform_indices = @transform_5, window_bounds = array<i64: 4, 128, 512>}, {pipeline_mode = #tpu.pipeline_mode<synchronous>, transform_indices = @transform_6, window_bounds = array<i64: 8, 72>}, {pipeline_mode = #tpu.pipeline_mode<synchronous>, transform_indices = @transform_7, window_bounds = array<i64: 8, 1>}, {pipeline_mode = #tpu.pipeline_mode<synchronous>, transform_indices = @transform_8, window_bounds = array<i64: 8, 200>}, {pipeline_mode = #tpu.pipeline_mode<synchronous>, transform_indices = @transform_9, window_bounds = array<i64: 8, 1>}, {pipeline_mode = #tpu.pipeline_mode<synchronous>, transform_indices = @transform_10, window_bounds = array<i64: 3, 2, 2, 512>}, {pipeline_mode = #tpu.pipeline_mode<synchronous>, transform_indices = @transform_11, window_bounds = array<i64: 2, 1>}, {pipeline_mode = #tpu.pipeline_mode<synchronous>, transform_indices = @transform_12, window_bounds = array<i64: 3, 2, 2, 512>}, {pipeline_mode = #tpu.pipeline_mode<synchronous>, transform_indices = @transform_13, window_bounds = array<i64: 2, 1>}, {pipeline_mode = #tpu.pipeline_mode<synchronous>, transform_indices = @transform_14, window_bounds = array<i64: 512, 32>}, {pipeline_mode = #tpu.pipeline_mode<synchronous>, transform_indices = @transform_15, window_bounds = array<i64: 32, 512>}, {pipeline_mode = #tpu.pipeline_mode<synchronous>, transform_indices = @transform_16, window_bounds = array<i64: 512, 32>}, {pipeline_mode = #tpu.pipeline_mode<synchronous>, transform_indices = @transform_17, window_bounds = array<i64: 32, 512>}, {pipeline_mode = #tpu.pipeline_mode<synchronous>, transform_indices = @transform_18, window_bounds = array<i64: 25, 1, 512>}, {transform_indices = @transform_19, window_bounds = array<i64: 1, 16, 512>}]} {
    %c0 = arith.constant 0 : index
    %c0_0 = arith.constant 0 : index
    %c0_1 = arith.constant 0 : index
    %0 = vector.load %arg1[%c0, %c0_0, %c0_1] : memref<1x32x128xf32, #tpu.memory_space<vmem>>, vector<1x32x128xf32>
    %1 = vector.shape_cast %0 : vector<1x32x128xf32> to vector<32x128xf32>
    %c0_2 = arith.constant 0 : index
    %c0_3 = arith.constant 0 : index
    %2 = vector.load %arg2[%c0_2, %c0_3] : memref<16x32xbf16, #tpu.memory_space<vmem>>, vector<16x32xbf16>
    %3 = arith.truncf %1 : vector<32x128xf32> to vector<32x128xbf16>
    %cst = arith.constant dense<0.000000e+00> : vector<16x128xf32>
    %4 = tpu.matmul %2, %3, %cst {dimension_numbers = #tpu.dot_dimension_numbers<[1], [0], [0], [1], [0, 0, 1, 1], [], []>} : vector<16x32xbf16>, vector<32x128xbf16>, vector<16x128xf32> -> vector<16x128xf32>
    %c0_4 = arith.constant 0 : index
    %c0_5 = arith.constant 0 : index
    %5 = vector.load %arg3[%c0_4, %c0_5] : memref<16x1xf32, #tpu.memory_space<vmem>>, vector<16x1xf32>
    %6 = vector.broadcast %5 : vector<16x1xf32> to vector<16x128xf32>
    %7 = arith.addf %4, %6 : vector<16x128xf32>
    %c0_6 = arith.constant 0 : index
    %c0_7 = arith.constant 0 : index
    %8 = vector.load %arg4[%c0_6, %c0_7] : memref<160x16xbf16, #tpu.memory_space<vmem>>, vector<160x16xbf16>
    %9 = arith.truncf %7 : vector<16x128xf32> to vector<16x128xbf16>
    %cst_8 = arith.constant dense<0.000000e+00> : vector<160x128xf32>
    %10 = tpu.matmul %8, %9, %cst_8 {dimension_numbers = #tpu.dot_dimension_numbers<[1], [0], [0], [1], [0, 0, 1, 1], [], []>} : vector<160x16xbf16>, vector<16x128xbf16>, vector<160x128xf32> -> vector<160x128xf32>
    %11 = vector.extract_strided_slice %10 {offsets = [0, 0], sizes = [40, 128], strides = [1, 1]} : vector<160x128xf32> to vector<40x128xf32>
    %12 = arith.truncf %11 : vector<40x128xf32> to vector<40x128xbf16>
    %c0_9 = arith.constant 0 : index
    %c0_10 = arith.constant 0 : index
    %c0_11 = arith.constant 0 : index
    %13 = vector.load %arg6[%c0_9, %c0_10, %c0_11] : memref<4x128x512xbf16, #tpu.memory_space<vmem>>, vector<1x128x512xbf16>
    %14 = vector.shape_cast %13 : vector<1x128x512xbf16> to vector<128x512xbf16>
    %cst_12 = arith.constant dense<0.000000e+00> : vector<40x512xf32>
    %15 = tpu.matmul %12, %14, %cst_12 {dimension_numbers = #tpu.dot_dimension_numbers<[1], [0], [0], [1], [0, 0, 1, 1], [], []>} : vector<40x128xbf16>, vector<128x512xbf16>, vector<40x512xf32> -> vector<40x512xf32>
    %16 = vector.extract_strided_slice %10 {offsets = [40, 0], sizes = [40, 128], strides = [1, 1]} : vector<160x128xf32> to vector<40x128xf32>
    %17 = arith.truncf %16 : vector<40x128xf32> to vector<40x128xbf16>
    %c1 = arith.constant 1 : index
    %c0_13 = arith.constant 0 : index
    %c0_14 = arith.constant 0 : index
    %18 = vector.load %arg6[%c1, %c0_13, %c0_14] : memref<4x128x512xbf16, #tpu.memory_space<vmem>>, vector<1x128x512xbf16>
    %19 = vector.shape_cast %18 : vector<1x128x512xbf16> to vector<128x512xbf16>
    %cst_15 = arith.constant dense<0.000000e+00> : vector<40x512xf32>
    %20 = tpu.matmul %17, %19, %cst_15 {dimension_numbers = #tpu.dot_dimension_numbers<[1], [0], [0], [1], [0, 0, 1, 1], [], []>} : vector<40x128xbf16>, vector<128x512xbf16>, vector<40x512xf32> -> vector<40x512xf32>
    %21 = arith.addf %15, %20 : vector<40x512xf32>
    %22 = vector.extract_strided_slice %10 {offsets = [80, 0], sizes = [40, 128], strides = [1, 1]} : vector<160x128xf32> to vector<40x128xf32>
    %23 = arith.truncf %22 : vector<40x128xf32> to vector<40x128xbf16>
    %c2 = arith.constant 2 : index
    %c0_16 = arith.constant 0 : index
    %c0_17 = arith.constant 0 : index
    %24 = vector.load %arg6[%c2, %c0_16, %c0_17] : memref<4x128x512xbf16, #tpu.memory_space<vmem>>, vector<1x128x512xbf16>
    %25 = vector.shape_cast %24 : vector<1x128x512xbf16> to vector<128x512xbf16>
    %cst_18 = arith.constant dense<0.000000e+00> : vector<40x512xf32>
    %26 = tpu.matmul %23, %25, %cst_18 {dimension_numbers = #tpu.dot_dimension_numbers<[1], [0], [0], [1], [0, 0, 1, 1], [], []>} : vector<40x128xbf16>, vector<128x512xbf16>, vector<40x512xf32> -> vector<40x512xf32>
    %27 = arith.addf %21, %26 : vector<40x512xf32>
    %28 = vector.extract_strided_slice %10 {offsets = [120, 0], sizes = [40, 128], strides = [1, 1]} : vector<160x128xf32> to vector<40x128xf32>
    %29 = arith.truncf %28 : vector<40x128xf32> to vector<40x128xbf16>
    %c3 = arith.constant 3 : index
    %c0_19 = arith.constant 0 : index
    %c0_20 = arith.constant 0 : index
    %30 = vector.load %arg6[%c3, %c0_19, %c0_20] : memref<4x128x512xbf16, #tpu.memory_space<vmem>>, vector<1x128x512xbf16>
    %31 = vector.shape_cast %30 : vector<1x128x512xbf16> to vector<128x512xbf16>
    %cst_21 = arith.constant dense<0.000000e+00> : vector<40x512xf32>
    %32 = tpu.matmul %29, %31, %cst_21 {dimension_numbers = #tpu.dot_dimension_numbers<[1], [0], [0], [1], [0, 0, 1, 1], [], []>} : vector<40x128xbf16>, vector<128x512xbf16>, vector<40x512xf32> -> vector<40x512xf32>
    %33 = arith.addf %27, %32 : vector<40x512xf32>
    %c0_22 = arith.constant 0 : index
    %c0_23 = arith.constant 0 : index
    %34 = vector.load %arg5[%c0_22, %c0_23] : memref<40x1xf32, #tpu.memory_space<vmem>>, vector<40x1xf32>
    %35 = vector.broadcast %34 : vector<40x1xf32> to vector<40x512xf32>
    %36 = arith.addf %33, %35 : vector<40x512xf32>
    %37 = vector.extract_strided_slice %36 {offsets = [0, 0], sizes = [8, 512], strides = [1, 1]} : vector<40x512xf32> to vector<8x512xf32>
    %38 = vector.extract_strided_slice %36 {offsets = [8, 0], sizes = [8, 512], strides = [1, 1]} : vector<40x512xf32> to vector<8x512xf32>
    %39 = vector.extract_strided_slice %36 {offsets = [16, 0], sizes = [8, 512], strides = [1, 1]} : vector<40x512xf32> to vector<8x512xf32>
    %40 = vector.extract_strided_slice %36 {offsets = [24, 0], sizes = [8, 512], strides = [1, 1]} : vector<40x512xf32> to vector<8x512xf32>
    %41 = vector.extract_strided_slice %36 {offsets = [32, 0], sizes = [8, 512], strides = [1, 1]} : vector<40x512xf32> to vector<8x512xf32>
    %c17_i32 = arith.constant 17 : i32
    %42 = tpu.dynamic_rotate %38 by %c17_i32 dim 1 : vector<8x512xf32>, i32 -> vector<8x512xf32>
    %c6 = arith.constant 6 : index
    %c0_24 = arith.constant 0 : index
    %c0_25 = arith.constant 0 : index
    %43 = vector.load %arg19[%c6, %c0_24, %c0_25] : memref<25x1x512xf32, #tpu.memory_space<vmem>>, vector<1x1x512xf32>
    %44 = vector.shape_cast %43 : vector<1x1x512xf32> to vector<1x512xf32>
    %45 = vector.broadcast %44 : vector<1x512xf32> to vector<8x512xf32>
    %46 = arith.mulf %42, %45 : vector<8x512xf32>
    %c16_i32 = arith.constant 16 : i32
    %47 = tpu.dynamic_rotate %38 by %c16_i32 dim 1 : vector<8x512xf32>, i32 -> vector<8x512xf32>
    %c7 = arith.constant 7 : index
    %c0_26 = arith.constant 0 : index
    %c0_27 = arith.constant 0 : index
    %48 = vector.load %arg19[%c7, %c0_26, %c0_27] : memref<25x1x512xf32, #tpu.memory_space<vmem>>, vector<1x1x512xf32>
    %49 = vector.shape_cast %48 : vector<1x1x512xf32> to vector<1x512xf32>
    %50 = vector.broadcast %49 : vector<1x512xf32> to vector<8x512xf32>
    %51 = arith.mulf %47, %50 : vector<8x512xf32>
    %c15_i32 = arith.constant 15 : i32
    %52 = tpu.dynamic_rotate %38 by %c15_i32 dim 1 : vector<8x512xf32>, i32 -> vector<8x512xf32>
    %c8 = arith.constant 8 : index
    %c0_28 = arith.constant 0 : index
    %c0_29 = arith.constant 0 : index
    %53 = vector.load %arg19[%c8, %c0_28, %c0_29] : memref<25x1x512xf32, #tpu.memory_space<vmem>>, vector<1x1x512xf32>
    %54 = vector.shape_cast %53 : vector<1x1x512xf32> to vector<1x512xf32>
    %55 = vector.broadcast %54 : vector<1x512xf32> to vector<8x512xf32>
    %56 = arith.mulf %52, %55 : vector<8x512xf32>
    %c1_i32 = arith.constant 1 : i32
    %57 = tpu.dynamic_rotate %38 by %c1_i32 dim 1 : vector<8x512xf32>, i32 -> vector<8x512xf32>
    %c11 = arith.constant 11 : index
    %c0_30 = arith.constant 0 : index
    %c0_31 = arith.constant 0 : index
    %58 = vector.load %arg19[%c11, %c0_30, %c0_31] : memref<25x1x512xf32, #tpu.memory_space<vmem>>, vector<1x1x512xf32>
    %59 = vector.shape_cast %58 : vector<1x1x512xf32> to vector<1x512xf32>
    %60 = vector.broadcast %59 : vector<1x512xf32> to vector<8x512xf32>
    %61 = arith.mulf %57, %60 : vector<8x512xf32>
    %c511_i32 = arith.constant 511 : i32
    %62 = tpu.dynamic_rotate %38 by %c511_i32 dim 1 : vector<8x512xf32>, i32 -> vector<8x512xf32>
    %c13 = arith.constant 13 : index
    %c0_32 = arith.constant 0 : index
    %c0_33 = arith.constant 0 : index
    %63 = vector.load %arg19[%c13, %c0_32, %c0_33] : memref<25x1x512xf32, #tpu.memory_space<vmem>>, vector<1x1x512xf32>
    %64 = vector.shape_cast %63 : vector<1x1x512xf32> to vector<1x512xf32>
    %65 = vector.broadcast %64 : vector<1x512xf32> to vector<8x512xf32>
    %66 = arith.mulf %62, %65 : vector<8x512xf32>
    %c497_i32 = arith.constant 497 : i32
    %67 = tpu.dynamic_rotate %38 by %c497_i32 dim 1 : vector<8x512xf32>, i32 -> vector<8x512xf32>
    %c16 = arith.constant 16 : index
    %c0_34 = arith.constant 0 : index
    %c0_35 = arith.constant 0 : index
    %68 = vector.load %arg19[%c16, %c0_34, %c0_35] : memref<25x1x512xf32, #tpu.memory_space<vmem>>, vector<1x1x512xf32>
    %69 = vector.shape_cast %68 : vector<1x1x512xf32> to vector<1x512xf32>
    %70 = vector.broadcast %69 : vector<1x512xf32> to vector<8x512xf32>
    %71 = arith.mulf %67, %70 : vector<8x512xf32>
    %c496_i32 = arith.constant 496 : i32
    %72 = tpu.dynamic_rotate %38 by %c496_i32 dim 1 : vector<8x512xf32>, i32 -> vector<8x512xf32>
    %c17 = arith.constant 17 : index
    %c0_36 = arith.constant 0 : index
    %c0_37 = arith.constant 0 : index
    %73 = vector.load %arg19[%c17, %c0_36, %c0_37] : memref<25x1x512xf32, #tpu.memory_space<vmem>>, vector<1x1x512xf32>
    %74 = vector.shape_cast %73 : vector<1x1x512xf32> to vector<1x512xf32>
    %75 = vector.broadcast %74 : vector<1x512xf32> to vector<8x512xf32>
    %76 = arith.mulf %72, %75 : vector<8x512xf32>
    %c495_i32 = arith.constant 495 : i32
    %77 = tpu.dynamic_rotate %38 by %c495_i32 dim 1 : vector<8x512xf32>, i32 -> vector<8x512xf32>
    %c18 = arith.constant 18 : index
    %c0_38 = arith.constant 0 : index
    %c0_39 = arith.constant 0 : index
    %78 = vector.load %arg19[%c18, %c0_38, %c0_39] : memref<25x1x512xf32, #tpu.memory_space<vmem>>, vector<1x1x512xf32>
    %79 = vector.shape_cast %78 : vector<1x1x512xf32> to vector<1x512xf32>
    %80 = vector.broadcast %79 : vector<1x512xf32> to vector<8x512xf32>
    %81 = arith.mulf %77, %80 : vector<8x512xf32>
    %82 = tpu.concatenate %46, %51, %56, %61, %38, %66, %71, %76, %81 in 0 : vector<8x512xf32>, vector<8x512xf32>, vector<8x512xf32>, vector<8x512xf32>, vector<8x512xf32>, vector<8x512xf32>, vector<8x512xf32>, vector<8x512xf32>, vector<8x512xf32> -> vector<72x512xf32>
    %c0_40 = arith.constant 0 : index
    %c0_41 = arith.constant 0 : index
    %83 = vector.load %arg7[%c0_40, %c0_41] : memref<8x72xbf16, #tpu.memory_space<vmem>>, vector<8x72xbf16>
    %84 = arith.truncf %82 : vector<72x512xf32> to vector<72x512xbf16>
    %cst_42 = arith.constant dense<0.000000e+00> : vector<8x512xf32>
    %85 = tpu.matmul %83, %84, %cst_42 {dimension_numbers = #tpu.dot_dimension_numbers<[1], [0], [0], [1], [0, 0, 1, 1], [], []>} : vector<8x72xbf16>, vector<72x512xbf16>, vector<8x512xf32> -> vector<8x512xf32>
    %c0_43 = arith.constant 0 : index
    %c0_44 = arith.constant 0 : index
    %86 = vector.load %arg8[%c0_43, %c0_44] : memref<8x1xf32, #tpu.memory_space<vmem>>, vector<8x1xf32>
    %87 = vector.broadcast %86 : vector<8x1xf32> to vector<8x512xf32>
    %88 = arith.addf %85, %87 : vector<8x512xf32>
    %c34_i32 = arith.constant 34 : i32
    %89 = tpu.dynamic_rotate %39 by %c34_i32 dim 1 : vector<8x512xf32>, i32 -> vector<8x512xf32>
    %c0_45 = arith.constant 0 : index
    %c0_46 = arith.constant 0 : index
    %c0_47 = arith.constant 0 : index
    %90 = vector.load %arg19[%c0_45, %c0_46, %c0_47] : memref<25x1x512xf32, #tpu.memory_space<vmem>>, vector<1x1x512xf32>
    %91 = vector.shape_cast %90 : vector<1x1x512xf32> to vector<1x512xf32>
    %92 = vector.broadcast %91 : vector<1x512xf32> to vector<8x512xf32>
    %93 = arith.mulf %89, %92 : vector<8x512xf32>
    %c33_i32 = arith.constant 33 : i32
    %94 = tpu.dynamic_rotate %39 by %c33_i32 dim 1 : vector<8x512xf32>, i32 -> vector<8x512xf32>
    %c1_48 = arith.constant 1 : index
    %c0_49 = arith.constant 0 : index
    %c0_50 = arith.constant 0 : index
    %95 = vector.load %arg19[%c1_48, %c0_49, %c0_50] : memref<25x1x512xf32, #tpu.memory_space<vmem>>, vector<1x1x512xf32>
    %96 = vector.shape_cast %95 : vector<1x1x512xf32> to vector<1x512xf32>
    %97 = vector.broadcast %96 : vector<1x512xf32> to vector<8x512xf32>
    %98 = arith.mulf %94, %97 : vector<8x512xf32>
    %c32_i32 = arith.constant 32 : i32
    %99 = tpu.dynamic_rotate %39 by %c32_i32 dim 1 : vector<8x512xf32>, i32 -> vector<8x512xf32>
    %c2_51 = arith.constant 2 : index
    %c0_52 = arith.constant 0 : index
    %c0_53 = arith.constant 0 : index
    %100 = vector.load %arg19[%c2_51, %c0_52, %c0_53] : memref<25x1x512xf32, #tpu.memory_space<vmem>>, vector<1x1x512xf32>
    %101 = vector.shape_cast %100 : vector<1x1x512xf32> to vector<1x512xf32>
    %102 = vector.broadcast %101 : vector<1x512xf32> to vector<8x512xf32>
    %103 = arith.mulf %99, %102 : vector<8x512xf32>
    %c31_i32 = arith.constant 31 : i32
    %104 = tpu.dynamic_rotate %39 by %c31_i32 dim 1 : vector<8x512xf32>, i32 -> vector<8x512xf32>
    %c3_54 = arith.constant 3 : index
    %c0_55 = arith.constant 0 : index
    %c0_56 = arith.constant 0 : index
    %105 = vector.load %arg19[%c3_54, %c0_55, %c0_56] : memref<25x1x512xf32, #tpu.memory_space<vmem>>, vector<1x1x512xf32>
    %106 = vector.shape_cast %105 : vector<1x1x512xf32> to vector<1x512xf32>
    %107 = vector.broadcast %106 : vector<1x512xf32> to vector<8x512xf32>
    %108 = arith.mulf %104, %107 : vector<8x512xf32>
    %c30_i32 = arith.constant 30 : i32
    %109 = tpu.dynamic_rotate %39 by %c30_i32 dim 1 : vector<8x512xf32>, i32 -> vector<8x512xf32>
    %c4 = arith.constant 4 : index
    %c0_57 = arith.constant 0 : index
    %c0_58 = arith.constant 0 : index
    %110 = vector.load %arg19[%c4, %c0_57, %c0_58] : memref<25x1x512xf32, #tpu.memory_space<vmem>>, vector<1x1x512xf32>
    %111 = vector.shape_cast %110 : vector<1x1x512xf32> to vector<1x512xf32>
    %112 = vector.broadcast %111 : vector<1x512xf32> to vector<8x512xf32>
    %113 = arith.mulf %109, %112 : vector<8x512xf32>
    %c18_i32 = arith.constant 18 : i32
    %114 = tpu.dynamic_rotate %39 by %c18_i32 dim 1 : vector<8x512xf32>, i32 -> vector<8x512xf32>
    %c5 = arith.constant 5 : index
    %c0_59 = arith.constant 0 : index
    %c0_60 = arith.constant 0 : index
    %115 = vector.load %arg19[%c5, %c0_59, %c0_60] : memref<25x1x512xf32, #tpu.memory_space<vmem>>, vector<1x1x512xf32>
    %116 = vector.shape_cast %115 : vector<1x1x512xf32> to vector<1x512xf32>
    %117 = vector.broadcast %116 : vector<1x512xf32> to vector<8x512xf32>
    %118 = arith.mulf %114, %117 : vector<8x512xf32>
    %c17_i32_61 = arith.constant 17 : i32
    %119 = tpu.dynamic_rotate %39 by %c17_i32_61 dim 1 : vector<8x512xf32>, i32 -> vector<8x512xf32>
    %c6_62 = arith.constant 6 : index
    %c0_63 = arith.constant 0 : index
    %c0_64 = arith.constant 0 : index
    %120 = vector.load %arg19[%c6_62, %c0_63, %c0_64] : memref<25x1x512xf32, #tpu.memory_space<vmem>>, vector<1x1x512xf32>
    %121 = vector.shape_cast %120 : vector<1x1x512xf32> to vector<1x512xf32>
    %122 = vector.broadcast %121 : vector<1x512xf32> to vector<8x512xf32>
    %123 = arith.mulf %119, %122 : vector<8x512xf32>
    %c16_i32_65 = arith.constant 16 : i32
    %124 = tpu.dynamic_rotate %39 by %c16_i32_65 dim 1 : vector<8x512xf32>, i32 -> vector<8x512xf32>
    %c7_66 = arith.constant 7 : index
    %c0_67 = arith.constant 0 : index
    %c0_68 = arith.constant 0 : index
    %125 = vector.load %arg19[%c7_66, %c0_67, %c0_68] : memref<25x1x512xf32, #tpu.memory_space<vmem>>, vector<1x1x512xf32>
    %126 = vector.shape_cast %125 : vector<1x1x512xf32> to vector<1x512xf32>
    %127 = vector.broadcast %126 : vector<1x512xf32> to vector<8x512xf32>
    %128 = arith.mulf %124, %127 : vector<8x512xf32>
    %c15_i32_69 = arith.constant 15 : i32
    %129 = tpu.dynamic_rotate %39 by %c15_i32_69 dim 1 : vector<8x512xf32>, i32 -> vector<8x512xf32>
    %c8_70 = arith.constant 8 : index
    %c0_71 = arith.constant 0 : index
    %c0_72 = arith.constant 0 : index
    %130 = vector.load %arg19[%c8_70, %c0_71, %c0_72] : memref<25x1x512xf32, #tpu.memory_space<vmem>>, vector<1x1x512xf32>
    %131 = vector.shape_cast %130 : vector<1x1x512xf32> to vector<1x512xf32>
    %132 = vector.broadcast %131 : vector<1x512xf32> to vector<8x512xf32>
    %133 = arith.mulf %129, %132 : vector<8x512xf32>
    %c14_i32 = arith.constant 14 : i32
    %134 = tpu.dynamic_rotate %39 by %c14_i32 dim 1 : vector<8x512xf32>, i32 -> vector<8x512xf32>
    %c9 = arith.constant 9 : index
    %c0_73 = arith.constant 0 : index
    %c0_74 = arith.constant 0 : index
    %135 = vector.load %arg19[%c9, %c0_73, %c0_74] : memref<25x1x512xf32, #tpu.memory_space<vmem>>, vector<1x1x512xf32>
    %136 = vector.shape_cast %135 : vector<1x1x512xf32> to vector<1x512xf32>
    %137 = vector.broadcast %136 : vector<1x512xf32> to vector<8x512xf32>
    %138 = arith.mulf %134, %137 : vector<8x512xf32>
    %c2_i32 = arith.constant 2 : i32
    %139 = tpu.dynamic_rotate %39 by %c2_i32 dim 1 : vector<8x512xf32>, i32 -> vector<8x512xf32>
    %c10 = arith.constant 10 : index
    %c0_75 = arith.constant 0 : index
    %c0_76 = arith.constant 0 : index
    %140 = vector.load %arg19[%c10, %c0_75, %c0_76] : memref<25x1x512xf32, #tpu.memory_space<vmem>>, vector<1x1x512xf32>
    %141 = vector.shape_cast %140 : vector<1x1x512xf32> to vector<1x512xf32>
    %142 = vector.broadcast %141 : vector<1x512xf32> to vector<8x512xf32>
    %143 = arith.mulf %139, %142 : vector<8x512xf32>
    %c1_i32_77 = arith.constant 1 : i32
    %144 = tpu.dynamic_rotate %39 by %c1_i32_77 dim 1 : vector<8x512xf32>, i32 -> vector<8x512xf32>
    %c11_78 = arith.constant 11 : index
    %c0_79 = arith.constant 0 : index
    %c0_80 = arith.constant 0 : index
    %145 = vector.load %arg19[%c11_78, %c0_79, %c0_80] : memref<25x1x512xf32, #tpu.memory_space<vmem>>, vector<1x1x512xf32>
    %146 = vector.shape_cast %145 : vector<1x1x512xf32> to vector<1x512xf32>
    %147 = vector.broadcast %146 : vector<1x512xf32> to vector<8x512xf32>
    %148 = arith.mulf %144, %147 : vector<8x512xf32>
    %c511_i32_81 = arith.constant 511 : i32
    %149 = tpu.dynamic_rotate %39 by %c511_i32_81 dim 1 : vector<8x512xf32>, i32 -> vector<8x512xf32>
    %c13_82 = arith.constant 13 : index
    %c0_83 = arith.constant 0 : index
    %c0_84 = arith.constant 0 : index
    %150 = vector.load %arg19[%c13_82, %c0_83, %c0_84] : memref<25x1x512xf32, #tpu.memory_space<vmem>>, vector<1x1x512xf32>
    %151 = vector.shape_cast %150 : vector<1x1x512xf32> to vector<1x512xf32>
    %152 = vector.broadcast %151 : vector<1x512xf32> to vector<8x512xf32>
    %153 = arith.mulf %149, %152 : vector<8x512xf32>
    %c510_i32 = arith.constant 510 : i32
    %154 = tpu.dynamic_rotate %39 by %c510_i32 dim 1 : vector<8x512xf32>, i32 -> vector<8x512xf32>
    %c14 = arith.constant 14 : index
    %c0_85 = arith.constant 0 : index
    %c0_86 = arith.constant 0 : index
    %155 = vector.load %arg19[%c14, %c0_85, %c0_86] : memref<25x1x512xf32, #tpu.memory_space<vmem>>, vector<1x1x512xf32>
    %156 = vector.shape_cast %155 : vector<1x1x512xf32> to vector<1x512xf32>
    %157 = vector.broadcast %156 : vector<1x512xf32> to vector<8x512xf32>
    %158 = arith.mulf %154, %157 : vector<8x512xf32>
    %c498_i32 = arith.constant 498 : i32
    %159 = tpu.dynamic_rotate %39 by %c498_i32 dim 1 : vector<8x512xf32>, i32 -> vector<8x512xf32>
    %c15 = arith.constant 15 : index
    %c0_87 = arith.constant 0 : index
    %c0_88 = arith.constant 0 : index
    %160 = vector.load %arg19[%c15, %c0_87, %c0_88] : memref<25x1x512xf32, #tpu.memory_space<vmem>>, vector<1x1x512xf32>
    %161 = vector.shape_cast %160 : vector<1x1x512xf32> to vector<1x512xf32>
    %162 = vector.broadcast %161 : vector<1x512xf32> to vector<8x512xf32>
    %163 = arith.mulf %159, %162 : vector<8x512xf32>
    %c497_i32_89 = arith.constant 497 : i32
    %164 = tpu.dynamic_rotate %39 by %c497_i32_89 dim 1 : vector<8x512xf32>, i32 -> vector<8x512xf32>
    %c16_90 = arith.constant 16 : index
    %c0_91 = arith.constant 0 : index
    %c0_92 = arith.constant 0 : index
    %165 = vector.load %arg19[%c16_90, %c0_91, %c0_92] : memref<25x1x512xf32, #tpu.memory_space<vmem>>, vector<1x1x512xf32>
    %166 = vector.shape_cast %165 : vector<1x1x512xf32> to vector<1x512xf32>
    %167 = vector.broadcast %166 : vector<1x512xf32> to vector<8x512xf32>
    %168 = arith.mulf %164, %167 : vector<8x512xf32>
    %c496_i32_93 = arith.constant 496 : i32
    %169 = tpu.dynamic_rotate %39 by %c496_i32_93 dim 1 : vector<8x512xf32>, i32 -> vector<8x512xf32>
    %c17_94 = arith.constant 17 : index
    %c0_95 = arith.constant 0 : index
    %c0_96 = arith.constant 0 : index
    %170 = vector.load %arg19[%c17_94, %c0_95, %c0_96] : memref<25x1x512xf32, #tpu.memory_space<vmem>>, vector<1x1x512xf32>
    %171 = vector.shape_cast %170 : vector<1x1x512xf32> to vector<1x512xf32>
    %172 = vector.broadcast %171 : vector<1x512xf32> to vector<8x512xf32>
    %173 = arith.mulf %169, %172 : vector<8x512xf32>
    %c495_i32_97 = arith.constant 495 : i32
    %174 = tpu.dynamic_rotate %39 by %c495_i32_97 dim 1 : vector<8x512xf32>, i32 -> vector<8x512xf32>
    %c18_98 = arith.constant 18 : index
    %c0_99 = arith.constant 0 : index
    %c0_100 = arith.constant 0 : index
    %175 = vector.load %arg19[%c18_98, %c0_99, %c0_100] : memref<25x1x512xf32, #tpu.memory_space<vmem>>, vector<1x1x512xf32>
    %176 = vector.shape_cast %175 : vector<1x1x512xf32> to vector<1x512xf32>
    %177 = vector.broadcast %176 : vector<1x512xf32> to vector<8x512xf32>
    %178 = arith.mulf %174, %177 : vector<8x512xf32>
    %c494_i32 = arith.constant 494 : i32
    %179 = tpu.dynamic_rotate %39 by %c494_i32 dim 1 : vector<8x512xf32>, i32 -> vector<8x512xf32>
    %c19 = arith.constant 19 : index
    %c0_101 = arith.constant 0 : index
    %c0_102 = arith.constant 0 : index
    %180 = vector.load %arg19[%c19, %c0_101, %c0_102] : memref<25x1x512xf32, #tpu.memory_space<vmem>>, vector<1x1x512xf32>
    %181 = vector.shape_cast %180 : vector<1x1x512xf32> to vector<1x512xf32>
    %182 = vector.broadcast %181 : vector<1x512xf32> to vector<8x512xf32>
    %183 = arith.mulf %179, %182 : vector<8x512xf32>
    %c482_i32 = arith.constant 482 : i32
    %184 = tpu.dynamic_rotate %39 by %c482_i32 dim 1 : vector<8x512xf32>, i32 -> vector<8x512xf32>
    %c20 = arith.constant 20 : index
    %c0_103 = arith.constant 0 : index
    %c0_104 = arith.constant 0 : index
    %185 = vector.load %arg19[%c20, %c0_103, %c0_104] : memref<25x1x512xf32, #tpu.memory_space<vmem>>, vector<1x1x512xf32>
    %186 = vector.shape_cast %185 : vector<1x1x512xf32> to vector<1x512xf32>
    %187 = vector.broadcast %186 : vector<1x512xf32> to vector<8x512xf32>
    %188 = arith.mulf %184, %187 : vector<8x512xf32>
    %c481_i32 = arith.constant 481 : i32
    %189 = tpu.dynamic_rotate %39 by %c481_i32 dim 1 : vector<8x512xf32>, i32 -> vector<8x512xf32>
    %c21 = arith.constant 21 : index
    %c0_105 = arith.constant 0 : index
    %c0_106 = arith.constant 0 : index
    %190 = vector.load %arg19[%c21, %c0_105, %c0_106] : memref<25x1x512xf32, #tpu.memory_space<vmem>>, vector<1x1x512xf32>
    %191 = vector.shape_cast %190 : vector<1x1x512xf32> to vector<1x512xf32>
    %192 = vector.broadcast %191 : vector<1x512xf32> to vector<8x512xf32>
    %193 = arith.mulf %189, %192 : vector<8x512xf32>
    %c480_i32 = arith.constant 480 : i32
    %194 = tpu.dynamic_rotate %39 by %c480_i32 dim 1 : vector<8x512xf32>, i32 -> vector<8x512xf32>
    %c22 = arith.constant 22 : index
    %c0_107 = arith.constant 0 : index
    %c0_108 = arith.constant 0 : index
    %195 = vector.load %arg19[%c22, %c0_107, %c0_108] : memref<25x1x512xf32, #tpu.memory_space<vmem>>, vector<1x1x512xf32>
    %196 = vector.shape_cast %195 : vector<1x1x512xf32> to vector<1x512xf32>
    %197 = vector.broadcast %196 : vector<1x512xf32> to vector<8x512xf32>
    %198 = arith.mulf %194, %197 : vector<8x512xf32>
    %c479_i32 = arith.constant 479 : i32
    %199 = tpu.dynamic_rotate %39 by %c479_i32 dim 1 : vector<8x512xf32>, i32 -> vector<8x512xf32>
    %c23 = arith.constant 23 : index
    %c0_109 = arith.constant 0 : index
    %c0_110 = arith.constant 0 : index
    %200 = vector.load %arg19[%c23, %c0_109, %c0_110] : memref<25x1x512xf32, #tpu.memory_space<vmem>>, vector<1x1x512xf32>
    %201 = vector.shape_cast %200 : vector<1x1x512xf32> to vector<1x512xf32>
    %202 = vector.broadcast %201 : vector<1x512xf32> to vector<8x512xf32>
    %203 = arith.mulf %199, %202 : vector<8x512xf32>
    %c478_i32 = arith.constant 478 : i32
    %204 = tpu.dynamic_rotate %39 by %c478_i32 dim 1 : vector<8x512xf32>, i32 -> vector<8x512xf32>
    %c24 = arith.constant 24 : index
    %c0_111 = arith.constant 0 : index
    %c0_112 = arith.constant 0 : index
    %205 = vector.load %arg19[%c24, %c0_111, %c0_112] : memref<25x1x512xf32, #tpu.memory_space<vmem>>, vector<1x1x512xf32>
    %206 = vector.shape_cast %205 : vector<1x1x512xf32> to vector<1x512xf32>
    %207 = vector.broadcast %206 : vector<1x512xf32> to vector<8x512xf32>
    %208 = arith.mulf %204, %207 : vector<8x512xf32>
    %209 = tpu.concatenate %93, %98, %103, %108, %113, %118, %123, %128, %133, %138, %143, %148, %39, %153, %158, %163 in 0 : vector<8x512xf32>, vector<8x512xf32>, vector<8x512xf32>, vector<8x512xf32>, vector<8x512xf32>, vector<8x512xf32>, vector<8x512xf32>, vector<8x512xf32>, vector<8x512xf32>, vector<8x512xf32>, vector<8x512xf32>, vector<8x512xf32>, vector<8x512xf32>, vector<8x512xf32>, vector<8x512xf32>, vector<8x512xf32> -> vector<128x512xf32>
    %210 = tpu.concatenate %168, %173, %178, %183, %188, %193, %198, %203, %208 in 0 : vector<8x512xf32>, vector<8x512xf32>, vector<8x512xf32>, vector<8x512xf32>, vector<8x512xf32>, vector<8x512xf32>, vector<8x512xf32>, vector<8x512xf32>, vector<8x512xf32> -> vector<72x512xf32>
    %211 = tpu.concatenate %209, %210 in 0 : vector<128x512xf32>, vector<72x512xf32> -> vector<200x512xf32>
    %c0_113 = arith.constant 0 : index
    %c0_114 = arith.constant 0 : index
    %212 = vector.load %arg9[%c0_113, %c0_114] : memref<8x200xbf16, #tpu.memory_space<vmem>>, vector<8x200xbf16>
    %213 = arith.truncf %211 : vector<200x512xf32> to vector<200x512xbf16>
    %cst_115 = arith.constant dense<0.000000e+00> : vector<8x512xf32>
    %214 = tpu.matmul %212, %213, %cst_115 {dimension_numbers = #tpu.dot_dimension_numbers<[1], [0], [0], [1], [0, 0, 1, 1], [], []>} : vector<8x200xbf16>, vector<200x512xbf16>, vector<8x512xf32> -> vector<8x512xf32>
    %c0_116 = arith.constant 0 : index
    %c0_117 = arith.constant 0 : index
    %215 = vector.load %arg10[%c0_116, %c0_117] : memref<8x1xf32, #tpu.memory_space<vmem>>, vector<8x1xf32>
    %216 = vector.broadcast %215 : vector<8x1xf32> to vector<8x512xf32>
    %217 = arith.addf %214, %216 : vector<8x512xf32>
    %cst_118 = arith.constant 0.000000e+00 : f32
    %218 = vector.broadcast %cst_118 : f32 to vector<2x512xf32>
    %c16_i32_119 = arith.constant 16 : i32
    %219 = tpu.dynamic_rotate %40 by %c16_i32_119 dim 1 : vector<8x512xf32>, i32 -> vector<8x512xf32>
    %c7_120 = arith.constant 7 : index
    %c0_121 = arith.constant 0 : index
    %c0_122 = arith.constant 0 : index
    %220 = vector.load %arg19[%c7_120, %c0_121, %c0_122] : memref<25x1x512xf32, #tpu.memory_space<vmem>>, vector<1x1x512xf32>
    %221 = vector.shape_cast %220 : vector<1x1x512xf32> to vector<1x512xf32>
    %222 = vector.broadcast %221 : vector<1x512xf32> to vector<8x512xf32>
    %223 = arith.mulf %219, %222 : vector<8x512xf32>
    %c0_123 = arith.constant 0 : index
    %c0_124 = arith.constant 0 : index
    %c0_125 = arith.constant 0 : index
    %c0_126 = arith.constant 0 : index
    %224 = vector.load %arg11[%c0_123, %c0_124, %c0_125, %c0_126] : memref<3x2x2x512xf32, #tpu.memory_space<vmem>>, vector<1x2x2x512xf32>
    %225 = vector.shape_cast %224 : vector<1x2x2x512xf32> to vector<2x2x512xf32>
    %226 = vector.extract_strided_slice %225 {offsets = [0, 0, 0], sizes = [2, 1, 512], strides = [1, 1, 1]} : vector<2x2x512xf32> to vector<2x1x512xf32>
    %227 = vector.shape_cast %226 : vector<2x1x512xf32> to vector<2x512xf32>
    %228 = vector.extract_strided_slice %223 {offsets = [0, 0], sizes = [1, 512], strides = [1, 1]} : vector<8x512xf32> to vector<1x512xf32>
    %229 = vector.broadcast %228 : vector<1x512xf32> to vector<2x512xf32>
    %230 = arith.mulf %227, %229 : vector<2x512xf32>
    %231 = arith.addf %218, %230 : vector<2x512xf32>
    %232 = vector.extract_strided_slice %225 {offsets = [0, 1, 0], sizes = [2, 1, 512], strides = [1, 1, 1]} : vector<2x2x512xf32> to vector<2x1x512xf32>
    %233 = vector.shape_cast %232 : vector<2x1x512xf32> to vector<2x512xf32>
    %234 = vector.extract_strided_slice %223 {offsets = [1, 0], sizes = [1, 512], strides = [1, 1]} : vector<8x512xf32> to vector<1x512xf32>
    %235 = vector.broadcast %234 : vector<1x512xf32> to vector<2x512xf32>
    %236 = arith.mulf %233, %235 : vector<2x512xf32>
    %237 = arith.addf %231, %236 : vector<2x512xf32>
    %c1_127 = arith.constant 1 : index
    %c0_128 = arith.constant 0 : index
    %c0_129 = arith.constant 0 : index
    %c0_130 = arith.constant 0 : index
    %238 = vector.load %arg11[%c1_127, %c0_128, %c0_129, %c0_130] : memref<3x2x2x512xf32, #tpu.memory_space<vmem>>, vector<1x2x2x512xf32>
    %239 = vector.shape_cast %238 : vector<1x2x2x512xf32> to vector<2x2x512xf32>
    %240 = vector.extract_strided_slice %239 {offsets = [0, 0, 0], sizes = [2, 1, 512], strides = [1, 1, 1]} : vector<2x2x512xf32> to vector<2x1x512xf32>
    %241 = vector.shape_cast %240 : vector<2x1x512xf32> to vector<2x512xf32>
    %242 = vector.extract_strided_slice %40 {offsets = [0, 0], sizes = [1, 512], strides = [1, 1]} : vector<8x512xf32> to vector<1x512xf32>
    %243 = vector.broadcast %242 : vector<1x512xf32> to vector<2x512xf32>
    %244 = arith.mulf %241, %243 : vector<2x512xf32>
    %245 = arith.addf %237, %244 : vector<2x512xf32>
    %246 = vector.extract_strided_slice %239 {offsets = [0, 1, 0], sizes = [2, 1, 512], strides = [1, 1, 1]} : vector<2x2x512xf32> to vector<2x1x512xf32>
    %247 = vector.shape_cast %246 : vector<2x1x512xf32> to vector<2x512xf32>
    %248 = vector.extract_strided_slice %40 {offsets = [1, 0], sizes = [1, 512], strides = [1, 1]} : vector<8x512xf32> to vector<1x512xf32>
    %249 = vector.broadcast %248 : vector<1x512xf32> to vector<2x512xf32>
    %250 = arith.mulf %247, %249 : vector<2x512xf32>
    %251 = arith.addf %245, %250 : vector<2x512xf32>
    %c496_i32_131 = arith.constant 496 : i32
    %252 = tpu.dynamic_rotate %40 by %c496_i32_131 dim 1 : vector<8x512xf32>, i32 -> vector<8x512xf32>
    %c17_132 = arith.constant 17 : index
    %c0_133 = arith.constant 0 : index
    %c0_134 = arith.constant 0 : index
    %253 = vector.load %arg19[%c17_132, %c0_133, %c0_134] : memref<25x1x512xf32, #tpu.memory_space<vmem>>, vector<1x1x512xf32>
    %254 = vector.shape_cast %253 : vector<1x1x512xf32> to vector<1x512xf32>
    %255 = vector.broadcast %254 : vector<1x512xf32> to vector<8x512xf32>
    %256 = arith.mulf %252, %255 : vector<8x512xf32>
    %c2_135 = arith.constant 2 : index
    %c0_136 = arith.constant 0 : index
    %c0_137 = arith.constant 0 : index
    %c0_138 = arith.constant 0 : index
    %257 = vector.load %arg11[%c2_135, %c0_136, %c0_137, %c0_138] : memref<3x2x2x512xf32, #tpu.memory_space<vmem>>, vector<1x2x2x512xf32>
    %258 = vector.shape_cast %257 : vector<1x2x2x512xf32> to vector<2x2x512xf32>
    %259 = vector.extract_strided_slice %258 {offsets = [0, 0, 0], sizes = [2, 1, 512], strides = [1, 1, 1]} : vector<2x2x512xf32> to vector<2x1x512xf32>
    %260 = vector.shape_cast %259 : vector<2x1x512xf32> to vector<2x512xf32>
    %261 = vector.extract_strided_slice %256 {offsets = [0, 0], sizes = [1, 512], strides = [1, 1]} : vector<8x512xf32> to vector<1x512xf32>
    %262 = vector.broadcast %261 : vector<1x512xf32> to vector<2x512xf32>
    %263 = arith.mulf %260, %262 : vector<2x512xf32>
    %264 = arith.addf %251, %263 : vector<2x512xf32>
    %265 = vector.extract_strided_slice %258 {offsets = [0, 1, 0], sizes = [2, 1, 512], strides = [1, 1, 1]} : vector<2x2x512xf32> to vector<2x1x512xf32>
    %266 = vector.shape_cast %265 : vector<2x1x512xf32> to vector<2x512xf32>
    %267 = vector.extract_strided_slice %256 {offsets = [1, 0], sizes = [1, 512], strides = [1, 1]} : vector<8x512xf32> to vector<1x512xf32>
    %268 = vector.broadcast %267 : vector<1x512xf32> to vector<2x512xf32>
    %269 = arith.mulf %266, %268 : vector<2x512xf32>
    %270 = arith.addf %264, %269 : vector<2x512xf32>
    %271 = arith.truncf %270 : vector<2x512xf32> to vector<2x512xbf16>
    %c0_139 = arith.constant 0 : index
    %c0_140 = arith.constant 0 : index
    %272 = vector.load %arg15[%c0_139, %c0_140] : memref<512x32xbf16, #tpu.memory_space<vmem>>, vector<512x32xbf16>
    %cst_141 = arith.constant dense<0.000000e+00> : vector<2x32xf32>
    %273 = tpu.matmul %271, %272, %cst_141 {dimension_numbers = #tpu.dot_dimension_numbers<[1], [0], [0], [1], [0, 0, 1, 1], [], []>} : vector<2x512xbf16>, vector<512x32xbf16>, vector<2x32xf32> -> vector<2x32xf32>
    %274 = arith.truncf %273 : vector<2x32xf32> to vector<2x32xbf16>
    %c0_142 = arith.constant 0 : index
    %c0_143 = arith.constant 0 : index
    %275 = vector.load %arg16[%c0_142, %c0_143] : memref<32x512xbf16, #tpu.memory_space<vmem>>, vector<32x512xbf16>
    %cst_144 = arith.constant dense<0.000000e+00> : vector<2x512xf32>
    %276 = tpu.matmul %274, %275, %cst_144 {dimension_numbers = #tpu.dot_dimension_numbers<[1], [0], [0], [1], [0, 0, 1, 1], [], []>} : vector<2x32xbf16>, vector<32x512xbf16>, vector<2x512xf32> -> vector<2x512xf32>
    %c0_145 = arith.constant 0 : index
    %c0_146 = arith.constant 0 : index
    %277 = vector.load %arg12[%c0_145, %c0_146] : memref<2x1xf32, #tpu.memory_space<vmem>>, vector<2x1xf32>
    %278 = vector.broadcast %277 : vector<2x1xf32> to vector<2x512xf32>
    %279 = arith.addf %276, %278 : vector<2x512xf32>
    %cst_147 = arith.constant 0.000000e+00 : f32
    %280 = vector.broadcast %cst_147 : f32 to vector<2x512xf32>
    %c1_i32_148 = arith.constant 1 : i32
    %281 = tpu.dynamic_rotate %41 by %c1_i32_148 dim 1 : vector<8x512xf32>, i32 -> vector<8x512xf32>
    %c11_149 = arith.constant 11 : index
    %c0_150 = arith.constant 0 : index
    %c0_151 = arith.constant 0 : index
    %282 = vector.load %arg19[%c11_149, %c0_150, %c0_151] : memref<25x1x512xf32, #tpu.memory_space<vmem>>, vector<1x1x512xf32>
    %283 = vector.shape_cast %282 : vector<1x1x512xf32> to vector<1x512xf32>
    %284 = vector.broadcast %283 : vector<1x512xf32> to vector<8x512xf32>
    %285 = arith.mulf %281, %284 : vector<8x512xf32>
    %c0_152 = arith.constant 0 : index
    %c0_153 = arith.constant 0 : index
    %c0_154 = arith.constant 0 : index
    %c0_155 = arith.constant 0 : index
    %286 = vector.load %arg13[%c0_152, %c0_153, %c0_154, %c0_155] : memref<3x2x2x512xf32, #tpu.memory_space<vmem>>, vector<1x2x2x512xf32>
    %287 = vector.shape_cast %286 : vector<1x2x2x512xf32> to vector<2x2x512xf32>
    %288 = vector.extract_strided_slice %287 {offsets = [0, 0, 0], sizes = [2, 1, 512], strides = [1, 1, 1]} : vector<2x2x512xf32> to vector<2x1x512xf32>
    %289 = vector.shape_cast %288 : vector<2x1x512xf32> to vector<2x512xf32>
    %290 = vector.extract_strided_slice %285 {offsets = [0, 0], sizes = [1, 512], strides = [1, 1]} : vector<8x512xf32> to vector<1x512xf32>
    %291 = vector.broadcast %290 : vector<1x512xf32> to vector<2x512xf32>
    %292 = arith.mulf %289, %291 : vector<2x512xf32>
    %293 = arith.addf %280, %292 : vector<2x512xf32>
    %294 = vector.extract_strided_slice %287 {offsets = [0, 1, 0], sizes = [2, 1, 512], strides = [1, 1, 1]} : vector<2x2x512xf32> to vector<2x1x512xf32>
    %295 = vector.shape_cast %294 : vector<2x1x512xf32> to vector<2x512xf32>
    %296 = vector.extract_strided_slice %285 {offsets = [1, 0], sizes = [1, 512], strides = [1, 1]} : vector<8x512xf32> to vector<1x512xf32>
    %297 = vector.broadcast %296 : vector<1x512xf32> to vector<2x512xf32>
    %298 = arith.mulf %295, %297 : vector<2x512xf32>
    %299 = arith.addf %293, %298 : vector<2x512xf32>
    %c1_156 = arith.constant 1 : index
    %c0_157 = arith.constant 0 : index
    %c0_158 = arith.constant 0 : index
    %c0_159 = arith.constant 0 : index
    %300 = vector.load %arg13[%c1_156, %c0_157, %c0_158, %c0_159] : memref<3x2x2x512xf32, #tpu.memory_space<vmem>>, vector<1x2x2x512xf32>
    %301 = vector.shape_cast %300 : vector<1x2x2x512xf32> to vector<2x2x512xf32>
    %302 = vector.extract_strided_slice %301 {offsets = [0, 0, 0], sizes = [2, 1, 512], strides = [1, 1, 1]} : vector<2x2x512xf32> to vector<2x1x512xf32>
    %303 = vector.shape_cast %302 : vector<2x1x512xf32> to vector<2x512xf32>
    %304 = vector.extract_strided_slice %41 {offsets = [0, 0], sizes = [1, 512], strides = [1, 1]} : vector<8x512xf32> to vector<1x512xf32>
    %305 = vector.broadcast %304 : vector<1x512xf32> to vector<2x512xf32>
    %306 = arith.mulf %303, %305 : vector<2x512xf32>
    %307 = arith.addf %299, %306 : vector<2x512xf32>
    %308 = vector.extract_strided_slice %301 {offsets = [0, 1, 0], sizes = [2, 1, 512], strides = [1, 1, 1]} : vector<2x2x512xf32> to vector<2x1x512xf32>
    %309 = vector.shape_cast %308 : vector<2x1x512xf32> to vector<2x512xf32>
    %310 = vector.extract_strided_slice %41 {offsets = [1, 0], sizes = [1, 512], strides = [1, 1]} : vector<8x512xf32> to vector<1x512xf32>
    %311 = vector.broadcast %310 : vector<1x512xf32> to vector<2x512xf32>
    %312 = arith.mulf %309, %311 : vector<2x512xf32>
    %313 = arith.addf %307, %312 : vector<2x512xf32>
    %c511_i32_160 = arith.constant 511 : i32
    %314 = tpu.dynamic_rotate %41 by %c511_i32_160 dim 1 : vector<8x512xf32>, i32 -> vector<8x512xf32>
    %c13_161 = arith.constant 13 : index
    %c0_162 = arith.constant 0 : index
    %c0_163 = arith.constant 0 : index
    %315 = vector.load %arg19[%c13_161, %c0_162, %c0_163] : memref<25x1x512xf32, #tpu.memory_space<vmem>>, vector<1x1x512xf32>
    %316 = vector.shape_cast %315 : vector<1x1x512xf32> to vector<1x512xf32>
    %317 = vector.broadcast %316 : vector<1x512xf32> to vector<8x512xf32>
    %318 = arith.mulf %314, %317 : vector<8x512xf32>
    %c2_164 = arith.constant 2 : index
    %c0_165 = arith.constant 0 : index
    %c0_166 = arith.constant 0 : index
    %c0_167 = arith.constant 0 : index
    %319 = vector.load %arg13[%c2_164, %c0_165, %c0_166, %c0_167] : memref<3x2x2x512xf32, #tpu.memory_space<vmem>>, vector<1x2x2x512xf32>
    %320 = vector.shape_cast %319 : vector<1x2x2x512xf32> to vector<2x2x512xf32>
    %321 = vector.extract_strided_slice %320 {offsets = [0, 0, 0], sizes = [2, 1, 512], strides = [1, 1, 1]} : vector<2x2x512xf32> to vector<2x1x512xf32>
    %322 = vector.shape_cast %321 : vector<2x1x512xf32> to vector<2x512xf32>
    %323 = vector.extract_strided_slice %318 {offsets = [0, 0], sizes = [1, 512], strides = [1, 1]} : vector<8x512xf32> to vector<1x512xf32>
    %324 = vector.broadcast %323 : vector<1x512xf32> to vector<2x512xf32>
    %325 = arith.mulf %322, %324 : vector<2x512xf32>
    %326 = arith.addf %313, %325 : vector<2x512xf32>
    %327 = vector.extract_strided_slice %320 {offsets = [0, 1, 0], sizes = [2, 1, 512], strides = [1, 1, 1]} : vector<2x2x512xf32> to vector<2x1x512xf32>
    %328 = vector.shape_cast %327 : vector<2x1x512xf32> to vector<2x512xf32>
    %329 = vector.extract_strided_slice %318 {offsets = [1, 0], sizes = [1, 512], strides = [1, 1]} : vector<8x512xf32> to vector<1x512xf32>
    %330 = vector.broadcast %329 : vector<1x512xf32> to vector<2x512xf32>
    %331 = arith.mulf %328, %330 : vector<2x512xf32>
    %332 = arith.addf %326, %331 : vector<2x512xf32>
    %333 = arith.truncf %332 : vector<2x512xf32> to vector<2x512xbf16>
    %c0_168 = arith.constant 0 : index
    %c0_169 = arith.constant 0 : index
    %334 = vector.load %arg17[%c0_168, %c0_169] : memref<512x32xbf16, #tpu.memory_space<vmem>>, vector<512x32xbf16>
    %cst_170 = arith.constant dense<0.000000e+00> : vector<2x32xf32>
    %335 = tpu.matmul %333, %334, %cst_170 {dimension_numbers = #tpu.dot_dimension_numbers<[1], [0], [0], [1], [0, 0, 1, 1], [], []>} : vector<2x512xbf16>, vector<512x32xbf16>, vector<2x32xf32> -> vector<2x32xf32>
    %336 = arith.truncf %335 : vector<2x32xf32> to vector<2x32xbf16>
    %c0_171 = arith.constant 0 : index
    %c0_172 = arith.constant 0 : index
    %337 = vector.load %arg18[%c0_171, %c0_172] : memref<32x512xbf16, #tpu.memory_space<vmem>>, vector<32x512xbf16>
    %cst_173 = arith.constant dense<0.000000e+00> : vector<2x512xf32>
    %338 = tpu.matmul %336, %337, %cst_173 {dimension_numbers = #tpu.dot_dimension_numbers<[1], [0], [0], [1], [0, 0, 1, 1], [], []>} : vector<2x32xbf16>, vector<32x512xbf16>, vector<2x512xf32> -> vector<2x512xf32>
    %c0_174 = arith.constant 0 : index
    %c0_175 = arith.constant 0 : index
    %339 = vector.load %arg14[%c0_174, %c0_175] : memref<2x1xf32, #tpu.memory_space<vmem>>, vector<2x1xf32>
    %340 = vector.broadcast %339 : vector<2x1xf32> to vector<2x512xf32>
    %341 = arith.addf %338, %340 : vector<2x512xf32>
    %342 = vector.extract_strided_slice %37 {offsets = [0, 0], sizes = [4, 512], strides = [1, 1]} : vector<8x512xf32> to vector<4x512xf32>
    %c0_176 = arith.constant 0 : index
    %c0_177 = arith.constant 0 : index
    %c0_178 = arith.constant 0 : index
    %343 = vector.load %arg20[%c0_176, %c0_177, %c0_178] : memref<1x16x512xf32, #tpu.memory_space<vmem>>, vector<1x4x512xf32>
    %344 = vector.shape_cast %343 : vector<1x4x512xf32> to vector<4x512xf32>
    %345 = vector.shape_cast %342 : vector<4x512xf32> to vector<1x4x512xf32>
    tpu.vector_store %arg20[%c0_176, %c0_177, %c0_178], %345 {strides = array<i32>} : memref<1x16x512xf32, #tpu.memory_space<vmem>>, vector<1x4x512xf32>,
    %346 = vector.extract_strided_slice %88 {offsets = [0, 0], sizes = [4, 512], strides = [1, 1]} : vector<8x512xf32> to vector<4x512xf32>
    %c0_179 = arith.constant 0 : index
    %c4_180 = arith.constant 4 : index
    %c0_181 = arith.constant 0 : index
    %347 = vector.load %arg20[%c0_179, %c4_180, %c0_181] : memref<1x16x512xf32, #tpu.memory_space<vmem>>, vector<1x4x512xf32>
    %348 = vector.shape_cast %347 : vector<1x4x512xf32> to vector<4x512xf32>
    %349 = vector.shape_cast %346 : vector<4x512xf32> to vector<1x4x512xf32>
    tpu.vector_store %arg20[%c0_179, %c4_180, %c0_181], %349 {strides = array<i32>} : memref<1x16x512xf32, #tpu.memory_space<vmem>>, vector<1x4x512xf32>,
    %350 = vector.extract_strided_slice %217 {offsets = [0, 0], sizes = [4, 512], strides = [1, 1]} : vector<8x512xf32> to vector<4x512xf32>
    %c0_182 = arith.constant 0 : index
    %c8_183 = arith.constant 8 : index
    %c0_184 = arith.constant 0 : index
    %351 = vector.load %arg20[%c0_182, %c8_183, %c0_184] : memref<1x16x512xf32, #tpu.memory_space<vmem>>, vector<1x4x512xf32>
    %352 = vector.shape_cast %351 : vector<1x4x512xf32> to vector<4x512xf32>
    %353 = vector.shape_cast %350 : vector<4x512xf32> to vector<1x4x512xf32>
    tpu.vector_store %arg20[%c0_182, %c8_183, %c0_184], %353 {strides = array<i32>} : memref<1x16x512xf32, #tpu.memory_space<vmem>>, vector<1x4x512xf32>,
    %c0_185 = arith.constant 0 : index
    %c12 = arith.constant 12 : index
    %c0_186 = arith.constant 0 : index
    %354 = vector.load %arg20[%c0_185, %c12, %c0_186] : memref<1x16x512xf32, #tpu.memory_space<vmem>>, vector<1x2x512xf32>
    %355 = vector.shape_cast %354 : vector<1x2x512xf32> to vector<2x512xf32>
    %356 = vector.shape_cast %341 : vector<2x512xf32> to vector<1x2x512xf32>
    tpu.vector_store %arg20[%c0_185, %c12, %c0_186], %356 {strides = array<i32>} : memref<1x16x512xf32, #tpu.memory_space<vmem>>, vector<1x2x512xf32>,
    %c0_187 = arith.constant 0 : index
    %c14_188 = arith.constant 14 : index
    %c0_189 = arith.constant 0 : index
    %357 = vector.load %arg20[%c0_187, %c14_188, %c0_189] : memref<1x16x512xf32, #tpu.memory_space<vmem>>, vector<1x2x512xf32>
    %358 = vector.shape_cast %357 : vector<1x2x512xf32> to vector<2x512xf32>
    %359 = vector.shape_cast %279 : vector<2x512xf32> to vector<1x2x512xf32>
    tpu.vector_store %arg20[%c0_187, %c14_188, %c0_189], %359 {strides = array<i32>} : memref<1x16x512xf32, #tpu.memory_space<vmem>>, vector<1x2x512xf32>,
    return
  }
  func.func @transform_0(%arg0: i32) -> (i32, i32, i32) {
    %c0_i32 = arith.constant 0 : i32
    %c0_i32_0 = arith.constant 0 : i32
    %c0_i32_1 = arith.constant 0 : i32
    return %arg0, %c0_i32, %c0_i32_0 : i32, i32, i32
  }
  func.func @transform_1(%arg0: i32) -> (i32, i32) {
    %c0_i32 = arith.constant 0 : i32
    %c0_i32_0 = arith.constant 0 : i32
    %c0_i32_1 = arith.constant 0 : i32
    return %c0_i32, %c0_i32_0 : i32, i32
  }
  func.func @transform_2(%arg0: i32) -> (i32, i32) {
    %c0_i32 = arith.constant 0 : i32
    %c0_i32_0 = arith.constant 0 : i32
    %c0_i32_1 = arith.constant 0 : i32
    return %c0_i32, %c0_i32_0 : i32, i32
  }
  func.func @transform_3(%arg0: i32) -> (i32, i32) {
    %c0_i32 = arith.constant 0 : i32
    %c0_i32_0 = arith.constant 0 : i32
    %c0_i32_1 = arith.constant 0 : i32
    return %c0_i32, %c0_i32_0 : i32, i32
  }
  func.func @transform_4(%arg0: i32) -> (i32, i32) {
    %c0_i32 = arith.constant 0 : i32
    %c0_i32_0 = arith.constant 0 : i32
    %c0_i32_1 = arith.constant 0 : i32
    return %c0_i32, %c0_i32_0 : i32, i32
  }
  func.func @transform_5(%arg0: i32) -> (i32, i32, i32) {
    %c0_i32 = arith.constant 0 : i32
    %c0_i32_0 = arith.constant 0 : i32
    %c0_i32_1 = arith.constant 0 : i32
    %c0_i32_2 = arith.constant 0 : i32
    return %c0_i32, %c0_i32_0, %c0_i32_1 : i32, i32, i32
  }
  func.func @transform_6(%arg0: i32) -> (i32, i32) {
    %c0_i32 = arith.constant 0 : i32
    %c0_i32_0 = arith.constant 0 : i32
    %c0_i32_1 = arith.constant 0 : i32
    return %c0_i32, %c0_i32_0 : i32, i32
  }
  func.func @transform_7(%arg0: i32) -> (i32, i32) {
    %c0_i32 = arith.constant 0 : i32
    %c0_i32_0 = arith.constant 0 : i32
    %c0_i32_1 = arith.constant 0 : i32
    return %c0_i32, %c0_i32_0 : i32, i32
  }
  func.func @transform_8(%arg0: i32) -> (i32, i32) {
    %c0_i32 = arith.constant 0 : i32
    %c0_i32_0 = arith.constant 0 : i32
    %c0_i32_1 = arith.constant 0 : i32
    return %c0_i32, %c0_i32_0 : i32, i32
  }
  func.func @transform_9(%arg0: i32) -> (i32, i32) {
    %c0_i32 = arith.constant 0 : i32
    %c0_i32_0 = arith.constant 0 : i32
    %c0_i32_1 = arith.constant 0 : i32
    return %c0_i32, %c0_i32_0 : i32, i32
  }
  func.func @transform_10(%arg0: i32) -> (i32, i32, i32, i32) {
    %c0_i32 = arith.constant 0 : i32
    %c0_i32_0 = arith.constant 0 : i32
    %c0_i32_1 = arith.constant 0 : i32
    %c0_i32_2 = arith.constant 0 : i32
    %c0_i32_3 = arith.constant 0 : i32
    return %c0_i32, %c0_i32_0, %c0_i32_1, %c0_i32_2 : i32, i32, i32, i32
  }
  func.func @transform_11(%arg0: i32) -> (i32, i32) {
    %c0_i32 = arith.constant 0 : i32
    %c0_i32_0 = arith.constant 0 : i32
    %c0_i32_1 = arith.constant 0 : i32
    return %c0_i32, %c0_i32_0 : i32, i32
  }
  func.func @transform_12(%arg0: i32) -> (i32, i32, i32, i32) {
    %c0_i32 = arith.constant 0 : i32
    %c0_i32_0 = arith.constant 0 : i32
    %c0_i32_1 = arith.constant 0 : i32
    %c0_i32_2 = arith.constant 0 : i32
    %c0_i32_3 = arith.constant 0 : i32
    return %c0_i32, %c0_i32_0, %c0_i32_1, %c0_i32_2 : i32, i32, i32, i32
  }
  func.func @transform_13(%arg0: i32) -> (i32, i32) {
    %c0_i32 = arith.constant 0 : i32
    %c0_i32_0 = arith.constant 0 : i32
    %c0_i32_1 = arith.constant 0 : i32
    return %c0_i32, %c0_i32_0 : i32, i32
  }
  func.func @transform_14(%arg0: i32) -> (i32, i32) {
    %c0_i32 = arith.constant 0 : i32
    %c0_i32_0 = arith.constant 0 : i32
    %c0_i32_1 = arith.constant 0 : i32
    return %c0_i32, %c0_i32_0 : i32, i32
  }
  func.func @transform_15(%arg0: i32) -> (i32, i32) {
    %c0_i32 = arith.constant 0 : i32
    %c0_i32_0 = arith.constant 0 : i32
    %c0_i32_1 = arith.constant 0 : i32
    return %c0_i32, %c0_i32_0 : i32, i32
  }
  func.func @transform_16(%arg0: i32) -> (i32, i32) {
    %c0_i32 = arith.constant 0 : i32
    %c0_i32_0 = arith.constant 0 : i32
    %c0_i32_1 = arith.constant 0 : i32
    return %c0_i32, %c0_i32_0 : i32, i32
  }
  func.func @transform_17(%arg0: i32) -> (i32, i32) {
    %c0_i32 = arith.constant 0 : i32
    %c0_i32_0 = arith.constant 0 : i32
    %c0_i32_1 = arith.constant 0 : i32
    return %c0_i32, %c0_i32_0 : i32, i32
  }
  func.func @transform_18(%arg0: i32) -> (i32, i32, i32) {
    %c0_i32 = arith.constant 0 : i32
    %c0_i32_0 = arith.constant 0 : i32
    %c0_i32_1 = arith.constant 0 : i32
    %c0_i32_2 = arith.constant 0 : i32
    return %c0_i32, %c0_i32_0, %c0_i32_1 : i32, i32, i32
  }
  func.func @transform_19(%arg0: i32) -> (i32, i32, i32) {
    %c0_i32 = arith.constant 0 : i32
    %c0_i32_0 = arith.constant 0 : i32
    %c0_i32_1 = arith.constant 0 : i32
    return %arg0, %c0_i32, %c0_i32_0 : i32, i32, i32
  }
}

</mosaic_0001>

<bundles_post_ra>
// kernel: tile.138
= control target key start
LH: loop header
LB: loop body
LE: loop exit
PB: predicated region body
PF: predicated region fallthrough
CT: control target
= control target key end

     0   :  { %vm70_vm0 = vcmask 1042433   ;;  %vm75_vm1 = vcmask 1044483   ;;  %vm80_vm2 = vcmask 1046533   ;;  %vm84_vm3 = vcmask 1047559   ;;  %s131_s6 = smov 6  ;;  %s136_s11 = smov 24  ;;  %s2968_s0 = inlined_call_operand.vmem [shape: f32[3,2,2,32,16], index: 0, kind: input, shape index: {}]   ;;  %s2969_s1 = inlined_call_operand.vmem [shape: f32[3,2,2,512], index: 1, kind: output, shape index: {}]  }
   0x1   :  { %v1587_v0 = vld [vmem:[%s2968_s0 + $0x87] sm:$0x1]   ;;  %s141_s12 = smov 96  ;;  %s68_s17 = smov 6  ;;  %v1591_v6 = vld [vmem:[%s2968_s0 + $0xb8] sm:$0x80]  }
   0x2   :  { %v1588_v1 = vld [vmem:[%s2968_s0 + $0xbf] ss:$-24 sm:%s131_s6]   ;;  %s73_s18 = smov 24  ;;  %s78_s27 = smov 96  ;;  %v1612_v47 = vld [vmem:[%s2968_s0 + $0x46] sm:$0x1]  }
   0x3   :  { %v134_v2 = vsel %vm70_vm0, %v1588_v1, %v1587_v0  ;;  %v1589_v3 = vld [vmem:[%s2968_s0 + $0xf7] ss:$-24 sm:%s136_s11]   ;;  %s163_s30 = smov 6  ;;  %s168_s6 = smov 24  ;;  %v1616_v54 = vld [vmem:[%s2968_s0 + $0x77] sm:$0x80]  }
   0x4   :  { %v1590_v4 = vld [vmem:[%s2968_s0 + $0x12f] ss:$-24 sm:%s141_s12]   ;;  %v139_v5 = vsel %vm75_vm1, %v1589_v3, %v134_v2  ;;  %s173_s7 = smov 96  ;;  %s1817_s8 = smov 112   ;;  %v1607_v61 = vld [vmem:[%s2968_s0 + $0x6] sm:$0x1]  }
   0x5   :  { %v1577_v7 = vld [vmem:[%s2968_s0 + $0x7] sm:$0x1]   ;;  %v144_v9 = vsel %vm80_vm2, %v1590_v4, %v139_v5  ;;  %v1581_v12 = vld [vmem:[%s2968_s0 + $0x38] sm:$0x80]   ;;  %s99_s13 = smov 6  ;;  %s104_s14 = smov 24 }
   0x6   :  { %v1578_v8 = vld [vmem:[%s2968_s0 + $0x3f] ss:$-24 sm:%s68_s17]   ;;  %v148_v13 = vsel %vm84_vm3, %v1591_v6, %v144_v9  ;;  %s109_s19 = smov 96  ;;  %s227_s20 = smov 6  ;;  %v1611_v63 = vld [vmem:[%s2968_s0 + $0x37] sm:$0x80]  }
   0x7   :  { %v71_v10 = vsel %vm70_vm0, %v1578_v8, %v1577_v7  ;;  %v1579_v11 = vld [vmem:[%s2968_s0 + $0x77] ss:$-24 sm:%s73_s18]   ;;  %149 = vrot.lane.b32.xlu1 %v148_v13, %s1817_s8  ;;  %s232_s25 = smov 24  ;;  %s237_s26 = smov 96  ;;  %v1622_v3 = vld [vmem:[%s2968_s0 + $0xc6] sm:$0x1]  }
   0x8   :  { %v76_v14 = vsel %vm75_vm1, %v1579_v11, %v71_v10  ;;  %v1580_v15 = vld [vmem:[%s2968_s0 + $0xaf] ss:$-24 sm:%s78_s27]   ;;  %s195_s2 = smov 6  ;;  %s200_s3 = smov 24  ;;  %v1626_v11 = vld [vmem:[%s2968_s0 + $0xf7] sm:$0x80]  }
   0x9   :  { %v1592_v16 = vld [vmem:[%s2968_s0 + $0xc7] sm:$0x1]   ;;  %v81_v17 = vsel %vm80_vm2, %v1580_v15, %v76_v14  ;;  %v1596_v19 = vld [vmem:[%s2968_s0 + $0xf8] sm:$0x80]   ;;  %s205_s15 = smov 96  ;;  %s295_s27 = smov 24 }
   0xa   :  { %v1593_v18 = vld [vmem:[%s2968_s0 + $0xff] ss:$-24 sm:%s163_s30]   ;;  %v85_v20 = vsel %vm84_vm3, %v1581_v12, %v81_v17  ;;  %s259_s4 = smov 6  ;;  %s264_s10 = smov 24  ;;  %v1614_v57 = vld [vmem:[%s2968_s0 + $0xb6] ss:$-24 sm:%s295_s27]  }
   0xb   :  { %v166_v21 = vsel %vm70_vm0, %v1593_v18, %v1592_v16  ;;  %v1594_v22 = vld [vmem:[%s2968_s0 + $0x137] ss:$-24 sm:%s168_s6]   ;;  %86 = vrot.lane.b32.xlu0 %v85_v20, %s1817_s8  ;;  %s269_s11 = smov 96  ;;  %s354_s16 = smov 6  ;;  %v1617_v15 = vld [vmem:[%s2968_s0 + $0x86] sm:$0x1]  }
   0xc   :  { %v1595_v23 = vld [vmem:[%s2968_s0 + $0x16f] ss:$-24 sm:%s173_s7]   ;;  %v171_v24 = vsel %vm75_vm1, %v1594_v22, %v166_v21  ;;  %s359_s17 = smov 24  ;;  %v1608_v62 = vld [vmem:[%s2968_s0 + $0x3e] ss:$-24 sm:%s259_s4]   ;;  %s364_s27 = smov 96 }
   0xd   :  { %v1582_v25 = vld [vmem:[%s2968_s0 + $0x47] sm:$0x1]   ;;  %v176_v27 = vsel %vm80_vm2, %v1595_v23, %v171_v24  ;;  %v1586_v33 = vld [vmem:[%s2968_s0 + $0x78] sm:$0x80]   ;;  %v262_v1 = vsel %vm70_vm0, %v1608_v62, %v1607_v61  ;;  %v1609_v2 = vld [vmem:[%s2968_s0 + $0x76] ss:$-24 sm:%s264_s10]  }
   0xe   :  { %v1583_v26 = vld [vmem:[%s2968_s0 + $0x7f] ss:$-24 sm:%s99_s13]   ;;  %v180_v31 = vsel %vm84_vm3, %v1596_v19, %v176_v27  ;;  %v267_v5 = vsel %vm75_vm1, %v1609_v2, %v262_v1  ;;  %v1610_v6 = vld [vmem:[%s2968_s0 + $0xae] ss:$-24 sm:%s269_s11]   ;;  %s327_s4 = smov 24  ;;  %s1818_s5 = smov 96  }
   0xf   :  { %v102_v28 = vsel %vm70_vm0, %v1583_v26, %v1582_v25  ;;  %v1584_v29 = vld [vmem:[%s2968_s0 + $0xb7] ss:$-24 sm:%s104_s14]   ;;  %181 = vrot.lane.b32.xlu1 %v180_v31, %s1817_s8  ;;  %v272_v8 = vsel %vm80_vm2, %v1610_v6, %v267_v5  ;;  %s332_s11 = smov 96  ;;  %s418_s12 = smov 6  ;;  %v1621_v16 = vld [vmem:[%s2968_s0 + $0xb7] sm:$0x80]  }
  0x10   :  { %v1585_v30 = vld [vmem:[%s2968_s0 + $0xef] ss:$-24 sm:%s109_s19]   ;;  %v107_v32 = vsel %vm75_vm1, %v1584_v29, %v102_v28  ;;  %v1623_v7 = vld [vmem:[%s2968_s0 + $0xfe] ss:$-24 sm:%s354_s16]   ;;  %v276_v12 = vsel %vm84_vm3, %v1611_v63, %v272_v8  ;;  %s423_s23 = smov 24  ;;  %s386_s28 = smov 6 }
  0x11   :  { %v1602_v34 = vld [vmem:[%s2968_s0 + $0x147] sm:$0x1]   ;;  %v112_v36 = vsel %vm80_vm2, %v1585_v30, %v107_v32  ;;  %v1606_v39 = vld [vmem:[%s2968_s0 + $0x178] sm:$0x80]   ;;  %v357_v9 = vsel %vm70_vm0, %v1623_v7, %v1622_v3  ;;  %v1624_v10 = vld [vmem:[%s2968_s0 + $0x136] ss:$-24 sm:%s359_s17]  }
  0x12   :  { %v1603_v35 = vld [vmem:[%s2968_s0 + $0x17f] ss:$-24 sm:%s227_s20]   ;;  %v116_v40 = vsel %vm84_vm3, %v1586_v33, %v112_v36  ;;  %v362_v13 = vsel %vm75_vm1, %v1624_v10, %v357_v9  ;;  %v1625_v14 = vld [vmem:[%s2968_s0 + $0x16e] ss:$-24 sm:%s364_s27]   ;;  %s396_s6 = smov 96  ;;  %s486_s13 = smov 24 }
  0x13   :  { %v230_v37 = vsel %vm70_vm0, %v1603_v35, %v1602_v34  ;;  %v1604_v38 = vld [vmem:[%s2968_s0 + $0x1b7] ss:$-24 sm:%s232_s25]   ;;  %117 = vrot.lane.b32.xlu0 %v116_v40, %s1817_s8  ;;  %v367_v17 = vsel %vm80_vm2, %v1625_v14, %v362_v13  ;;  %v1632_v19 = vld [vmem:[%s2968_s0 + $0x146] sm:$0x1]   ;;  %s455_s29 = smov 24  ;;  %s545_s7 = smov 6 }
  0x14   :  { %v235_v41 = vsel %vm75_vm1, %v1604_v38, %v230_v37  ;;  %v1605_v42 = vld [vmem:[%s2968_s0 + $0x1ef] ss:$-24 sm:%s237_s26]   ;;  %s290_s26 = smov 6  ;;  %v371_v20 = vsel %vm84_vm3, %v1626_v11, %v367_v17  ;;  %v1619_v22 = vld [vmem:[%s2968_s0 + $0xf6] ss:$-24 sm:%s327_s4]   ;;  %s391_s4 = smov 24 }
  0x15   :  { %v1597_v43 = vld [vmem:[%s2968_s0 + $0x107] sm:$0x1]   ;;  %v1601_v44 = vld [vmem:[%s2968_s0 + $0x138] sm:$0x80]   ;;  %v240_v45 = vsel %vm80_vm2, %v1605_v42, %v235_v41  ;;  %v1613_v53 = vld [vmem:[%s2968_s0 + $0x7e] ss:$-24 sm:%s290_s26]  }
  0x16   :  { %v1598_v46 = vld [vmem:[%s2968_s0 + $0x13f] ss:$-24 sm:%s195_s2]   ;;  %v244_v48 = vsel %vm84_vm3, %v1606_v39, %v240_v45  ;;  %v293_v56 = vsel %vm70_vm0, %v1613_v53, %v1612_v47  ;;  %v1620_v23 = vld [vmem:[%s2968_s0 + $0x12e] ss:$-24 sm:%s332_s11]   ;;  %s550_s18 = smov 24  ;;  %s555_s19 = smov 96 }
  0x17   :  { %v198_v49 = vsel %vm70_vm0, %v1598_v46, %v1597_v43  ;;  %v1599_v50 = vld [vmem:[%s2968_s0 + $0x177] ss:$-24 sm:%s200_s3]   ;;  %s300_s3 = smov 96  ;;  %245 = vrot.lane.b32.xlu1 %v244_v48, %s1817_s8  ;;  %v298_v60 = vsel %vm75_vm1, %v1614_v57, %v293_v56  ;;  %v1636_v26 = vld [vmem:[%s2968_s0 + $0x177] sm:$0x80]   ;;  %s1819_s24 = smov 80  }
  0x18   :  { %v1600_v51 = vld [vmem:[%s2968_s0 + $0x1af] ss:$-24 sm:%s205_s15]   ;;  %v203_v52 = vsel %vm75_vm1, %v1599_v50, %v198_v49  ;;  %v1615_v58 = vld [vmem:[%s2968_s0 + $0xee] ss:$-24 sm:%s300_s3]   ;;  %s322_s3 = smov 6  ;;  %s523_s30 = smov 96 }
  0x19   :  { %v208_v55 = vsel %vm80_vm2, %v1600_v51, %v203_v52  ;;  %v303_v0 = vsel %vm80_vm2, %v1615_v58, %v298_v60  ;;  %v1618_v18 = vld [vmem:[%s2968_s0 + $0xbe] ss:$-24 sm:%s322_s3]   ;;  %v1642_v39 = vld [vmem:[%s2968_s0 + $0x45] sm:$0x1]   ;;  %v1646_v47 = vld [vmem:[%s2968_s0 + $0x76] sm:$0x80]  }
  0x1a   :  { %v212_v59 = vsel %vm84_vm3, %v1601_v44, %v208_v55  ;;  %v307_v4 = vsel %vm84_vm3, %v1616_v54, %v303_v0  ;;  %v325_v21 = vsel %vm70_vm0, %v1618_v18, %v1617_v15  ;;  %v1633_v25 = vld [vmem:[%s2968_s0 + $0x17e] ss:$-24 sm:%s418_s12]   ;;  %s481_s12 = smov 6  ;;  %v1644_v46 = vld [vmem:[%s2968_s0 + $0xb5] ss:$-24 sm:%s486_s13]   ;;  %s614_s9 = smov 24 }
  0x1b   :  { %213 = vrot.lane.b32.xlu0 %v212_v59, %s1817_s8  ;;  %308 = vrot.lane.b32.xlu1 %v307_v4, %s1818_s5  ;;  %s428_s8 = smov 96  ;;  %v330_v24 = vsel %vm75_vm1, %v1619_v22, %v325_v21  ;;  %v421_v28 = vsel %vm70_vm0, %v1633_v25, %v1632_v19  ;;  %v1634_v29 = vld [vmem:[%s2968_s0 + $0x1b6] ss:$-24 sm:%s423_s23]   ;;  %s582_s25 = smov 24  ;;  %vm4_vm4 = vcmask 1047556   ;;  %vm6_vm5 = vcmask 130048  }
  0x1c   :  { %v335_v27 = vsel %vm80_vm2, %v1620_v23, %v330_v24  ;;  %v1635_v30 = vld [vmem:[%s2968_s0 + $0x1ee] ss:$-24 sm:%s428_s8]   ;;  %v426_v32 = vsel %vm75_vm1, %v1634_v29, %v421_v28  ;;  %s491_s8 = smov 96  ;;  %v1643_v43 = vld [vmem:[%s2968_s0 + $0x7d] ss:$-24 sm:%s481_s12]   ;;  %s672_s2 = smov 6 }
  0x1d   :  { %v339_v31 = vsel %vm84_vm3, %v1621_v16, %v335_v27  ;;  %v1627_v33 = vld [vmem:[%s2968_s0 + $0x106] sm:$0x1]   ;;  %v1631_v35 = vld [vmem:[%s2968_s0 + $0x137] sm:$0x80]   ;;  %v431_v36 = vsel %vm80_vm2, %v1635_v30, %v426_v32  ;;  %v484_v45 = vsel %vm70_vm0, %v1643_v43, %v1642_v39  ;;  %v1645_v50 = vld [vmem:[%s2968_s0 + $0xed] ss:$-24 sm:%s491_s8]  }
  0x1e   :  { %v1628_v34 = vld [vmem:[%s2968_s0 + $0x13e] ss:$-24 sm:%s386_s28]   ;;  %v435_v40 = vsel %vm84_vm3, %v1636_v26, %v431_v36  ;;  %s450_s28 = smov 6  ;;  %v489_v49 = vsel %vm75_vm1, %v1644_v46, %v484_v45  ;;  %v1637_v51 = vld [vmem:[%s2968_s0 + $0x5] sm:$0x1]   ;;  %s513_s8 = smov 6 }
  0x1f   :  { %277 = vrot.lane.b32.xlu0 %v276_v12, %s1818_s5  ;;  %372 = vrot.lane.b32.xlu1 %v371_v20, %s1818_s5  ;;  %v389_v37 = vsel %vm70_vm0, %v1628_v34, %v1627_v33  ;;  %v1629_v38 = vld [vmem:[%s2968_s0 + $0x176] ss:$-24 sm:%s391_s4]   ;;  %v494_v53 = vsel %vm80_vm2, %v1645_v50, %v489_v49  ;;  %s682_s15 = smov 96  ;;  %s641_s20 = smov 6  ;;  %vm88_vm6 = vcmask 1048448   ;;  %vm279_vm7 = vcmask 917248  }
  0x20   :  { %v394_v41 = vsel %vm75_vm1, %v1629_v38, %v389_v37  ;;  %v1630_v42 = vld [vmem:[%s2968_s0 + $0x1ae] ss:$-24 sm:%s396_s6]   ;;  %s460_s6 = smov 96  ;;  %v1641_v52 = vld [vmem:[%s2968_s0 + $0x36] sm:$0x80]   ;;  %v498_v56 = vsel %vm84_vm3, %v1646_v47, %v494_v53  ;;  %s651_s26 = smov 96 }
  0x21   :  { %v399_v44 = vsel %vm80_vm2, %v1630_v42, %v394_v41  ;;  %v1638_v54 = vld [vmem:[%s2968_s0 + $0x3d] ss:$-24 sm:%s450_s28]   ;;  %v1672_v27 = vld [vmem:[%s2968_s0 + $0x44] sm:$0x1]   ;;  %v1676_v34 = vld [vmem:[%s2968_s0 + $0x75] sm:$0x80]  }
  0x22   :  { %v403_v48 = vsel %vm84_vm3, %v1631_v35, %v399_v44  ;;  %v1652_v55 = vld [vmem:[%s2968_s0 + $0xc5] sm:$0x1]   ;;  %v453_v57 = vsel %vm70_vm0, %v1638_v54, %v1637_v51  ;;  %v1656_v62 = vld [vmem:[%s2968_s0 + $0xf6] sm:$0x80]   ;;  %v1673_v33 = vld [vmem:[%s2968_s0 + $0x7c] ss:$-24 sm:%s672_s2]  }
  0x23   :  { %340 = vrot.lane.b32.xlu0 %v339_v31, %s1818_s5  ;;  %436 = vrot.lane.b32.xlu1 %v435_v40, %s1818_s5  ;;  %v1639_v58 = vld [vmem:[%s2968_s0 + $0x75] ss:$-24 sm:%s455_s29]   ;;  %s518_s29 = smov 24  ;;  %v675_v36 = vsel %vm70_vm0, %v1673_v33, %v1672_v27  ;;  %s736_s2 = smov 6  ;;  %vm470_vm8 = vcmask 786048   ;;  %vm661_vm9 = vcmask 654848  }
  0x24   :  { %v1640_v59 = vld [vmem:[%s2968_s0 + $0xad] ss:$-24 sm:%s460_s6]   ;;  %v458_v60 = vsel %vm75_vm1, %v1639_v58, %v453_v57  ;;  %v1675_v38 = vld [vmem:[%s2968_s0 + $0xec] ss:$-24 sm:%s682_s15]   ;;  %s741_s3 = smov 24  ;;  %s1820_s21 = smov 64  }
  0x25   :  { %v1653_v61 = vld [vmem:[%s2968_s0 + $0xfd] ss:$-24 sm:%s545_s7]   ;;  %v463_v63 = vsel %vm80_vm2, %v1640_v59, %v458_v60  ;;  %s609_s7 = smov 6  ;;  %v1667_v41 = vld [vmem:[%s2968_s0 + $0x4] sm:$0x1]   ;;  %s800_s27 = smov 6 }
  0x26   :  { %v548_v0 = vsel %vm70_vm0, %v1653_v61, %v1652_v55  ;;  %v1654_v1 = vld [vmem:[%s2968_s0 + $0x135] ss:$-24 sm:%s550_s18]   ;;  %v467_v3 = vsel %vm84_vm3, %v1641_v52, %v463_v63  ;;  %v1668_v42 = vld [vmem:[%s2968_s0 + $0x3c] ss:$-24 sm:%s641_s20]   ;;  %s709_s20 = smov 24  ;;  %s805_s11 = smov 24 }
  0x27   :  { %404 = vrot.lane.b32.xlu0 %v403_v48, %s1818_s5  ;;  %499 = vrot.lane.b32.xlu1 %v498_v56, %s1819_s24  ;;  %v1655_v2 = vld [vmem:[%s2968_s0 + $0x16d] ss:$-24 sm:%s555_s19]   ;;  %v553_v4 = vsel %vm75_vm1, %v1654_v1, %v548_v0  ;;  %s619_s19 = smov 96  ;;  %s677_s5 = smov 24  ;;  %v644_v45 = vsel %vm70_vm0, %v1668_v42, %v1667_v41  ;;  %vm852_vm10 = vcmask 523648   ;;  %vm1043_vm11 = vcmask 392448  }
  0x28   :  { %v1647_v5 = vld [vmem:[%s2968_s0 + $0x85] sm:$0x1]   ;;  %v1651_v7 = vld [vmem:[%s2968_s0 + $0xb6] sm:$0x80]   ;;  %v558_v8 = vsel %vm80_vm2, %v1655_v2, %v553_v4  ;;  %v1674_v37 = vld [vmem:[%s2968_s0 + $0xb4] ss:$-24 sm:%s677_s5]  }
  0x29   :  { %v1648_v6 = vld [vmem:[%s2968_s0 + $0xbd] ss:$-24 sm:%s513_s8]   ;;  %v562_v12 = vsel %vm84_vm3, %v1656_v62, %v558_v8  ;;  %s577_s8 = smov 6  ;;  %v680_v40 = vsel %vm75_vm1, %v1674_v37, %v675_v36  ;;  %v1671_v43 = vld [vmem:[%s2968_s0 + $0x35] sm:$0x80]   ;;  %s746_s5 = smov 96 }
  0x2a   :  { %v516_v9 = vsel %vm70_vm0, %v1648_v6, %v1647_v5  ;;  %v1649_v10 = vld [vmem:[%s2968_s0 + $0xf5] ss:$-24 sm:%s518_s29]   ;;  %v685_v44 = vsel %vm80_vm2, %v1675_v38, %v680_v40  ;;  %v1682_v47 = vld [vmem:[%s2968_s0 + $0xc4] sm:$0x1]   ;;  %v1686_v55 = vld [vmem:[%s2968_s0 + $0xf5] sm:$0x80]  }
  0x2b   :  { %468 = vrot.lane.b32.xlu0 %v467_v3, %s1819_s24  ;;  %v1662_v11 = vld [vmem:[%s2968_s0 + $0x145] sm:$0x1]   ;;  %v521_v13 = vsel %vm75_vm1, %v1649_v10, %v516_v9  ;;  %563 = vrot.lane.b32.xlu1 %v562_v12, %s1819_s24  ;;  %v1666_v19 = vld [vmem:[%s2968_s0 + $0x176] sm:$0x80]   ;;  %v689_v48 = vsel %vm84_vm3, %v1676_v34, %v685_v44  ;;  %s768_s15 = smov 6  ;;  %s778_s22 = smov 96 }
  0x2c   :  { %v1650_v14 = vld [vmem:[%s2968_s0 + $0x12d] ss:$-24 sm:%s523_s30]   ;;  %s587_s30 = smov 96  ;;  %v1670_v50 = vld [vmem:[%s2968_s0 + $0xac] ss:$-24 sm:%s651_s26]   ;;  %s714_s26 = smov 96 }
  0x2d   :  { %v1663_v15 = vld [vmem:[%s2968_s0 + $0x17d] ss:$-24 sm:%s609_s7]   ;;  %v526_v16 = vsel %vm80_vm2, %v1650_v14, %v521_v13  ;;  %v1683_v51 = vld [vmem:[%s2968_s0 + $0xfc] ss:$-24 sm:%s736_s2]   ;;  %s868_s28 = smov 24  ;;  %s837_s16 = smov 24 }
  0x2e   :  { %v612_v17 = vsel %vm70_vm0, %v1663_v15, %v1662_v11  ;;  %v1664_v18 = vld [vmem:[%s2968_s0 + $0x1b5] ss:$-24 sm:%s614_s9]   ;;  %v530_v20 = vsel %vm84_vm3, %v1651_v7, %v526_v16  ;;  %v739_v53 = vsel %vm70_vm0, %v1683_v51, %v1682_v47  ;;  %v1684_v54 = vld [vmem:[%s2968_s0 + $0x134] ss:$-24 sm:%s741_s3]   ;;  %s927_s23 = smov 6  ;;  %s932_s4 = smov 24 }
  0x2f   :  { %v617_v21 = vsel %vm75_vm1, %v1664_v18, %v612_v17  ;;  %v1665_v22 = vld [vmem:[%s2968_s0 + $0x1ed] ss:$-24 sm:%s619_s19]   ;;  %531 = vrot.lane.b32.xlu0 %v530_v20, %s1819_s24  ;;  %s704_s19 = smov 6  ;;  %v744_v57 = vsel %vm75_vm1, %v1684_v54, %v739_v53  ;;  %v1677_v59 = vld [vmem:[%s2968_s0 + $0x84] sm:$0x1]   ;;  %s937_s6 = smov 96 }
  0x30   :  { %v1657_v23 = vld [vmem:[%s2968_s0 + $0x105] sm:$0x1]   ;;  %v1661_v24 = vld [vmem:[%s2968_s0 + $0x136] sm:$0x80]   ;;  %v622_v25 = vsel %vm80_vm2, %v1665_v22, %v617_v21  ;;  %v1685_v58 = vld [vmem:[%s2968_s0 + $0x16c] ss:$-24 sm:%s746_s5]  }
  0x31   :  { %v1658_v26 = vld [vmem:[%s2968_s0 + $0x13d] ss:$-24 sm:%s577_s8]   ;;  %v626_v28 = vsel %vm84_vm3, %v1666_v19, %v622_v25  ;;  %v1681_v60 = vld [vmem:[%s2968_s0 + $0xb5] sm:$0x80]   ;;  %v749_v61 = vsel %vm80_vm2, %v1685_v58, %v744_v57  ;;  %v1692_v63 = vld [vmem:[%s2968_s0 + $0x144] sm:$0x1]  }
  0x32   :  { %v580_v29 = vsel %vm70_vm0, %v1658_v26, %v1657_v23  ;;  %v1659_v30 = vld [vmem:[%s2968_s0 + $0x175] ss:$-24 sm:%s582_s25]   ;;  %627 = vrot.lane.b32.xlu1 %v626_v28, %s1819_s24  ;;  %s646_s25 = smov 24  ;;  %v753_v0 = vsel %vm84_vm3, %v1686_v55, %v749_v61  ;;  %v1696_v6 = vld [vmem:[%s2968_s0 + $0x175] sm:$0x80]   ;;  %s1821_s12 = smov 48  }
  0x33   :  { %v1660_v31 = vld [vmem:[%s2968_s0 + $0x1ad] ss:$-24 sm:%s587_s30]   ;;  %v585_v32 = vsel %vm75_vm1, %v1659_v30, %v580_v29  ;;  %v1669_v46 = vld [vmem:[%s2968_s0 + $0x74] ss:$-24 sm:%s646_s25]   ;;  %s905_s17 = smov 96  ;;  %s996_s8 = smov 24 }
  0x34   :  { %v590_v35 = vsel %vm80_vm2, %v1660_v31, %v585_v32  ;;  %v649_v49 = vsel %vm75_vm1, %v1669_v46, %v644_v45  ;;  %v1678_v62 = vld [vmem:[%s2968_s0 + $0xbc] ss:$-24 sm:%s704_s19]   ;;  %v1702_v19 = vld [vmem:[%s2968_s0 + $0x43] sm:$0x1]   ;;  %v1706_v27 = vld [vmem:[%s2968_s0 + $0x74] sm:$0x80]  }
  0x35   :  { %v594_v39 = vsel %vm84_vm3, %v1661_v24, %v590_v35  ;;  %v654_v52 = vsel %vm80_vm2, %v1670_v50, %v649_v49  ;;  %v707_v1 = vsel %vm70_vm0, %v1678_v62, %v1677_v59  ;;  %v1679_v2 = vld [vmem:[%s2968_s0 + $0xf4] ss:$-24 sm:%s709_s20]   ;;  %s773_s20 = smov 24  ;;  %v1704_v26 = vld [vmem:[%s2968_s0 + $0xb3] ss:$-24 sm:%s868_s28]   ;;  %s964_s13 = smov 24 }
  0x36   :  { %595 = vrot.lane.b32.xlu0 %v594_v39, %s1819_s24  ;;  %690 = vrot.lane.b32.xlu1 %v689_v48, %s1820_s21  ;;  %v658_v56 = vsel %vm84_vm3, %v1671_v43, %v654_v52  ;;  %s810_s24 = smov 96  ;;  %v1680_v3 = vld [vmem:[%s2968_s0 + $0x12c] ss:$-24 sm:%s714_s26]   ;;  %v712_v4 = vsel %vm75_vm1, %v1679_v2, %v707_v1  ;;  %s1054_s18 = smov 6  ;;  %vm1234_vm12 = vcmask 261248  }
  0x37   :  { %v1693_v5 = vld [vmem:[%s2968_s0 + $0x17c] ss:$-24 sm:%s800_s27]   ;;  %v717_v7 = vsel %vm80_vm2, %v1680_v3, %v712_v4  ;;  %s863_s27 = smov 6  ;;  %v1697_v31 = vld [vmem:[%s2968_s0 + $0x3] sm:$0x1]   ;;  %s1064_s30 = smov 96 }
  0x38   :  { %v803_v8 = vsel %vm70_vm0, %v1693_v5, %v1692_v63  ;;  %v1694_v9 = vld [vmem:[%s2968_s0 + $0x1b4] ss:$-24 sm:%s805_s11]   ;;  %v721_v11 = vsel %vm84_vm3, %v1681_v60, %v717_v7  ;;  %v1703_v23 = vld [vmem:[%s2968_s0 + $0x7b] ss:$-24 sm:%s863_s27]   ;;  %s1023_s7 = smov 6  ;;  %s1033_s14 = smov 96 }
  0x39   :  { %v1695_v10 = vld [vmem:[%s2968_s0 + $0x1ec] ss:$-24 sm:%s810_s24]   ;;  %v808_v12 = vsel %vm75_vm1, %v1694_v9, %v803_v8  ;;  %s873_s24 = smov 96  ;;  %v866_v25 = vsel %vm70_vm0, %v1703_v23, %v1702_v19  ;;  %v1701_v32 = vld [vmem:[%s2968_s0 + $0x34] sm:$0x80]   ;;  %s1123_s19 = smov 24 }
  0x3a   :  { %659 = vrot.lane.b32.xlu0 %v658_v56, %s1820_s21  ;;  %754 = vrot.lane.b32.xlu1 %v753_v0, %s1820_s21  ;;  %v1687_v13 = vld [vmem:[%s2968_s0 + $0x104] sm:$0x1]   ;;  %v1691_v15 = vld [vmem:[%s2968_s0 + $0x135] sm:$0x80]   ;;  %v813_v16 = vsel %vm80_vm2, %v1695_v10, %v808_v12  ;;  %v871_v29 = vsel %vm75_vm1, %v1704_v26, %v866_v25  ;;  %s1822_s9 = smov 32   ;;  %s1182_s5 = smov 6 }
  0x3b   :  { %v1688_v14 = vld [vmem:[%s2968_s0 + $0x13c] ss:$-24 sm:%s768_s15]   ;;  %v817_v20 = vsel %vm84_vm3, %v1696_v6, %v813_v16  ;;  %s832_s15 = smov 6  ;;  %v1705_v30 = vld [vmem:[%s2968_s0 + $0xeb] ss:$-24 sm:%s873_s24]   ;;  %s895_s24 = smov 6 }
  0x3c   :  { %v771_v17 = vsel %vm70_vm0, %v1688_v14, %v1687_v13  ;;  %v1689_v18 = vld [vmem:[%s2968_s0 + $0x174] ss:$-24 sm:%s773_s20]   ;;  %v876_v33 = vsel %vm80_vm2, %v1705_v30, %v871_v29  ;;  %v1698_v34 = vld [vmem:[%s2968_s0 + $0x3b] ss:$-24 sm:%s832_s15]   ;;  %s1187_s26 = smov 24  ;;  %s1160_s10 = smov 96 }
  0x3d   :  { %v776_v21 = vsel %vm75_vm1, %v1689_v18, %v771_v17  ;;  %v1690_v22 = vld [vmem:[%s2968_s0 + $0x1ac] ss:$-24 sm:%s778_s22]   ;;  %s842_s22 = smov 96  ;;  %v1712_v35 = vld [vmem:[%s2968_s0 + $0xc3] sm:$0x1]   ;;  %v880_v36 = vsel %vm84_vm3, %v1706_v27, %v876_v33  ;;  %v835_v37 = vsel %vm70_vm0, %v1698_v34, %v1697_v31  ;;  %s1250_s15 = smov 24 }
  0x3e   :  { %722 = vrot.lane.b32.xlu0 %v721_v11, %s1820_s21  ;;  %818 = vrot.lane.b32.xlu1 %v817_v20, %s1820_s21  ;;  %v781_v24 = vsel %vm80_vm2, %v1690_v22, %v776_v21  ;;  %v1699_v38 = vld [vmem:[%s2968_s0 + $0x73] ss:$-24 sm:%s837_s16]   ;;  %s900_s16 = smov 24  ;;  %s1219_s2 = smov 24 }
  0x3f   :  { %v785_v28 = vsel %vm84_vm3, %v1691_v15, %v781_v24  ;;  %v1700_v39 = vld [vmem:[%s2968_s0 + $0xab] ss:$-24 sm:%s842_s22]   ;;  %v840_v40 = vsel %vm75_vm1, %v1699_v38, %v835_v37  ;;  %v1732_v7 = vld [vmem:[%s2968_s0 + $0x42] sm:$0x1]   ;;  %v1736_v14 = vld [vmem:[%s2968_s0 + $0x73] sm:$0x80]  }
  0x40   :  { %v1713_v41 = vld [vmem:[%s2968_s0 + $0xfb] ss:$-24 sm:%s927_s23]   ;;  %v845_v43 = vsel %vm80_vm2, %v1700_v39, %v840_v40  ;;  %s991_s23 = smov 6  ;;  %v1733_v13 = vld [vmem:[%s2968_s0 + $0x7a] ss:$-24 sm:%s1054_s18]   ;;  %s1118_s18 = smov 6 }
  0x41   :  { %v1716_v42 = vld [vmem:[%s2968_s0 + $0xf4] sm:$0x80]   ;;  %v930_v44 = vsel %vm70_vm0, %v1713_v41, %v1712_v35  ;;  %v849_v47 = vsel %vm84_vm3, %v1701_v32, %v845_v43  ;;  %v1707_v49 = vld [vmem:[%s2968_s0 + $0x83] sm:$0x1]   ;;  %v1057_v16 = vsel %vm70_vm0, %v1733_v13, %v1732_v7  ;;  %v1735_v18 = vld [vmem:[%s2968_s0 + $0xea] ss:$-24 sm:%s1064_s30]  }
  0x42   :  { %786 = vrot.lane.b32.xlu0 %v785_v28, %s1820_s21  ;;  %881 = vrot.lane.b32.xlu1 %v880_v36, %s1821_s12  ;;  %v1714_v45 = vld [vmem:[%s2968_s0 + $0x133] ss:$-24 sm:%s932_s4]   ;;  %s1059_s21 = smov 24  ;;  %s1150_s30 = smov 6 }
  0x43   :  { %v1715_v46 = vld [vmem:[%s2968_s0 + $0x16b] ss:$-24 sm:%s937_s6]   ;;  %v935_v48 = vsel %vm75_vm1, %v1714_v45, %v930_v44  ;;  %s1001_s6 = smov 96  ;;  %v1734_v17 = vld [vmem:[%s2968_s0 + $0xb2] ss:$-24 sm:%s1059_s21]   ;;  %s1128_s21 = smov 96 }
  0x44   :  { %v1708_v50 = vld [vmem:[%s2968_s0 + $0xbb] ss:$-24 sm:%s895_s24]   ;;  %v940_v52 = vsel %vm80_vm2, %v1715_v46, %v935_v48  ;;  %s959_s24 = smov 6  ;;  %v1062_v20 = vsel %vm75_vm1, %v1734_v17, %v1057_v16  ;;  %v1727_v21 = vld [vmem:[%s2968_s0 + $0x2] sm:$0x1]   ;;  %s1309_s11 = smov 6 }
  0x45   :  { %v1711_v51 = vld [vmem:[%s2968_s0 + $0xb4] sm:$0x80]   ;;  %v898_v53 = vsel %vm70_vm0, %v1708_v50, %v1707_v49  ;;  %v1722_v55 = vld [vmem:[%s2968_s0 + $0x143] sm:$0x1]   ;;  %v944_v56 = vsel %vm84_vm3, %v1716_v42, %v940_v52  ;;  %v1728_v22 = vld [vmem:[%s2968_s0 + $0x3a] ss:$-24 sm:%s1023_s7]   ;;  %v1067_v24 = vsel %vm80_vm2, %v1735_v18, %v1062_v20 }
  0x46   :  { %850 = vrot.lane.b32.xlu0 %v849_v47, %s1821_s12  ;;  %v1709_v54 = vld [vmem:[%s2968_s0 + $0xf3] ss:$-24 sm:%s900_s16]   ;;  %945 = vrot.lane.b32.xlu1 %v944_v56, %s1821_s12  ;;  %v1026_v25 = vsel %vm70_vm0, %v1728_v22, %v1727_v21  ;;  %v1071_v28 = vsel %vm84_vm3, %v1736_v14, %v1067_v24  ;;  %s1091_s7 = smov 24  ;;  %s1314_s20 = smov 24 }
  0x47   :  { %v903_v57 = vsel %vm75_vm1, %v1709_v54, %v898_v53  ;;  %v1710_v58 = vld [vmem:[%s2968_s0 + $0x12b] ss:$-24 sm:%s905_s17]   ;;  %s969_s17 = smov 96  ;;  %v1731_v23 = vld [vmem:[%s2968_s0 + $0x33] sm:$0x80]   ;;  %s1319_s22 = smov 96 }
  0x48   :  { %v1723_v59 = vld [vmem:[%s2968_s0 + $0x17b] ss:$-24 sm:%s991_s23]   ;;  %v908_v60 = vsel %vm80_vm2, %v1710_v58, %v903_v57  ;;  %v1742_v27 = vld [vmem:[%s2968_s0 + $0xc2] sm:$0x1]   ;;  %v1746_v35 = vld [vmem:[%s2968_s0 + $0xf3] sm:$0x80]  }
  0x49   :  { %v994_v61 = vsel %vm70_vm0, %v1723_v59, %v1722_v55  ;;  %v1724_v62 = vld [vmem:[%s2968_s0 + $0x1b3] ss:$-24 sm:%s996_s8]   ;;  %v912_v0 = vsel %vm84_vm3, %v1711_v51, %v908_v60  ;;  %v1730_v30 = vld [vmem:[%s2968_s0 + $0xaa] ss:$-24 sm:%s1033_s14]   ;;  %s1096_s14 = smov 96  ;;  %s1823_s27 = smov 16  }
  0x4a   :  { %v1726_v63 = vld [vmem:[%s2968_s0 + $0x174] sm:$0x80]   ;;  %v999_v1 = vsel %vm75_vm1, %v1724_v62, %v994_v61  ;;  %v1717_v3 = vld [vmem:[%s2968_s0 + $0x103] sm:$0x1]   ;;  %913 = vrot.lane.b32.xlu0 %v912_v0, %s1821_s12  ;;  %v1737_v39 = vld [vmem:[%s2968_s0 + $0x82] sm:$0x1]  }
  0x4b   :  { %v1725_v2 = vld [vmem:[%s2968_s0 + $0x1eb] ss:$-24 sm:%s1001_s6]   ;;  %v1743_v31 = vld [vmem:[%s2968_s0 + $0xfa] ss:$-24 sm:%s1118_s18]   ;;  %s1086_s6 = smov 6  ;;  %s1287_s3 = smov 96 }
  0x4c   :  { %v1721_v4 = vld [vmem:[%s2968_s0 + $0x134] sm:$0x80]   ;;  %v1004_v5 = vsel %vm80_vm2, %v1725_v2, %v999_v1  ;;  %v1121_v33 = vsel %vm70_vm0, %v1743_v31, %v1742_v27  ;;  %v1744_v34 = vld [vmem:[%s2968_s0 + $0x132] ss:$-24 sm:%s1123_s19]   ;;  %v1766_v7 = vld [vmem:[%s2968_s0 + $0x72] sm:$0x80]  }
  0x4d   :  { %v1718_v6 = vld [vmem:[%s2968_s0 + $0x13b] ss:$-24 sm:%s959_s24]   ;;  %v1008_v8 = vsel %vm84_vm3, %v1726_v63, %v1004_v5  ;;  %v1126_v37 = vsel %vm75_vm1, %v1744_v34, %v1121_v33  ;;  %v1745_v38 = vld [vmem:[%s2968_s0 + $0x16a] ss:$-24 sm:%s1128_s21]   ;;  %s1378_s24 = smov 24 }
  0x4e   :  { %v962_v9 = vsel %vm70_vm0, %v1718_v6, %v1717_v3  ;;  %v1719_v10 = vld [vmem:[%s2968_s0 + $0x173] ss:$-24 sm:%s964_s13]   ;;  %1009 = vrot.lane.b32.xlu1 %v1008_v8, %s1821_s12  ;;  %s1028_s13 = smov 24  ;;  %v1741_v40 = vld [vmem:[%s2968_s0 + $0xb3] sm:$0x80]   ;;  %v1131_v41 = vsel %vm80_vm2, %v1745_v38, %v1126_v37 }
  0x4f   :  { %v1720_v11 = vld [vmem:[%s2968_s0 + $0x1ab] ss:$-24 sm:%s969_s17]   ;;  %v967_v12 = vsel %vm75_vm1, %v1719_v10, %v962_v9  ;;  %v1729_v26 = vld [vmem:[%s2968_s0 + $0x72] ss:$-24 sm:%s1028_s13]   ;;  %v1135_v44 = vsel %vm84_vm3, %v1746_v35, %v1131_v41 }
  0x50   :  { %v972_v15 = vsel %vm80_vm2, %v1720_v11, %v967_v12  ;;  %v1031_v29 = vsel %vm75_vm1, %v1729_v26, %v1026_v25  ;;  %v1738_v42 = vld [vmem:[%s2968_s0 + $0xba] ss:$-24 sm:%s1086_s6]   ;;  %v1762_v63 = vld [vmem:[%s2968_s0 + $0x41] sm:$0x1]   ;;  %v1761_v12 = vld [vmem:[%s2968_s0 + $0x32] sm:$0x80]  }
  0x51   :  { %v976_v19 = vsel %vm84_vm3, %v1721_v4, %v972_v15  ;;  %v1036_v32 = vsel %vm80_vm2, %v1730_v30, %v1031_v29  ;;  %v1752_v43 = vld [vmem:[%s2968_s0 + $0x142] sm:$0x1]   ;;  %v1089_v45 = vsel %vm70_vm0, %v1738_v42, %v1737_v39  ;;  %v1756_v50 = vld [vmem:[%s2968_s0 + $0x173] sm:$0x80]   ;;  %v1764_v6 = vld [vmem:[%s2968_s0 + $0xb1] ss:$-24 sm:%s1250_s15]  }
  0x52   :  { %977 = vrot.lane.b32.xlu0 %v976_v19, %s1821_s12  ;;  %1072 = vrot.lane.b32.xlu1 %v1071_v28, %s1822_s9  ;;  %v1040_v36 = vsel %vm84_vm3, %v1731_v23, %v1036_v32  ;;  %s1192_s12 = smov 96  ;;  %v1739_v46 = vld [vmem:[%s2968_s0 + $0xf2] ss:$-24 sm:%s1091_s7]   ;;  %s1155_s7 = smov 24 }
  0x53   :  { %v1740_v47 = vld [vmem:[%s2968_s0 + $0x12a] ss:$-24 sm:%s1096_s14]   ;;  %v1094_v48 = vsel %vm75_vm1, %v1739_v46, %v1089_v45  ;;  %v1757_v11 = vld [vmem:[%s2968_s0 + $0x1] sm:$0x1]   ;;  %v1776_v22 = vld [vmem:[%s2968_s0 + $0xf2] sm:$0x80]  }
  0x54   :  { %v1753_v49 = vld [vmem:[%s2968_s0 + $0x17a] ss:$-24 sm:%s1182_s5]   ;;  %v1099_v51 = vsel %vm80_vm2, %v1740_v47, %v1094_v48  ;;  %s1245_s5 = smov 6  ;;  %v1772_v15 = vld [vmem:[%s2968_s0 + $0xc1] sm:$0x1]  }
  0x55   :  { %v1185_v52 = vsel %vm70_vm0, %v1753_v49, %v1752_v43  ;;  %v1754_v53 = vld [vmem:[%s2968_s0 + $0x1b2] ss:$-24 sm:%s1187_s26]   ;;  %v1103_v55 = vsel %vm84_vm3, %v1741_v40, %v1099_v51  ;;  %v1763_v3 = vld [vmem:[%s2968_s0 + $0x79] ss:$-24 sm:%s1245_s5]  }
  0x56   :  { %1041 = vrot.lane.b32.xlu0 %v1040_v36, %s1822_s9  ;;  %1136 = vrot.lane.b32.xlu1 %v1135_v44, %s1822_s9  ;;  %v1755_v54 = vld [vmem:[%s2968_s0 + $0x1ea] ss:$-24 sm:%s1192_s12]   ;;  %v1190_v56 = vsel %vm75_vm1, %v1754_v53, %v1185_v52  ;;  %s1255_s12 = smov 96  ;;  %v1248_v5 = vsel %vm70_vm0, %v1763_v3, %v1762_v63 }
  0x57   :  { %v1747_v57 = vld [vmem:[%s2968_s0 + $0x102] sm:$0x1]   ;;  %v1751_v59 = vld [vmem:[%s2968_s0 + $0x133] sm:$0x80]   ;;  %v1195_v60 = vsel %vm80_vm2, %v1755_v54, %v1190_v56  ;;  %v1253_v9 = vsel %vm75_vm1, %v1764_v6, %v1248_v5  ;;  %v1765_v10 = vld [vmem:[%s2968_s0 + $0xe9] ss:$-24 sm:%s1255_s12]  }
  0x58   :  { %v1748_v58 = vld [vmem:[%s2968_s0 + $0x13a] ss:$-24 sm:%s1150_s30]   ;;  %v1199_v0 = vsel %vm84_vm3, %v1756_v50, %v1195_v60  ;;  %s1214_s30 = smov 6  ;;  %v1258_v13 = vsel %vm80_vm2, %v1765_v10, %v1253_v9  ;;  %v1759_v18 = vld [vmem:[%s2968_s0 + $0x71] ss:$-24 sm:%s1219_s2]   ;;  %s1277_s12 = smov 6 }
  0x59   :  { %v1153_v61 = vsel %vm70_vm0, %v1748_v58, %v1747_v57  ;;  %v1749_v62 = vld [vmem:[%s2968_s0 + $0x172] ss:$-24 sm:%s1155_s7]   ;;  %v1758_v14 = vld [vmem:[%s2968_s0 + $0x39] ss:$-24 sm:%s1214_s30]   ;;  %v1262_v16 = vsel %vm84_vm3, %v1766_v7, %v1258_v13  ;;  %s1282_s2 = smov 24 }
  0x5a   :  { %1104 = vrot.lane.b32.xlu0 %v1103_v55, %s1822_s9  ;;  %v1158_v1 = vsel %vm75_vm1, %v1749_v62, %v1153_v61  ;;  %v1750_v2 = vld [vmem:[%s2968_s0 + $0x1aa] ss:$-24 sm:%s1160_s10]   ;;  %1200 = vrot.lane.b32.xlu1 %v1199_v0, %s1822_s9  ;;  %s1224_s10 = smov 96  ;;  %v1217_v17 = vsel %vm70_vm0, %v1758_v14, %v1757_v11 }
  0x5b   :  { %v1163_v4 = vsel %vm80_vm2, %v1750_v2, %v1158_v1  ;;  %v1760_v19 = vld [vmem:[%s2968_s0 + $0xa9] ss:$-24 sm:%s1224_s10]   ;;  %v1222_v20 = vsel %vm75_vm1, %v1759_v18, %v1217_v17  ;;  %v1569_v51 = vld [vmem:[%s2968_s0 + $0x80] ss:$8 sm:$0xf]  }
  0x5c   :  { %v1167_v8 = vsel %vm84_vm3, %v1751_v59, %v1163_v4  ;;  %v1773_v21 = vld [vmem:[%s2968_s0 + $0xf9] ss:$-24 sm:%s1309_s11]   ;;  %v1227_v23 = vsel %vm80_vm2, %v1760_v19, %v1222_v20  ;;  %s1373_s11 = smov 6  ;;  %v1570_v57 = vld [vmem:[%s2968_s0 + $0x80] ss:$8 sm:$0xf0]  }
  0x5d   :  { %v1312_v24 = vsel %vm70_vm0, %v1773_v21, %v1772_v15  ;;  %v1774_v25 = vld [vmem:[%s2968_s0 + $0x131] ss:$-24 sm:%s1314_s20]   ;;  %v1231_v27 = vsel %vm84_vm3, %v1761_v12, %v1227_v23  ;;  %v2_v58 = vld [vmem:[%s2968_s0] ss:$8 sm:$0xf]   ;;  %v26_v60 = vsel %vm4_vm4, %v1570_v57, %v1569_v51 }
  0x5e   :  { %1168 = vrot.lane.b32.xlu0 %v1167_v8, %s1822_s9  ;;  %1263 = vrot.lane.b32.xlu1 %v1262_v16, %s1823_s27  ;;  %v1775_v26 = vld [vmem:[%s2968_s0 + $0x169] ss:$-24 sm:%s1319_s22]   ;;  %v1317_v28 = vsel %vm75_vm1, %v1774_v25, %v1312_v24  ;;  %s1383_s22 = smov 96  ;;  %29 = vst.msk [vmem:[#allocation0 + $0x40] ss:$8 sm:$0xf] %vm6_vm5, %v26_v60  }
  0x5f   :  { %v1767_v29 = vld [vmem:[%s2968_s0 + $0x81] sm:$0x1]   ;;  %v1771_v31 = vld [vmem:[%s2968_s0 + $0xb2] sm:$0x80]   ;;  %v1322_v32 = vsel %vm80_vm2, %v1775_v26, %v1317_v28 }
  0x60   :  { %v1768_v30 = vld [vmem:[%s2968_s0 + $0xb9] ss:$-24 sm:%s1277_s12]   ;;  %v1326_v36 = vsel %vm84_vm3, %v1776_v22, %v1322_v32  ;;  %s1341_s12 = smov 6  ;;  %v3_v61 = vld [vmem:[%s2968_s0] ss:$8 sm:$0xf0]  }
  0x61   :  { %v1280_v33 = vsel %vm70_vm0, %v1768_v30, %v1767_v29  ;;  %v1769_v34 = vld [vmem:[%s2968_s0 + $0xf1] ss:$-24 sm:%s1282_s2]   ;;  %s1346_s2 = smov 24  ;;  %v1571_v62 = vld [vmem:[%s2968_s0 + $0xc0] ss:$8 sm:$0xf]   ;;  %v5_v0 = vsel %vm4_vm4, %v3_v61, %v2_v58 }
  0x62   :  { %1232 = vrot.lane.b32.xlu0 %v1231_v27, %s1823_s27  ;;  %v1782_v35 = vld [vmem:[%s2968_s0 + $0x141] sm:$0x1]   ;;  %v1285_v37 = vsel %vm75_vm1, %v1769_v34, %v1280_v33  ;;  %1327 = vrot.lane.b32.xlu1 %v1326_v36, %s1823_s27  ;;  %v1786_v43 = vld [vmem:[%s2968_s0 + $0x172] sm:$0x80]  }
  0x63   :  { %v1770_v38 = vld [vmem:[%s2968_s0 + $0x129] ss:$-24 sm:%s1287_s3]   ;;  %s1351_s3 = smov 96  ;;  %31 = vst.msk [vmem:[#allocation0 + $0x21] ss:$8 sm:$0xf0] %vm6_vm5, %v26_v60  }
  0x64   :  { %v1783_v39 = vld [vmem:[%s2968_s0 + $0x179] ss:$-24 sm:%s1373_s11]   ;;  %v1290_v40 = vsel %vm80_vm2, %v1770_v38, %v1285_v37  ;;  %v1572_v1 = vld [vmem:[%s2968_s0 + $0xc0] ss:$8 sm:$0xf0]  }
  0x65   :  { %v1376_v41 = vsel %vm70_vm0, %v1783_v39, %v1782_v35  ;;  %v1784_v42 = vld [vmem:[%s2968_s0 + $0x1b1] ss:$-24 sm:%s1378_s24]   ;;  %v1294_v44 = vsel %vm84_vm3, %v1771_v31, %v1290_v40  ;;  %v1567_v2 = vld [vmem:[%s2968_s0 + $0x40] ss:$8 sm:$0xf]   ;;  %v37_v3 = vsel %vm4_vm4, %v1572_v1, %v1571_v62 }
  0x66   :  { %v1381_v45 = vsel %vm75_vm1, %v1784_v42, %v1376_v41  ;;  %v1785_v46 = vld [vmem:[%s2968_s0 + $0x1e9] ss:$-24 sm:%s1383_s22]   ;;  %1295 = vrot.lane.b32.xlu0 %v1294_v44, %s1823_s27  ;;  %7 = vst.msk [vmem:[#allocation0] ss:$8 sm:$0xf] %vm6_vm5, %v5_v0  }
  0x67   :  { %v1777_v47 = vld [vmem:[%s2968_s0 + $0x101] sm:$0x1]   ;;  %v1781_v48 = vld [vmem:[%s2968_s0 + $0x132] sm:$0x80]   ;;  %v1386_v49 = vsel %vm80_vm2, %v1785_v46, %v1381_v45 }
  0x68   :  { %v1778_v50 = vld [vmem:[%s2968_s0 + $0x139] ss:$-24 sm:%s1341_s12]   ;;  %v1390_v52 = vsel %vm84_vm3, %v1786_v43, %v1386_v49  ;;  %9 = vst.msk [vmem:[#allocation0 - $0x1f] ss:$8 sm:$0xf0] %vm6_vm5, %v5_v0  }
  0x69   :  { %v1344_v53 = vsel %vm70_vm0, %v1778_v50, %v1777_v47  ;;  %v1779_v54 = vld [vmem:[%s2968_s0 + $0x171] ss:$-24 sm:%s1346_s2]   ;;  %1391 = vrot.lane.b32.xlu1 %v1390_v52, %s1823_s27  ;;  %v1568_v4 = vld [vmem:[%s2968_s0 + $0x40] ss:$8 sm:$0xf0]  }
  0x6a   :  { %v1780_v55 = vld [vmem:[%s2968_s0 + $0x1a9] ss:$-24 sm:%s1351_s3]   ;;  %v1349_v56 = vsel %vm75_vm1, %v1779_v54, %v1344_v53  ;;  %v1575_v5 = vld [vmem:[%s2968_s0 + $0x140] ss:$8 sm:$0xf]   ;;  %v15_v6 = vsel %vm4_vm4, %v1568_v4, %v1567_v2 }
  0x6b   :  { %v1354_v59 = vsel %vm80_vm2, %v1780_v55, %v1349_v56  ;;  %40 = vst.msk [vmem:[#allocation0 + $0x60] ss:$8 sm:$0xf] %vm6_vm5, %v37_v3   ;;  %42 = vst.msk [vmem:[#allocation0 + $0x41] ss:$8 sm:$0xf0] %vm6_vm5, %v37_v3  }
  0x6c   :  { %v1358_v63 = vsel %vm84_vm3, %v1781_v48, %v1354_v59  ;;  %v1576_v7 = vld [vmem:[%s2968_s0 + $0x140] ss:$8 sm:$0xf0]   ;;  %18 = vst.msk [vmem:[#allocation0 + $0x20] ss:$8 sm:$0xf] %vm6_vm5, %v15_v6  }
  0x6d   :  { %1359 = vrot.lane.b32.xlu0 %v1358_v63, %s1823_s27  ;;  %v1573_v8 = vld [vmem:[%s2968_s0 + $0x100] ss:$8 sm:$0xf]   ;;  %20 = vst.msk [vmem:[#allocation0 + $0x1] ss:$8 sm:$0xf0] %vm6_vm5, %v15_v6   ;;  %v59_v9 = vsel %vm4_vm4, %v1576_v7, %v1575_v5 }
  0x6e   :  { %v1574_v10 = vld [vmem:[%s2968_s0 + $0x100] ss:$8 sm:$0xf0]   ;;  %62 = vst.msk [vmem:[#allocation0 + $0xa0] ss:$8 sm:$0xf] %vm6_vm5, %v59_v9  }
  0x6f   :  { %64 = vst.msk [vmem:[#allocation0 + $0x81] ss:$8 sm:$0xf0] %vm6_vm5, %v59_v9   ;;  %v48_v11 = vsel %vm4_vm4, %v1574_v10, %v1573_v8 }
  0x70   :  { %51 = vst.msk [vmem:[#allocation0 + $0x80] ss:$8 sm:$0xf] %vm6_vm5, %v48_v11   ;;  %53 = vst.msk [vmem:[#allocation0 + $0x61] ss:$8 sm:$0xf0] %vm6_vm5, %v48_v11  }
  0x79   :  { %v150_v12 = vpop.permute.xlu1 %149  }
  0x7a   :  { %153 = vst.msk [vmem:[#allocation0 + $0x40] sm:$0x3] %vm88_vm6, %v150_v12   ;;  %155 = vst.msk [vmem:[#allocation0 + $0x46] sm:$0xc] %vm88_vm6, %v150_v12  }
  0x7b   :  { %157 = vst.msk [vmem:[#allocation0 + $0x4c] sm:$0x30] %vm88_vm6, %v150_v12   ;;  %159 = vst.msk [vmem:[#allocation0 + $0x52] sm:$0xc0] %vm88_vm6, %v150_v12  }
  0x7d   :  { %v87_v13 = vpop.permute.xlu0 %86  }
  0x7e   :  { %89 = vst.msk [vmem:[#allocation0] sm:$0x3] %vm88_vm6, %v87_v13   ;;  %91 = vst.msk [vmem:[#allocation0 + $0x6] sm:$0xc] %vm88_vm6, %v87_v13  }
  0x7f   :  { %93 = vst.msk [vmem:[#allocation0 + $0xc] sm:$0x30] %vm88_vm6, %v87_v13   ;;  %95 = vst.msk [vmem:[#allocation0 + $0x12] sm:$0xc0] %vm88_vm6, %v87_v13  }
  0x81   :  { %v182_v14 = vpop.permute.xlu1 %181  }
  0x82   :  { %185 = vst.msk [vmem:[#allocation0 + $0x60] sm:$0x3] %vm88_vm6, %v182_v14   ;;  %187 = vst.msk [vmem:[#allocation0 + $0x66] sm:$0xc] %vm88_vm6, %v182_v14  }
  0x83   :  { %189 = vst.msk [vmem:[#allocation0 + $0x6c] sm:$0x30] %vm88_vm6, %v182_v14   ;;  %191 = vst.msk [vmem:[#allocation0 + $0x72] sm:$0xc0] %vm88_vm6, %v182_v14  }
  0x85   :  { %v118_v15 = vpop.permute.xlu0 %117  }
  0x86   :  { %121 = vst.msk [vmem:[#allocation0 + $0x20] sm:$0x3] %vm88_vm6, %v118_v15   ;;  %123 = vst.msk [vmem:[#allocation0 + $0x26] sm:$0xc] %vm88_vm6, %v118_v15  }
  0x87   :  { %125 = vst.msk [vmem:[#allocation0 + $0x2c] sm:$0x30] %vm88_vm6, %v118_v15   ;;  %127 = vst.msk [vmem:[#allocation0 + $0x32] sm:$0xc0] %vm88_vm6, %v118_v15  }
  0x89   :  { %v246_v16 = vpop.permute.xlu1 %245  }
  0x8a   :  { %249 = vst.msk [vmem:[#allocation0 + $0xa0] sm:$0x3] %vm88_vm6, %v246_v16   ;;  %251 = vst.msk [vmem:[#allocation0 + $0xa6] sm:$0xc] %vm88_vm6, %v246_v16  }
  0x8b   :  { %253 = vst.msk [vmem:[#allocation0 + $0xac] sm:$0x30] %vm88_vm6, %v246_v16   ;;  %255 = vst.msk [vmem:[#allocation0 + $0xb2] sm:$0xc0] %vm88_vm6, %v246_v16  }
  0x8d   :  { %v214_v17 = vpop.permute.xlu0 %213   ;;  %v309_v18 = vpop.permute.xlu1 %308  }
  0x8e   :  { %217 = vst.msk [vmem:[#allocation0 + $0x80] sm:$0x3] %vm88_vm6, %v214_v17   ;;  %219 = vst.msk [vmem:[#allocation0 + $0x86] sm:$0xc] %vm88_vm6, %v214_v17  }
  0x8f   :  { %221 = vst.msk [vmem:[#allocation0 + $0x8c] sm:$0x30] %vm88_vm6, %v214_v17   ;;  %223 = vst.msk [vmem:[#allocation0 + $0x92] sm:$0xc0] %vm88_vm6, %v214_v17  }
  0x90   :  { %312 = vst.msk [vmem:[#allocation0 + $0x20] sm:$0x3] %vm279_vm7, %v309_v18   ;;  %314 = vst.msk [vmem:[#allocation0 + $0x26] sm:$0xc] %vm279_vm7, %v309_v18  }
  0x91   :  { %316 = vst.msk [vmem:[#allocation0 + $0x2c] sm:$0x30] %vm279_vm7, %v309_v18   ;;  %318 = vst.msk [vmem:[#allocation0 + $0x32] sm:$0xc0] %vm279_vm7, %v309_v18   ;;  %v278_v19 = vpop.permute.xlu0 %277   ;;  %v373_v20 = vpop.permute.xlu1 %372  }
  0x92   :  { %280 = vst.msk [vmem:[#allocation0] sm:$0x3] %vm279_vm7, %v278_v19   ;;  %282 = vst.msk [vmem:[#allocation0 + $0x6] sm:$0xc] %vm279_vm7, %v278_v19  }
  0x93   :  { %284 = vst.msk [vmem:[#allocation0 + $0xc] sm:$0x30] %vm279_vm7, %v278_v19   ;;  %286 = vst.msk [vmem:[#allocation0 + $0x12] sm:$0xc0] %vm279_vm7, %v278_v19  }
  0x94   :  { %376 = vst.msk [vmem:[#allocation0 + $0x60] sm:$0x3] %vm279_vm7, %v373_v20   ;;  %378 = vst.msk [vmem:[#allocation0 + $0x66] sm:$0xc] %vm279_vm7, %v373_v20  }
  0x95   :  { %380 = vst.msk [vmem:[#allocation0 + $0x6c] sm:$0x30] %vm279_vm7, %v373_v20   ;;  %382 = vst.msk [vmem:[#allocation0 + $0x72] sm:$0xc0] %vm279_vm7, %v373_v20   ;;  %v341_v21 = vpop.permute.xlu0 %340   ;;  %v437_v22 = vpop.permute.xlu1 %436  }
  0x96   :  { %344 = vst.msk [vmem:[#allocation0 + $0x40] sm:$0x3] %vm279_vm7, %v341_v21   ;;  %346 = vst.msk [vmem:[#allocation0 + $0x46] sm:$0xc] %vm279_vm7, %v341_v21  }
  0x97   :  { %348 = vst.msk [vmem:[#allocation0 + $0x4c] sm:$0x30] %vm279_vm7, %v341_v21   ;;  %350 = vst.msk [vmem:[#allocation0 + $0x52] sm:$0xc0] %vm279_vm7, %v341_v21  }
  0x98   :  { %440 = vst.msk [vmem:[#allocation0 + $0xa0] sm:$0x3] %vm279_vm7, %v437_v22   ;;  %442 = vst.msk [vmem:[#allocation0 + $0xa6] sm:$0xc] %vm279_vm7, %v437_v22  }
  0x99   :  { %444 = vst.msk [vmem:[#allocation0 + $0xac] sm:$0x30] %vm279_vm7, %v437_v22   ;;  %446 = vst.msk [vmem:[#allocation0 + $0xb2] sm:$0xc0] %vm279_vm7, %v437_v22   ;;  %v405_v23 = vpop.permute.xlu0 %404   ;;  %v500_v24 = vpop.permute.xlu1 %499  }
  0x9a   :  { %408 = vst.msk [vmem:[#allocation0 + $0x80] sm:$0x3] %vm279_vm7, %v405_v23   ;;  %410 = vst.msk [vmem:[#allocation0 + $0x86] sm:$0xc] %vm279_vm7, %v405_v23  }
  0x9b   :  { %412 = vst.msk [vmem:[#allocation0 + $0x8c] sm:$0x30] %vm279_vm7, %v405_v23   ;;  %414 = vst.msk [vmem:[#allocation0 + $0x92] sm:$0xc0] %vm279_vm7, %v405_v23  }
  0x9c   :  { %503 = vst.msk [vmem:[#allocation0 + $0x20] sm:$0x3] %vm470_vm8, %v500_v24   ;;  %505 = vst.msk [vmem:[#allocation0 + $0x26] sm:$0xc] %vm470_vm8, %v500_v24  }
  0x9d   :  { %507 = vst.msk [vmem:[#allocation0 + $0x2c] sm:$0x30] %vm470_vm8, %v500_v24   ;;  %509 = vst.msk [vmem:[#allocation0 + $0x32] sm:$0xc0] %vm470_vm8, %v500_v24   ;;  %v469_v25 = vpop.permute.xlu0 %468   ;;  %v564_v26 = vpop.permute.xlu1 %563  }
  0x9e   :  { %471 = vst.msk [vmem:[#allocation0] sm:$0x3] %vm470_vm8, %v469_v25   ;;  %473 = vst.msk [vmem:[#allocation0 + $0x6] sm:$0xc] %vm470_vm8, %v469_v25  }
  0x9f   :  { %475 = vst.msk [vmem:[#allocation0 + $0xc] sm:$0x30] %vm470_vm8, %v469_v25   ;;  %477 = vst.msk [vmem:[#allocation0 + $0x12] sm:$0xc0] %vm470_vm8, %v469_v25  }
  0xa0   :  { %567 = vst.msk [vmem:[#allocation0 + $0x60] sm:$0x3] %vm470_vm8, %v564_v26   ;;  %569 = vst.msk [vmem:[#allocation0 + $0x66] sm:$0xc] %vm470_vm8, %v564_v26  }
  0xa1   :  { %571 = vst.msk [vmem:[#allocation0 + $0x6c] sm:$0x30] %vm470_vm8, %v564_v26   ;;  %573 = vst.msk [vmem:[#allocation0 + $0x72] sm:$0xc0] %vm470_vm8, %v564_v26   ;;  %v532_v27 = vpop.permute.xlu0 %531  }
  0xa2   :  { %535 = vst.msk [vmem:[#allocation0 + $0x40] sm:$0x3] %vm470_vm8, %v532_v27   ;;  %537 = vst.msk [vmem:[#allocation0 + $0x46] sm:$0xc] %vm470_vm8, %v532_v27  }
  0xa3   :  { %539 = vst.msk [vmem:[#allocation0 + $0x4c] sm:$0x30] %vm470_vm8, %v532_v27   ;;  %541 = vst.msk [vmem:[#allocation0 + $0x52] sm:$0xc0] %vm470_vm8, %v532_v27  }
  0xa4   :  { %v628_v28 = vpop.permute.xlu1 %627  }
  0xa5   :  { %631 = vst.msk [vmem:[#allocation0 + $0xa0] sm:$0x3] %vm470_vm8, %v628_v28   ;;  %633 = vst.msk [vmem:[#allocation0 + $0xa6] sm:$0xc] %vm470_vm8, %v628_v28  }
  0xa6   :  { %635 = vst.msk [vmem:[#allocation0 + $0xac] sm:$0x30] %vm470_vm8, %v628_v28   ;;  %637 = vst.msk [vmem:[#allocation0 + $0xb2] sm:$0xc0] %vm470_vm8, %v628_v28  }
  0xa8   :  { %v596_v29 = vpop.permute.xlu0 %595   ;;  %v691_v30 = vpop.permute.xlu1 %690  }
  0xa9   :  { %599 = vst.msk [vmem:[#allocation0 + $0x80] sm:$0x3] %vm470_vm8, %v596_v29   ;;  %601 = vst.msk [vmem:[#allocation0 + $0x86] sm:$0xc] %vm470_vm8, %v596_v29  }
  0xaa   :  { %603 = vst.msk [vmem:[#allocation0 + $0x8c] sm:$0x30] %vm470_vm8, %v596_v29   ;;  %605 = vst.msk [vmem:[#allocation0 + $0x92] sm:$0xc0] %vm470_vm8, %v596_v29  }
  0xab   :  { %694 = vst.msk [vmem:[#allocation0 + $0x20] sm:$0x3] %vm661_vm9, %v691_v30   ;;  %696 = vst.msk [vmem:[#allocation0 + $0x26] sm:$0xc] %vm661_vm9, %v691_v30  }
  0xac   :  { %698 = vst.msk [vmem:[#allocation0 + $0x2c] sm:$0x30] %vm661_vm9, %v691_v30   ;;  %700 = vst.msk [vmem:[#allocation0 + $0x32] sm:$0xc0] %vm661_vm9, %v691_v30   ;;  %v660_v31 = vpop.permute.xlu0 %659   ;;  %v755_v32 = vpop.permute.xlu1 %754  }
  0xad   :  { %662 = vst.msk [vmem:[#allocation0] sm:$0x3] %vm661_vm9, %v660_v31   ;;  %664 = vst.msk [vmem:[#allocation0 + $0x6] sm:$0xc] %vm661_vm9, %v660_v31  }
  0xae   :  { %666 = vst.msk [vmem:[#allocation0 + $0xc] sm:$0x30] %vm661_vm9, %v660_v31   ;;  %668 = vst.msk [vmem:[#allocation0 + $0x12] sm:$0xc0] %vm661_vm9, %v660_v31  }
  0xaf   :  { %758 = vst.msk [vmem:[#allocation0 + $0x60] sm:$0x3] %vm661_vm9, %v755_v32   ;;  %760 = vst.msk [vmem:[#allocation0 + $0x66] sm:$0xc] %vm661_vm9, %v755_v32  }
  0xb0   :  { %762 = vst.msk [vmem:[#allocation0 + $0x6c] sm:$0x30] %vm661_vm9, %v755_v32   ;;  %764 = vst.msk [vmem:[#allocation0 + $0x72] sm:$0xc0] %vm661_vm9, %v755_v32   ;;  %v723_v33 = vpop.permute.xlu0 %722   ;;  %v819_v34 = vpop.permute.xlu1 %818  }
  0xb1   :  { %726 = vst.msk [vmem:[#allocation0 + $0x40] sm:$0x3] %vm661_vm9, %v723_v33   ;;  %728 = vst.msk [vmem:[#allocation0 + $0x46] sm:$0xc] %vm661_vm9, %v723_v33  }
  0xb2   :  { %730 = vst.msk [vmem:[#allocation0 + $0x4c] sm:$0x30] %vm661_vm9, %v723_v33   ;;  %732 = vst.msk [vmem:[#allocation0 + $0x52] sm:$0xc0] %vm661_vm9, %v723_v33  }
  0xb3   :  { %822 = vst.msk [vmem:[#allocation0 + $0xa0] sm:$0x3] %vm661_vm9, %v819_v34   ;;  %824 = vst.msk [vmem:[#allocation0 + $0xa6] sm:$0xc] %vm661_vm9, %v819_v34  }
  0xb4   :  { %826 = vst.msk [vmem:[#allocation0 + $0xac] sm:$0x30] %vm661_vm9, %v819_v34   ;;  %828 = vst.msk [vmem:[#allocation0 + $0xb2] sm:$0xc0] %vm661_vm9, %v819_v34   ;;  %v787_v35 = vpop.permute.xlu0 %786   ;;  %v882_v36 = vpop.permute.xlu1 %881  }
  0xb5   :  { %790 = vst.msk [vmem:[#allocation0 + $0x80] sm:$0x3] %vm661_vm9, %v787_v35   ;;  %792 = vst.msk [vmem:[#allocation0 + $0x86] sm:$0xc] %vm661_vm9, %v787_v35  }
  0xb6   :  { %794 = vst.msk [vmem:[#allocation0 + $0x8c] sm:$0x30] %vm661_vm9, %v787_v35   ;;  %796 = vst.msk [vmem:[#allocation0 + $0x92] sm:$0xc0] %vm661_vm9, %v787_v35  }
  0xb7   :  { %885 = vst.msk [vmem:[#allocation0 + $0x20] sm:$0x3] %vm852_vm10, %v882_v36   ;;  %887 = vst.msk [vmem:[#allocation0 + $0x26] sm:$0xc] %vm852_vm10, %v882_v36  }
  0xb8   :  { %889 = vst.msk [vmem:[#allocation0 + $0x2c] sm:$0x30] %vm852_vm10, %v882_v36   ;;  %891 = vst.msk [vmem:[#allocation0 + $0x32] sm:$0xc0] %vm852_vm10, %v882_v36   ;;  %v851_v37 = vpop.permute.xlu0 %850   ;;  %v946_v38 = vpop.permute.xlu1 %945  }
  0xb9   :  { %853 = vst.msk [vmem:[#allocation0] sm:$0x3] %vm852_vm10, %v851_v37   ;;  %855 = vst.msk [vmem:[#allocation0 + $0x6] sm:$0xc] %vm852_vm10, %v851_v37  }
  0xba   :  { %857 = vst.msk [vmem:[#allocation0 + $0xc] sm:$0x30] %vm852_vm10, %v851_v37   ;;  %859 = vst.msk [vmem:[#allocation0 + $0x12] sm:$0xc0] %vm852_vm10, %v851_v37  }
  0xbb   :  { %949 = vst.msk [vmem:[#allocation0 + $0x60] sm:$0x3] %vm852_vm10, %v946_v38   ;;  %951 = vst.msk [vmem:[#allocation0 + $0x66] sm:$0xc] %vm852_vm10, %v946_v38  }
  0xbc   :  { %953 = vst.msk [vmem:[#allocation0 + $0x6c] sm:$0x30] %vm852_vm10, %v946_v38   ;;  %955 = vst.msk [vmem:[#allocation0 + $0x72] sm:$0xc0] %vm852_vm10, %v946_v38   ;;  %v914_v39 = vpop.permute.xlu0 %913  }
  0xbd   :  { %917 = vst.msk [vmem:[#allocation0 + $0x40] sm:$0x3] %vm852_vm10, %v914_v39   ;;  %919 = vst.msk [vmem:[#allocation0 + $0x46] sm:$0xc] %vm852_vm10, %v914_v39  }
  0xbe   :  { %921 = vst.msk [vmem:[#allocation0 + $0x4c] sm:$0x30] %vm852_vm10, %v914_v39   ;;  %923 = vst.msk [vmem:[#allocation0 + $0x52] sm:$0xc0] %vm852_vm10, %v914_v39  }
  0xc0   :  { %v1010_v40 = vpop.permute.xlu1 %1009  }
  0xc1   :  { %1013 = vst.msk [vmem:[#allocation0 + $0xa0] sm:$0x3] %vm852_vm10, %v1010_v40   ;;  %1015 = vst.msk [vmem:[#allocation0 + $0xa6] sm:$0xc] %vm852_vm10, %v1010_v40  }
  0xc2   :  { %1017 = vst.msk [vmem:[#allocation0 + $0xac] sm:$0x30] %vm852_vm10, %v1010_v40   ;;  %1019 = vst.msk [vmem:[#allocation0 + $0xb2] sm:$0xc0] %vm852_vm10, %v1010_v40  }
  0xc4   :  { %v978_v41 = vpop.permute.xlu0 %977   ;;  %v1073_v42 = vpop.permute.xlu1 %1072  }
  0xc5   :  { %981 = vst.msk [vmem:[#allocation0 + $0x80] sm:$0x3] %vm852_vm10, %v978_v41   ;;  %983 = vst.msk [vmem:[#allocation0 + $0x86] sm:$0xc] %vm852_vm10, %v978_v41  }
  0xc6   :  { %985 = vst.msk [vmem:[#allocation0 + $0x8c] sm:$0x30] %vm852_vm10, %v978_v41   ;;  %987 = vst.msk [vmem:[#allocation0 + $0x92] sm:$0xc0] %vm852_vm10, %v978_v41  }
  0xc7   :  { %1076 = vst.msk [vmem:[#allocation0 + $0x20] sm:$0x3] %vm1043_vm11, %v1073_v42   ;;  %1078 = vst.msk [vmem:[#allocation0 + $0x26] sm:$0xc] %vm1043_vm11, %v1073_v42  }
  0xc8   :  { %1080 = vst.msk [vmem:[#allocation0 + $0x2c] sm:$0x30] %vm1043_vm11, %v1073_v42   ;;  %1082 = vst.msk [vmem:[#allocation0 + $0x32] sm:$0xc0] %vm1043_vm11, %v1073_v42   ;;  %v1042_v43 = vpop.permute.xlu0 %1041   ;;  %v1137_v44 = vpop.permute.xlu1 %1136  }
  0xc9   :  { %1044 = vst.msk [vmem:[#allocation0] sm:$0x3] %vm1043_vm11, %v1042_v43   ;;  %1046 = vst.msk [vmem:[#allocation0 + $0x6] sm:$0xc] %vm1043_vm11, %v1042_v43  }
  0xca   :  { %1048 = vst.msk [vmem:[#allocation0 + $0xc] sm:$0x30] %vm1043_vm11, %v1042_v43   ;;  %1050 = vst.msk [vmem:[#allocation0 + $0x12] sm:$0xc0] %vm1043_vm11, %v1042_v43  }
  0xcb   :  { %1140 = vst.msk [vmem:[#allocation0 + $0x60] sm:$0x3] %vm1043_vm11, %v1137_v44   ;;  %1142 = vst.msk [vmem:[#allocation0 + $0x66] sm:$0xc] %vm1043_vm11, %v1137_v44  }
  0xcc   :  { %1144 = vst.msk [vmem:[#allocation0 + $0x6c] sm:$0x30] %vm1043_vm11, %v1137_v44   ;;  %1146 = vst.msk [vmem:[#allocation0 + $0x72] sm:$0xc0] %vm1043_vm11, %v1137_v44   ;;  %v1105_v45 = vpop.permute.xlu0 %1104   ;;  %v1201_v46 = vpop.permute.xlu1 %1200  }
  0xcd   :  { %1108 = vst.msk [vmem:[#allocation0 + $0x40] sm:$0x3] %vm1043_vm11, %v1105_v45   ;;  %1110 = vst.msk [vmem:[#allocation0 + $0x46] sm:$0xc] %vm1043_vm11, %v1105_v45  }
  0xce   :  { %1112 = vst.msk [vmem:[#allocation0 + $0x4c] sm:$0x30] %vm1043_vm11, %v1105_v45   ;;  %1114 = vst.msk [vmem:[#allocation0 + $0x52] sm:$0xc0] %vm1043_vm11, %v1105_v45  }
  0xcf   :  { %1204 = vst.msk [vmem:[#allocation0 + $0xa0] sm:$0x3] %vm1043_vm11, %v1201_v46   ;;  %1206 = vst.msk [vmem:[#allocation0 + $0xa6] sm:$0xc] %vm1043_vm11, %v1201_v46  }
  0xd0   :  { %1208 = vst.msk [vmem:[#allocation0 + $0xac] sm:$0x30] %vm1043_vm11, %v1201_v46   ;;  %1210 = vst.msk [vmem:[#allocation0 + $0xb2] sm:$0xc0] %vm1043_vm11, %v1201_v46   ;;  %v1169_v47 = vpop.permute.xlu0 %1168   ;;  %v1264_v48 = vpop.permute.xlu1 %1263  }
  0xd1   :  { %1172 = vst.msk [vmem:[#allocation0 + $0x80] sm:$0x3] %vm1043_vm11, %v1169_v47   ;;  %1174 = vst.msk [vmem:[#allocation0 + $0x86] sm:$0xc] %vm1043_vm11, %v1169_v47  }
  0xd2   :  { %1176 = vst.msk [vmem:[#allocation0 + $0x8c] sm:$0x30] %vm1043_vm11, %v1169_v47   ;;  %1178 = vst.msk [vmem:[#allocation0 + $0x92] sm:$0xc0] %vm1043_vm11, %v1169_v47  }
  0xd3   :  { %1267 = vst.msk [vmem:[#allocation0 + $0x20] sm:$0x3] %vm1234_vm12, %v1264_v48   ;;  %1269 = vst.msk [vmem:[#allocation0 + $0x26] sm:$0xc] %vm1234_vm12, %v1264_v48  }
  0xd4   :  { %1271 = vst.msk [vmem:[#allocation0 + $0x2c] sm:$0x30] %vm1234_vm12, %v1264_v48   ;;  %1273 = vst.msk [vmem:[#allocation0 + $0x32] sm:$0xc0] %vm1234_vm12, %v1264_v48   ;;  %v1233_v49 = vpop.permute.xlu0 %1232   ;;  %v1328_v50 = vpop.permute.xlu1 %1327  }
  0xd5   :  { %1235 = vst.msk [vmem:[#allocation0] sm:$0x3] %vm1234_vm12, %v1233_v49   ;;  %1237 = vst.msk [vmem:[#allocation0 + $0x6] sm:$0xc] %vm1234_vm12, %v1233_v49  }
  0xd6   :  { %1239 = vst.msk [vmem:[#allocation0 + $0xc] sm:$0x30] %vm1234_vm12, %v1233_v49   ;;  %1241 = vst.msk [vmem:[#allocation0 + $0x12] sm:$0xc0] %vm1234_vm12, %v1233_v49  }
  0xd7   :  { %1331 = vst.msk [vmem:[#allocation0 + $0x60] sm:$0x3] %vm1234_vm12, %v1328_v50   ;;  %1333 = vst.msk [vmem:[#allocation0 + $0x66] sm:$0xc] %vm1234_vm12, %v1328_v50  }
  0xd8   :  { %1335 = vst.msk [vmem:[#allocation0 + $0x6c] sm:$0x30] %vm1234_vm12, %v1328_v50   ;;  %1337 = vst.msk [vmem:[#allocation0 + $0x72] sm:$0xc0] %vm1234_vm12, %v1328_v50   ;;  %v1296_v51 = vpop.permute.xlu0 %1295  }
  0xd9   :  { %1299 = vst.msk [vmem:[#allocation0 + $0x40] sm:$0x3] %vm1234_vm12, %v1296_v51   ;;  %1301 = vst.msk [vmem:[#allocation0 + $0x46] sm:$0xc] %vm1234_vm12, %v1296_v51  }
  0xda   :  { %v1426_v52 = vld [vmem:[#allocation0 + $0x20] sm:$0x3]  ;;  %v1432_v53 = vld [vmem:[#allocation0 + $0x28] sm:$0x3]  ;;  %1303 = vst.msk [vmem:[#allocation0 + $0x4c] sm:$0x30] %vm1234_vm12, %v1296_v51  }
  0xdb   :  { %v1438_v54 = vld [vmem:[#allocation0 + $0x30] sm:$0x3]  ;;  %1305 = vst.msk [vmem:[#allocation0 + $0x52] sm:$0xc0] %vm1234_vm12, %v1296_v51   ;;  %1790 = vst [vmem:[%s2969_s1 + $0x8] sm:$0x3] %v1426_v52  ;;  %v1392_v56 = vpop.permute.xlu1 %1391  }
  0xdc   :  { %1791 = vst [vmem:[%s2969_s1 + $0xa] sm:$0x3] %v1432_v53  ;;  %1792 = vst [vmem:[%s2969_s1 + $0xc] sm:$0x3] %v1438_v54  ;;  %v1444_v55 = vld [vmem:[#allocation0 + $0x38] sm:$0x3] }
  0xdd   :  { %1793 = vst [vmem:[%s2969_s1 + $0xe] sm:$0x3] %v1444_v55  ;;  %1395 = vst.msk [vmem:[#allocation0 + $0xa0] sm:$0x3] %vm1234_vm12, %v1392_v56   ;;  %v1405_v57 = vld [vmem:[#allocation0] sm:$0x3] }
  0xde   :  { %1397 = vst.msk [vmem:[#allocation0 + $0xa6] sm:$0xc] %vm1234_vm12, %v1392_v56   ;;  %1399 = vst.msk [vmem:[#allocation0 + $0xac] sm:$0x30] %vm1234_vm12, %v1392_v56   ;;  %v1409_v58 = vld [vmem:[#allocation0 + $0x8] sm:$0x3] }
  0xdf   :  { %1401 = vst.msk [vmem:[#allocation0 + $0xb2] sm:$0xc0] %vm1234_vm12, %v1392_v56   ;;  %v1414_v59 = vld [vmem:[#allocation0 + $0x10] sm:$0x3]  ;;  %1407 = vst [vmem:[%s2969_s1] sm:$0x3] %v1405_v57  ;;  %v1360_v61 = vpop.permute.xlu0 %1359  }
  0xe0   :  { %1787 = vst [vmem:[%s2969_s1 + $0x2] sm:$0x3] %v1409_v58  ;;  %1788 = vst [vmem:[%s2969_s1 + $0x4] sm:$0x3] %v1414_v59  ;;  %v1420_v60 = vld [vmem:[#allocation0 + $0x18] sm:$0x3] }
  0xe1   :  { %1789 = vst [vmem:[%s2969_s1 + $0x6] sm:$0x3] %v1420_v60  ;;  %v1474_v62 = vld [vmem:[#allocation0 + $0x60] sm:$0x3]  ;;  %v1480_v63 = vld [vmem:[#allocation0 + $0x68] sm:$0x3] }
  0xe2   :  { %v1486_v0 = vld [vmem:[#allocation0 + $0x70] sm:$0x3]  ;;  %1363 = vst.msk [vmem:[#allocation0 + $0x80] sm:$0x3] %vm1234_vm12, %v1360_v61   ;;  %1365 = vst.msk [vmem:[#allocation0 + $0x86] sm:$0xc] %vm1234_vm12, %v1360_v61  }
  0xe3   :  { %1367 = vst.msk [vmem:[#allocation0 + $0x8c] sm:$0x30] %vm1234_vm12, %v1360_v61   ;;  %1369 = vst.msk [vmem:[#allocation0 + $0x92] sm:$0xc0] %vm1234_vm12, %v1360_v61   ;;  %v1492_v1 = vld [vmem:[#allocation0 + $0x78] sm:$0x3] }
  0xe4   :  { %1798 = vst [vmem:[%s2969_s1 + $0x18] sm:$0x3] %v1474_v62  ;;  %1799 = vst [vmem:[%s2969_s1 + $0x1a] sm:$0x3] %v1480_v63  ;;  %v1450_v2 = vld [vmem:[#allocation0 + $0x40] sm:$0x3] }
  0xe5   :  { %1800 = vst [vmem:[%s2969_s1 + $0x1c] sm:$0x3] %v1486_v0  ;;  %1801 = vst [vmem:[%s2969_s1 + $0x1e] sm:$0x3] %v1492_v1  ;;  %v1456_v3 = vld [vmem:[#allocation0 + $0x48] sm:$0x3] }
  0xe6   :  { %v1462_v4 = vld [vmem:[#allocation0 + $0x50] sm:$0x3]  ;;  %1794 = vst [vmem:[%s2969_s1 + $0x10] sm:$0x3] %v1450_v2  ;;  %1795 = vst [vmem:[%s2969_s1 + $0x12] sm:$0x3] %v1456_v3 }
  0xe7   :  { %1796 = vst [vmem:[%s2969_s1 + $0x14] sm:$0x3] %v1462_v4  ;;  %v1468_v5 = vld [vmem:[#allocation0 + $0x58] sm:$0x3]  ;;  %v1522_v6 = vld [vmem:[#allocation0 + $0xa0] sm:$0x3] }
  0xe8   :  { %1797 = vst [vmem:[%s2969_s1 + $0x16] sm:$0x3] %v1468_v5  ;;  %v1528_v7 = vld [vmem:[#allocation0 + $0xa8] sm:$0x3]  ;;  %v1534_v8 = vld [vmem:[#allocation0 + $0xb0] sm:$0x3] }
  0xe9   :  { %1806 = vst [vmem:[%s2969_s1 + $0x28] sm:$0x3] %v1522_v6  ;;  %1807 = vst [vmem:[%s2969_s1 + $0x2a] sm:$0x3] %v1528_v7  ;;  %v1540_v9 = vld [vmem:[#allocation0 + $0xb8] sm:$0x3] }
  0xea   :  { %1808 = vst [vmem:[%s2969_s1 + $0x2c] sm:$0x3] %v1534_v8  ;;  %1809 = vst [vmem:[%s2969_s1 + $0x2e] sm:$0x3] %v1540_v9  ;;  %v1498_v10 = vld [vmem:[#allocation0 + $0x80] sm:$0x3] }
  0xeb   :  { %v1504_v11 = vld [vmem:[#allocation0 + $0x88] sm:$0x3]  ;;  %v1510_v12 = vld [vmem:[#allocation0 + $0x90] sm:$0x3]  ;;  %1802 = vst [vmem:[%s2969_s1 + $0x20] sm:$0x3] %v1498_v10 }
  0xec   :  { %1803 = vst [vmem:[%s2969_s1 + $0x22] sm:$0x3] %v1504_v11  ;;  %1804 = vst [vmem:[%s2969_s1 + $0x24] sm:$0x3] %v1510_v12  ;;  %v1516_v13 = vld [vmem:[#allocation0 + $0x98] sm:$0x3] }
  0xed   :  { %1805 = vst [vmem:[%s2969_s1 + $0x26] sm:$0x3] %v1516_v13 }

// kernel: tile.142
= control target key start
LH: loop header
LB: loop body
LE: loop exit
PB: predicated region body
PF: predicated region fallthrough
CT: control target
= control target key end

     0   :  { %s601_s0 = inlined_call_operand.vmem [shape: f32[3,2,2,2,256], index: 0, kind: input, shape index: {}]   ;;  %s602_s1 = inlined_call_operand.vmem [shape: f32[3,2,2,512], index: 1, kind: output, shape index: {}]  }
   0x1   :  { %v401_v0 = vld [vmem:[%s601_s0 + $0x2e] sm:$0x3]  ;;  %v402_v1 = vld [vmem:[%s601_s0 + $0x2c] sm:$0x3]  ;;  %v403_v2 = vld [vmem:[%s601_s0 + $0x2a] sm:$0x3] }
   0x2   :  { %8 = vst [vmem:[#allocation1 + $0xb8] sm:$0x3] %v401_v0  ;;  %13 = vst [vmem:[#allocation1 + $0xb0] sm:$0x3] %v402_v1  ;;  %v404_v3 = vld [vmem:[%s601_s0 + $0x28] sm:$0x3] }
   0x3   :  { %18 = vst [vmem:[#allocation1 + $0xa8] sm:$0x3] %v403_v2  ;;  %v405_v4 = vld [vmem:[%s601_s0 + $0x26] sm:$0x3]  ;;  %v406_v5 = vld [vmem:[%s601_s0 + $0x24] sm:$0x3] }
   0x4   :  { %23 = vst [vmem:[#allocation1 + $0xa0] sm:$0x3] %v404_v3  ;;  %28 = vst [vmem:[#allocation1 + $0x98] sm:$0x3] %v405_v4  ;;  %v407_v6 = vld [vmem:[%s601_s0 + $0x22] sm:$0x3] }
   0x5   :  { %33 = vst [vmem:[#allocation1 + $0x90] sm:$0x3] %v406_v5  ;;  %v408_v7 = vld [vmem:[%s601_s0 + $0x20] sm:$0x3]  ;;  %v409_v8 = vld [vmem:[%s601_s0 + $0x1e] sm:$0x3] }
   0x6   :  { %38 = vst [vmem:[#allocation1 + $0x88] sm:$0x3] %v407_v6  ;;  %43 = vst [vmem:[#allocation1 + $0x80] sm:$0x3] %v408_v7  ;;  %v410_v9 = vld [vmem:[%s601_s0 + $0x1c] sm:$0x3] }
   0x7   :  { %48 = vst [vmem:[#allocation1 + $0x78] sm:$0x3] %v409_v8  ;;  %v411_v10 = vld [vmem:[%s601_s0 + $0x1a] sm:$0x3]  ;;  %v412_v11 = vld [vmem:[%s601_s0 + $0x18] sm:$0x3] }
   0x8   :  { %53 = vst [vmem:[#allocation1 + $0x70] sm:$0x3] %v410_v9  ;;  %58 = vst [vmem:[#allocation1 + $0x68] sm:$0x3] %v411_v10  ;;  %v413_v12 = vld [vmem:[%s601_s0 + $0x16] sm:$0x3] }
   0x9   :  { %63 = vst [vmem:[#allocation1 + $0x60] sm:$0x3] %v412_v11  ;;  %v414_v13 = vld [vmem:[%s601_s0 + $0x14] sm:$0x3]  ;;  %v415_v14 = vld [vmem:[%s601_s0 + $0x12] sm:$0x3] }
   0xa   :  { %68 = vst [vmem:[#allocation1 + $0x58] sm:$0x3] %v413_v12  ;;  %73 = vst [vmem:[#allocation1 + $0x50] sm:$0x3] %v414_v13  ;;  %v416_v15 = vld [vmem:[%s601_s0 + $0x10] sm:$0x3] }
   0xb   :  { %78 = vst [vmem:[#allocation1 + $0x48] sm:$0x3] %v415_v14  ;;  %v417_v16 = vld [vmem:[%s601_s0 + $0xe] sm:$0x3]  ;;  %v418_v17 = vld [vmem:[%s601_s0 + $0xc] sm:$0x3] }
   0xc   :  { %83 = vst [vmem:[#allocation1 + $0x40] sm:$0x3] %v416_v15  ;;  %88 = vst [vmem:[#allocation1 + $0x38] sm:$0x3] %v417_v16  ;;  %v419_v18 = vld [vmem:[%s601_s0 + $0xa] sm:$0x3] }
   0xd   :  { %93 = vst [vmem:[#allocation1 + $0x30] sm:$0x3] %v418_v17  ;;  %v420_v19 = vld [vmem:[%s601_s0 + $0x8] sm:$0x3]  ;;  %v421_v20 = vld [vmem:[%s601_s0 + $0x6] sm:$0x3] }
   0xe   :  { %98 = vst [vmem:[#allocation1 + $0x28] sm:$0x3] %v419_v18  ;;  %103 = vst [vmem:[#allocation1 + $0x20] sm:$0x3] %v420_v19  ;;  %v422_v21 = vld [vmem:[%s601_s0 + $0x4] sm:$0x3] }
   0xf   :  { %108 = vst [vmem:[#allocation1 + $0x18] sm:$0x3] %v421_v20  ;;  %v423_v22 = vld [vmem:[%s601_s0 + $0x2] sm:$0x3]  ;;  %v118_v23 = vld [vmem:[%s601_s0] sm:$0x3] }
  0x10   :  { %113 = vst [vmem:[#allocation1 + $0x10] sm:$0x3] %v422_v21  ;;  %117 = vst [vmem:[#allocation1 + $0x8] sm:$0x3] %v423_v22  ;;  %v203_v24 = vld [vmem:[#allocation1 + $0xa8] sm:$0x3]  }
  0x11   :  { %119 = vst [vmem:[#allocation1] sm:$0x3] %v118_v23  ;;  %v207_v25 = vld [vmem:[#allocation1 + $0xb0] sm:$0x3]   ;;  %v211_v26 = vld [vmem:[#allocation1 + $0xb8] sm:$0x3]  }
  0x12   :  { %v191_v27 = vld [vmem:[#allocation1 + $0x90] sm:$0x3]   ;;  %v195_v28 = vld [vmem:[#allocation1 + $0x98] sm:$0x3]   ;;  %v199_v29 = vld [vmem:[#allocation1 + $0xa0] sm:$0x3]  }
  0x13   :  { %205 = vst [vmem:[#allocation0 + $0xa8] ss:$16 sm:$0x3] %v203_v24   ;;  %209 = vst [vmem:[#allocation0 + $0xa1] ss:$16 sm:$0x3] %v207_v25  }
  0x14   :  { %213 = vst [vmem:[#allocation0 + $0xa9] ss:$16 sm:$0x3] %v211_v26   ;;  %v179_v30 = vld [vmem:[#allocation1 + $0x78] sm:$0x3]  }
  0x15   :  { %v183_v31 = vld [vmem:[#allocation1 + $0x80] sm:$0x3]   ;;  %v187_v32 = vld [vmem:[#allocation1 + $0x88] sm:$0x3]   ;;  %v175_v35 = vld [vmem:[#allocation1 + $0x70] sm:$0x3]  }
  0x16   :  { %193 = vst [vmem:[#allocation0 + $0x81] ss:$16 sm:$0x3] %v191_v27   ;;  %197 = vst [vmem:[#allocation0 + $0x89] ss:$16 sm:$0x3] %v195_v28  }
  0x17   :  { %201 = vst [vmem:[#allocation0 + $0xa0] ss:$16 sm:$0x3] %v199_v29   ;;  %v167_v33 = vld [vmem:[#allocation1 + $0x60] sm:$0x3]  }
  0x18   :  { %v171_v34 = vld [vmem:[#allocation1 + $0x68] sm:$0x3]   ;;  %181 = vst [vmem:[#allocation0 + $0x69] ss:$16 sm:$0x3] %v179_v30  }
  0x19   :  { %185 = vst [vmem:[#allocation0 + $0x80] ss:$16 sm:$0x3] %v183_v31   ;;  %189 = vst [vmem:[#allocation0 + $0x88] ss:$16 sm:$0x3] %v187_v32  }
  0x1a   :  { %v155_v36 = vld [vmem:[#allocation1 + $0x48] sm:$0x3]   ;;  %v159_v37 = vld [vmem:[#allocation1 + $0x50] sm:$0x3]   ;;  %v163_v38 = vld [vmem:[#allocation1 + $0x58] sm:$0x3]  }
  0x1b   :  { %169 = vst [vmem:[#allocation0 + $0x60] ss:$16 sm:$0x3] %v167_v33   ;;  %173 = vst [vmem:[#allocation0 + $0x68] ss:$16 sm:$0x3] %v171_v34  }
  0x1c   :  { %177 = vst [vmem:[#allocation0 + $0x61] ss:$16 sm:$0x3] %v175_v35   ;;  %v143_v39 = vld [vmem:[#allocation1 + $0x30] sm:$0x3]  }
  0x1d   :  { %v147_v40 = vld [vmem:[#allocation1 + $0x38] sm:$0x3]   ;;  %v151_v41 = vld [vmem:[#allocation1 + $0x40] sm:$0x3]   ;;  %v139_v44 = vld [vmem:[#allocation1 + $0x28] sm:$0x3]  }
  0x1e   :  { %157 = vst [vmem:[#allocation0 + $0x48] ss:$16 sm:$0x3] %v155_v36   ;;  %161 = vst [vmem:[#allocation0 + $0x41] ss:$16 sm:$0x3] %v159_v37  }
  0x1f   :  { %165 = vst [vmem:[#allocation0 + $0x49] ss:$16 sm:$0x3] %v163_v38   ;;  %v131_v42 = vld [vmem:[#allocation1 + $0x18] sm:$0x3]  }
  0x20   :  { %v135_v43 = vld [vmem:[#allocation1 + $0x20] sm:$0x3]   ;;  %145 = vst [vmem:[#allocation0 + $0x21] ss:$16 sm:$0x3] %v143_v39  }
  0x21   :  { %149 = vst [vmem:[#allocation0 + $0x29] ss:$16 sm:$0x3] %v147_v40   ;;  %153 = vst [vmem:[#allocation0 + $0x40] ss:$16 sm:$0x3] %v151_v41  }
  0x22   :  { %v120_v45 = vld [vmem:[#allocation1] sm:$0x3]   ;;  %v123_v46 = vld [vmem:[#allocation1 + $0x8] sm:$0x3]   ;;  %v127_v47 = vld [vmem:[#allocation1 + $0x10] sm:$0x3]  }
  0x23   :  { %133 = vst [vmem:[#allocation0 + $0x9] ss:$16 sm:$0x3] %v131_v42   ;;  %137 = vst [vmem:[#allocation0 + $0x20] ss:$16 sm:$0x3] %v135_v43  }
  0x24   :  { %141 = vst [vmem:[#allocation0 + $0x28] ss:$16 sm:$0x3] %v139_v44   ;;  %121 = vst [vmem:[#allocation0] ss:$16 sm:$0x3] %v120_v45  }
  0x25   :  { %125 = vst [vmem:[#allocation0 + $0x8] ss:$16 sm:$0x3] %v123_v46   ;;  %129 = vst [vmem:[#allocation0 + $0x1] ss:$16 sm:$0x3] %v127_v47  }
  0x26   :  { %v340_v48 = vld [vmem:[#allocation0 + $0xa8] sm:$0x3]  ;;  %v352_v49 = vld [vmem:[#allocation0 + $0xb8] sm:$0x3]  ;;  %v334_v50 = vld [vmem:[#allocation0 + $0xa0] sm:$0x3] }
  0x27   :  { %444 = vst [vmem:[%s602_s1 + $0x2a] sm:$0x3] %v340_v48  ;;  %v346_v51 = vld [vmem:[#allocation0 + $0xb0] sm:$0x3]  ;;  %446 = vst [vmem:[%s602_s1 + $0x2e] sm:$0x3] %v352_v49 }
  0x28   :  { %v310_v52 = vld [vmem:[#allocation0 + $0x80] sm:$0x3]  ;;  %v316_v53 = vld [vmem:[#allocation0 + $0x88] sm:$0x3]  ;;  %v322_v54 = vld [vmem:[#allocation0 + $0x90] sm:$0x3] }
  0x29   :  { %443 = vst [vmem:[%s602_s1 + $0x28] sm:$0x3] %v334_v50  ;;  %445 = vst [vmem:[%s602_s1 + $0x2c] sm:$0x3] %v346_v51  ;;  %v286_v55 = vld [vmem:[#allocation0 + $0x60] sm:$0x3] }
  0x2a   :  { %v292_v56 = vld [vmem:[#allocation0 + $0x68] sm:$0x3]  ;;  %v298_v57 = vld [vmem:[#allocation0 + $0x70] sm:$0x3]  ;;  %439 = vst [vmem:[%s602_s1 + $0x20] sm:$0x3] %v310_v52 }
  0x2b   :  { %440 = vst [vmem:[%s602_s1 + $0x22] sm:$0x3] %v316_v53  ;;  %441 = vst [vmem:[%s602_s1 + $0x24] sm:$0x3] %v322_v54  ;;  %v268_v58 = vld [vmem:[#allocation0 + $0x48] sm:$0x3] }
  0x2c   :  { %v280_v59 = vld [vmem:[#allocation0 + $0x58] sm:$0x3]  ;;  %435 = vst [vmem:[%s602_s1 + $0x18] sm:$0x3] %v286_v55  ;;  %436 = vst [vmem:[%s602_s1 + $0x1a] sm:$0x3] %v292_v56 }
  0x2d   :  { %437 = vst [vmem:[%s602_s1 + $0x1c] sm:$0x3] %v298_v57  ;;  %v304_v60 = vld [vmem:[#allocation0 + $0x78] sm:$0x3]  ;;  %v262_v61 = vld [vmem:[#allocation0 + $0x40] sm:$0x3] }
  0x2e   :  { %432 = vst [vmem:[%s602_s1 + $0x12] sm:$0x3] %v268_v58  ;;  %v274_v62 = vld [vmem:[#allocation0 + $0x50] sm:$0x3]  ;;  %434 = vst [vmem:[%s602_s1 + $0x16] sm:$0x3] %v280_v59 }
  0x2f   :  { %438 = vst [vmem:[%s602_s1 + $0x1e] sm:$0x3] %v304_v60  ;;  %v328_v63 = vld [vmem:[#allocation0 + $0x98] sm:$0x3]  ;;  %v238_v0 = vld [vmem:[#allocation0 + $0x20] sm:$0x3] }
  0x30   :  { %v244_v1 = vld [vmem:[#allocation0 + $0x28] sm:$0x3]  ;;  %v250_v2 = vld [vmem:[#allocation0 + $0x30] sm:$0x3]  ;;  %431 = vst [vmem:[%s602_s1 + $0x10] sm:$0x3] %v262_v61 }
  0x31   :  { %433 = vst [vmem:[%s602_s1 + $0x14] sm:$0x3] %v274_v62  ;;  %442 = vst [vmem:[%s602_s1 + $0x26] sm:$0x3] %v328_v63  ;;  %v217_v3 = vld [vmem:[#allocation0] sm:$0x3] }
  0x32   :  { %v221_v4 = vld [vmem:[#allocation0 + $0x8] sm:$0x3]  ;;  %v226_v5 = vld [vmem:[#allocation0 + $0x10] sm:$0x3]  ;;  %427 = vst [vmem:[%s602_s1 + $0x8] sm:$0x3] %v238_v0 }
  0x33   :  { %428 = vst [vmem:[%s602_s1 + $0xa] sm:$0x3] %v244_v1  ;;  %429 = vst [vmem:[%s602_s1 + $0xc] sm:$0x3] %v250_v2  ;;  %v232_v6 = vld [vmem:[#allocation0 + $0x18] sm:$0x3] }
  0x34   :  { %219 = vst [vmem:[%s602_s1] sm:$0x3] %v217_v3  ;;  %424 = vst [vmem:[%s602_s1 + $0x2] sm:$0x3] %v221_v4  ;;  %v256_v7 = vld [vmem:[#allocation0 + $0x38] sm:$0x3] }
  0x35   :  { %425 = vst [vmem:[%s602_s1 + $0x4] sm:$0x3] %v226_v5  ;;  %426 = vst [vmem:[%s602_s1 + $0x6] sm:$0x3] %v232_v6 }
  0x36   :  { %430 = vst [vmem:[%s602_s1 + $0xe] sm:$0x3] %v256_v7 }

// kernel: wsm_layer_forward.1
= control target key start
LH: loop header
LB: loop body
LE: loop exit
PB: predicated region body
PF: predicated region fallthrough
CT: control target
= control target key end

     0   :  { %v5805_v0 = vmov 0.0   ;;  %vm5806_vm0 = vmmov 0   ;;  %v8103_v6 = vmov 0   ;;  %vm88_vm1 = vcmask 261120   ;;  %s5809_s21 = smov 17   ;;  %s5810_s22 = smov 113   ;;  %s8080_s0 = inlined_call_operand.vmem [shape: f32[1,32,128], index: 0, kind: input, shape index: {}]   ;;  %s8081_s2 = inlined_call_operand.vmem [shape: f32[16,1], index: 2, kind: input, shape index: {}]   ;;  %s8082_s1 = inlined_call_operand.vmem [shape: bf16[16,32], index: 1, kind: input, shape index: {}]   ;;  %s8083_s4 = inlined_call_operand.vmem [shape: f32[40,1], index: 4, kind: input, shape index: {}]   ;;  %s8084_s3 = inlined_call_operand.vmem [shape: bf16[160,16], index: 3, kind: input, shape index: {}]   ;;  %s8085_s5 = inlined_call_operand.vmem [shape: bf16[4,128,512], index: 5, kind: input, shape index: {}]   ;;  %s8086_s18 = inlined_call_operand.vmem [shape: f32[25,1,512], index: 18, kind: input, shape index: {}]   ;;  %s8087_s6 = inlined_call_operand.vmem [shape: bf16[8,72], index: 6, kind: input, shape index: {}]   ;;  %s8088_s8 = inlined_call_operand.vmem [shape: bf16[8,200], index: 8, kind: input, shape index: {}]   ;;  %s8089_s14 = inlined_call_operand.vmem [shape: bf16[512,32], index: 14, kind: input, shape index: {}]   ;;  %s8090_s10 = inlined_call_operand.vmem [shape: f32[3,2,2,512], index: 10, kind: input, shape index: {}]   ;;  %s8091_s11 = inlined_call_operand.vmem [shape: f32[2,1], index: 11, kind: input, shape index: {}]   ;;  %s8092_s7 = inlined_call_operand.vmem [shape: f32[8,1], index: 7, kind: input, shape index: {}]   ;;  %s8093_s13 = inlined_call_operand.vmem [shape: f32[2,1], index: 13, kind: input, shape index: {}]   ;;  %s8094_s9 = inlined_call_operand.vmem [shape: f32[8,1], index: 9, kind: input, shape index: {}]   ;;  %s8095_s15 = inlined_call_operand.vmem [shape: bf16[32,512], index: 15, kind: input, shape index: {}]   ;;  %s8096_s16 = inlined_call_operand.vmem [shape: bf16[512,32], index: 16, kind: input, shape index: {}]   ;;  %s8097_s12 = inlined_call_operand.vmem [shape: f32[3,2,2,512], index: 12, kind: input, shape index: {}]   ;;  %s8098_s19 = inlined_call_operand.vmem [shape: f32[1,16,512], index: 19, kind: output, shape index: {}]   ;;  %s8099_s17 = inlined_call_operand.vmem [shape: bf16[32,512], index: 17, kind: input, shape index: {}]  }
   0x1   :  { %8130 = sst [smem:[#allocation31_spill]] %s8080_s0  ;;  %5404 = vmatprep.subr.bf16.mxu0 %v5805_v0  ;;  %5408 = vmatprep.mubr.msk.bf16.mxu0 %vm5806_vm0, %v5805_v0  ;;  %v5513_v12 = vld [vmem:[%s8084_s3] sm:$0xff]   ;;  %vm204_vm2 = vcmask 130048   ;;  %v5525_v32 = vld [vmem:[%s8085_s5 + $0x10c] ss:$16 sps:$4 sm:$0xff]   ;;  %v5515_v34 = vld [vmem:[%s8084_s3 + $0x10] sm:$0xff]  }
   0x2   :  { %8131 = sst [smem:[#allocation32_spill]] %s8081_s2  ;;  %s8134_s20 = sld [smem:[#allocation31_spill]]  ;;  %5510 = vset.pattern.permute.xlu0 %v8103_v6  ;;  %5511 = vset.pattern.permute.xlu1 %v8103_v6  ;;  %v5526_v13 = vld [vmem:[%s8085_s5 + $0x100] ss:$16 sps:$4 sm:$0xff]   ;;  %v5528_v14 = vld [vmem:[%s8085_s5 + $0x104] ss:$16 sps:$4 sm:$0xff]  }
   0x3   :  { %8132 = sst [smem:[#allocation33_spill]] %s8082_s1  ;;  %s8135_s26 = sld [smem:[#allocation32_spill]]  ;;  %5414 = vmatprep.mubr.msk.bf16.mxu1 %vm204_vm2, %v5513_v12  ;;  %v5532_v15 = vld [vmem:[%s8085_s5 + $0x120] ss:$16 sps:$4 sm:$0xff]   ;;  %v5534_v16 = vld [vmem:[%s8085_s5 + $0x124] ss:$16 sps:$4 sm:$0xff]  }
   0x4   :  { %8133 = sst [smem:[#allocation34_spill]] %s8083_s4  ;;  %s8136_s30 = sld [smem:[#allocation33_spill]]  ;;  %v5540_v17 = vld [vmem:[%s8085_s5 + $0x144] ss:$16 sps:$4 sm:$0xff]   ;;  %v5538_v18 = vld [vmem:[%s8085_s5 + $0x140] ss:$16 sps:$4 sm:$0xff]  }
   0x5   :  { %s8137_s2 = sld [smem:[#allocation34_spill]]  ;;  %v5546_v19 = vld [vmem:[%s8085_s5 + $0x164] ss:$16 sps:$4 sm:$0xff]   ;;  %v5544_v20 = vld [vmem:[%s8085_s5 + $0x160] ss:$16 sps:$4 sm:$0xff]   ;;  %v5514_v33 = vld [vmem:[%s8084_s3 + $0x8] sm:$0xff]  }
   0x6   :  { %v5549_v21 = vld [vmem:[%s8085_s5 + $0x184] ss:$16 sps:$4 sm:$0xff]   ;;  %v5547_v22 = vld [vmem:[%s8085_s5 + $0x180] ss:$16 sps:$4 sm:$0xff]   ;;  %v5523_v35 = vld [vmem:[%s8085_s5 + $0x108] ss:$16 sps:$4 sm:$0xff]  }
   0x7   :  { %v5531_v36 = vld [vmem:[%s8085_s5 + $0x12c] ss:$16 sps:$4 sm:$0xff]   ;;  %v5529_v37 = vld [vmem:[%s8085_s5 + $0x128] ss:$16 sps:$4 sm:$0xff]   ;;  %v5517_v40 = vld [vmem:[%s8084_s3 + $0x20] sm:$0xff]   ;;  %s5811_s1 = smov 16  }
   0x8   :  { %v63_v1 = vld [vmem:[%s8134_s20] sm:$0xff]  ;;  %v64_v2 = vld [vmem:[%s8134_s20 + $0x8] sm:$0xff]  ;;  %v65_v3 = vld [vmem:[%s8134_s20 + $0x10] sm:$0xff]  ;;  %s5812_s23 = smov 112   ;;  %s5813_s24 = smov 15   ;;  %vm2062_vm13 = vcmask 1043456  }
   0x9   :  { %v69_v4 = vpack.c.bf16 %v64_v2, %v63_v1  ;;  %v66_v5 = vld [vmem:[%s8134_s20 + $0x18] sm:$0xff]  ;;  %v71_v7 = vld [vmem:[%s8135_s26] sm:$0xff]  ;;  %v72_v9 = vld [vmem:[%s8135_s26 + $0x8] sm:$0xff]  ;;  %s5814_s25 = smov 111   ;;  %s5815_s4 = smov 1   ;;  %vm2058_vm14 = vcmask 588800  }
   0xa   :  { %v70_v8 = vpack.c.bf16 %v66_v5, %v65_v3  ;;  %75 = vperm.xlu0 %5510, %v71_v7   ;;  %v5512_v10 = vld [vmem:[%s8136_s30] sm:$0xff]   ;;  %v5537_v38 = vld [vmem:[%s8085_s5 + $0x14c] ss:$16 sps:$4 sm:$0xff]   ;;  %v5535_v41 = vld [vmem:[%s8085_s5 + $0x148] ss:$16 sps:$4 sm:$0xff]   ;;  %s5816_s26 = smov 34  }
   0xb   :  { %5405 = vmatpush3.bf16.msra.mxu0 %v69_v4  ;;  %v1662_v11 = vld [vmem:[%s8137_s2 + $0x18] sm:$0xff]  ;;  %v5518_v45 = vld [vmem:[%s8084_s3 + $0x28] sm:$0xff]   ;;  %v5519_v46 = vld [vmem:[%s8084_s3 + $0x30] sm:$0xff]   ;;  %s5817_s27 = smov 33   ;;  %s5818_s28 = smov 32  }
   0xc   :  { %5406 = vmatprep.subr.bf16.mxu0 %v5805_v0  ;;  %v5516_v39 = vld [vmem:[%s8084_s3 + $0x18] sm:$0xff]   ;;  %v5521_v49 = vld [vmem:[%s8084_s3 + $0x40] sm:$0xff]   ;;  %v5522_v50 = vld [vmem:[%s8084_s3 + $0x48] sm:$0xff]   ;;  %s5819_s29 = smov 31   ;;  %s5820_s0 = smov 30  }
   0xd   :  { %v5543_v42 = vld [vmem:[%s8085_s5 + $0x16c] ss:$16 sps:$4 sm:$0xff]   ;;  %v5541_v43 = vld [vmem:[%s8085_s5 + $0x168] ss:$16 sps:$4 sm:$0xff]   ;;  %v5555_v51 = vld [vmem:[%s8085_s5 + $0x1a4] ss:$16 sps:$4 sm:$0xff]  }
   0xe   :  { %80 = vperm.xlu0 %5510, %v72_v9   ;;  %v5552_v44 = vld [vmem:[%s8085_s5 + $0x18c] ss:$16 sps:$4 sm:$0xff]   ;;  %v5550_v47 = vld [vmem:[%s8085_s5 + $0x188] ss:$16 sps:$4 sm:$0xff]   ;;  %v5553_v53 = vld [vmem:[%s8085_s5 + $0x1a0] ss:$16 sps:$4 sm:$0xff]  }
   0xf   :  { %5407 = vmatpush3.bf16.msra.mxu0 %v70_v8  ;;  %v5520_v48 = vld [vmem:[%s8084_s3 + $0x38] sm:$0xff]   ;;  %v5561_v55 = vld [vmem:[%s8085_s5 + $0x1c4] ss:$16 sps:$4 sm:$0xff]   ;;  %v5559_v57 = vld [vmem:[%s8085_s5 + $0x1c0] ss:$16 sps:$4 sm:$0xff]   ;;  %s5821_s30 = smov 18  }
  0x10   :  { %579 = vmatprep.subr.bf16.mxu0 %v5528_v14  ;;  %v5558_v52 = vld [vmem:[%s8085_s5 + $0x1ac] ss:$16 sps:$4 sm:$0xff]   ;;  %v5556_v54 = vld [vmem:[%s8085_s5 + $0x1a8] ss:$16 sps:$4 sm:$0xff]   ;;  %v5567_v59 = vld [vmem:[%s8085_s5 + $0x1e4] ss:$16 sps:$4 sm:$0xff]  }
  0x11   :  { %v5564_v56 = vld [vmem:[%s8085_s5 + $0x1cc] ss:$16 sps:$4 sm:$0xff]   ;;  %v5562_v58 = vld [vmem:[%s8085_s5 + $0x1c8] ss:$16 sps:$4 sm:$0xff]   ;;  %v5565_v61 = vld [vmem:[%s8085_s5 + $0x1e0] ss:$16 sps:$4 sm:$0xff]  }
  0x12   :  { %5409 = vmatmul.mubr.msk.bf16.vlgmr.msra.gmra.mrb[0].mxu0 %vm88_vm1, %v5512_v10  ;;  %1681 = vperm.xlu0 %5510, %v1662_v11   ;;  %v5570_v60 = vld [vmem:[%s8085_s5 + $0x1ec] ss:$16 sps:$4 sm:$0xff]   ;;  %v5568_v62 = vld [vmem:[%s8085_s5 + $0x1e8] ss:$16 sps:$4 sm:$0xff]   ;;  %v5573_v63 = vld [vmem:[%s8085_s5 + $0x4] ss:$16 sps:$4 sm:$0xff]  }
  0x13   :  { %611 = vmatprep.mubr.bf16.mxu0 %v8103_v6  ;;  %580 = vmatpush1.bf16.msra.mxu0 %v5526_v13  ;;  %v5576_v0 = vld [vmem:[%s8085_s5 + $0xc] ss:$16 sps:$4 sm:$0xff]   ;;  %v1661_v3 = vld [vmem:[%s8137_s2 + $0x10] sm:$0xff]  ;;  %s5822_s3 = smov 14   ;;  %s5823_s20 = smov 2  }
  0x14   :  { %581 = vmatprep.subr.bf16.mxu0 %v5534_v16  ;;  %v1660_v1 = vld [vmem:[%s8137_s2 + $0x8] sm:$0xff]  ;;  %v5571_v14 = vld [vmem:[%s8085_s5] ss:$16 sps:$4 sm:$0xff]  }
  0x15   :  { %1671 = vperm.xlu1 %5511, %v1660_v1   ;;  %v5619_v1 = vld [vmem:[%s8085_s5 + $0x200] ss:$16 sps:$4 sm:$0xff]  }
  0x17   :  { %582 = vmatpush1.bf16.msra.mxu0 %v5532_v15  ;;  %v5574_v15 = vld [vmem:[%s8085_s5 + $0x8] ss:$16 sps:$4 sm:$0xff]  }
  0x18   :  { %583 = vmatprep.subr.bf16.mxu0 %v5540_v17  ;;  %v5579_v17 = vld [vmem:[%s8085_s5 + $0x24] ss:$16 sps:$4 sm:$0xff]  }
  0x19   :  { %1676 = vperm.xlu1 %5511, %v1661_v3   ;;  %v5627_v3 = vld [vmem:[%s8085_s5 + $0x224] ss:$16 sps:$4 sm:$0xff]  }
  0x1b   :  { %584 = vmatpush1.bf16.msra.mxu0 %v5538_v18  ;;  %v5582_v18 = vld [vmem:[%s8085_s5 + $0x2c] ss:$16 sps:$4 sm:$0xff]  }
  0x1c   :  { %585 = vmatprep.subr.bf16.mxu0 %v5546_v19  ;;  %v5577_v19 = vld [vmem:[%s8085_s5 + $0x20] ss:$16 sps:$4 sm:$0xff]  }
  0x1f   :  { %586 = vmatpush1.bf16.msra.mxu0 %v5544_v20  ;;  %v5580_v20 = vld [vmem:[%s8085_s5 + $0x28] ss:$16 sps:$4 sm:$0xff]  }
  0x20   :  { %587 = vmatprep.subr.bf16.mxu0 %v5549_v21 }
  0x23   :  { %588 = vmatpush1.bf16.msra.mxu0 %v5547_v22  ;;  %v5585_v22 = vld [vmem:[%s8085_s5 + $0x44] ss:$16 sps:$4 sm:$0xff]  }
  0x24   :  { %589 = vmatprep.subr.bf16.mxu0 %v5555_v51 }
  0x27   :  { %590 = vmatpush1.bf16.msra.mxu0 %v5553_v53 }
  0x28   :  { %591 = vmatprep.subr.bf16.mxu0 %v5561_v55  ;;  %v5607_v55 = vld [vmem:[%s8085_s5 + $0xc0] ss:$16 sps:$4 sm:$0xff]  }
  0x2b   :  { %592 = vmatpush1.bf16.msra.mxu0 %v5559_v57 }
  0x2c   :  { %593 = vmatprep.subr.bf16.mxu0 %v5567_v59  ;;  %v5618_v59 = vld [vmem:[%s8085_s5 + $0xec] ss:$16 sps:$4 sm:$0xff]  }
  0x2f   :  { %594 = vmatpush1.bf16.msra.mxu0 %v5565_v61  ;;  %v5613_v61 = vld [vmem:[%s8085_s5 + $0xe0] ss:$16 sps:$4 sm:$0xff]  }
  0x30   :  { %861 = vmatprep.subr.bf16.mxu0 %v5573_v63  ;;  %v5621_v63 = vld [vmem:[%s8085_s5 + $0x204] ss:$16 sps:$4 sm:$0xff]  }
  0x89   :  { %v76_v23 = vpop.permute.xlu0 %75 }
  0x8d   :  { %v81_v26 = vpop.permute.xlu0 %80 }
  0xe5   :  { %v126_v24 = vpop.f32.mrb[0].mxu0 }
  0xe6   :  { %v5410_v25 = vpop.f32.mrb[1].mxu0  ;;  %v127_v28 = vadd.f32 %v126_v24, %v76_v23  ;;  %v5588_v23 = vld [vmem:[%s8085_s5 + $0x4c] ss:$16 sps:$4 sm:$0xff]  }
  0xe7   :  { %v129_v27 = vpop.f32.mrb[2].mxu0 }
  0xe8   :  { %v130_v29 = vadd.f32 %v129_v27, %v81_v26  ;;  %v5411_v30 = vpop.f32.mrb[3].mxu0  ;;  %v5583_v27 = vld [vmem:[%s8085_s5 + $0x40] ss:$16 sps:$4 sm:$0xff]  }
  0xea   :  { %v153_v31 = vpack.c.bf16 %v130_v29, %v127_v28  ;;  %v5586_v28 = vld [vmem:[%s8085_s5 + $0x48] ss:$16 sps:$4 sm:$0xff]  }
  0xec   :  { %5412 = vmatprep.subr.bf16.mxu1 %v153_v31 }
  0xed   :  { %5413 = vmatpush3.bf16.msra.mxu1 %v153_v31  ;;  %v5591_v31 = vld [vmem:[%s8085_s5 + $0x64] ss:$16 sps:$4 sm:$0xff]  }
  0xee   :  { %640 = vmatprep.subr.bf16.mxu1 %v5525_v32  ;;  %v5594_v32 = vld [vmem:[%s8085_s5 + $0x6c] ss:$16 sps:$4 sm:$0xff]  }
  0xf0   :  { %5415 = vmatmul.mubr.msk.bf16.vlgmr.msra.gmra.mrb[0].mxu1 %vm204_vm2, %v5514_v33  ;;  %v5589_v33 = vld [vmem:[%s8085_s5 + $0x60] ss:$16 sps:$4 sm:$0xff]  }
  0xf1   :  { %5418 = vmatprep.mubr.msk.bf16.mxu1 %vm204_vm2, %v5515_v34  ;;  %641 = vmatpush1.bf16.msra.mxu1 %v5523_v35  ;;  %v5592_v34 = vld [vmem:[%s8085_s5 + $0x68] ss:$16 sps:$4 sm:$0xff]   ;;  %v5597_v35 = vld [vmem:[%s8085_s5 + $0x84] ss:$16 sps:$4 sm:$0xff]  }
  0xf2   :  { %642 = vmatprep.subr.bf16.mxu1 %v5531_v36  ;;  %v5600_v36 = vld [vmem:[%s8085_s5 + $0x8c] ss:$16 sps:$4 sm:$0xff]  }
  0xf5   :  { %643 = vmatpush1.bf16.msra.mxu1 %v5529_v37 }
  0xf6   :  { %644 = vmatprep.subr.bf16.mxu1 %v5537_v38 }
  0xf8   :  { %5419 = vmatmul.mubr.msk.bf16.gmra.mrb[4].mxu1 %vm204_vm2, %v5516_v39 }
  0xf9   :  { %5422 = vmatprep.mubr.msk.bf16.mxu1 %vm204_vm2, %v5517_v40  ;;  %645 = vmatpush1.bf16.msra.mxu1 %v5535_v41  ;;  %v5595_v41 = vld [vmem:[%s8085_s5 + $0x80] ss:$16 sps:$4 sm:$0xff]  }
  0xfa   :  { %646 = vmatprep.subr.bf16.mxu1 %v5543_v42  ;;  %v5598_v42 = vld [vmem:[%s8085_s5 + $0x88] ss:$16 sps:$4 sm:$0xff]  }
  0xfd   :  { %647 = vmatpush1.bf16.msra.mxu1 %v5541_v43 }
  0xfe   :  { %648 = vmatprep.subr.bf16.mxu1 %v5552_v44  ;;  %v5603_v44 = vld [vmem:[%s8085_s5 + $0xa4] ss:$16 sps:$4 sm:$0xff]  }
 0x100   :  { %5423 = vmatmul.mubr.msk.bf16.gmra.mrb[8].mxu1 %vm204_vm2, %v5518_v45  ;;  %v5606_v45 = vld [vmem:[%s8085_s5 + $0xac] ss:$16 sps:$4 sm:$0xff]  }
 0x101   :  { %5426 = vmatprep.mubr.msk.bf16.mxu1 %vm204_vm2, %v5519_v46  ;;  %649 = vmatpush1.bf16.msra.mxu1 %v5550_v47  ;;  %v5601_v47 = vld [vmem:[%s8085_s5 + $0xa0] ss:$16 sps:$4 sm:$0xff]  }
 0x102   :  { %650 = vmatprep.subr.bf16.mxu1 %v5558_v52 }
 0x105   :  { %651 = vmatpush1.bf16.msra.mxu1 %v5556_v54 }
 0x106   :  { %652 = vmatprep.subr.bf16.mxu1 %v5564_v56  ;;  %v5610_v56 = vld [vmem:[%s8085_s5 + $0xc8] ss:$16 sps:$4 sm:$0xff]  }
 0x108   :  { %5427 = vmatmul.mubr.msk.bf16.gmra.mrb[12].mxu1 %vm204_vm2, %v5520_v48  ;;  %v5604_v48 = vld [vmem:[%s8085_s5 + $0xa8] ss:$16 sps:$4 sm:$0xff]  }
 0x109   :  { %5430 = vmatprep.mubr.msk.bf16.mxu1 %vm204_vm2, %v5521_v49  ;;  %653 = vmatpush1.bf16.msra.mxu1 %v5562_v58  ;;  %v5609_v49 = vld [vmem:[%s8085_s5 + $0xc4] ss:$16 sps:$4 sm:$0xff]  }
 0x10a   :  { %654 = vmatprep.subr.bf16.mxu1 %v5570_v60  ;;  %v5615_v58 = vld [vmem:[%s8085_s5 + $0xe4] ss:$16 sps:$4 sm:$0xff]  }
 0x10d   :  { %655 = vmatpush1.bf16.msra.mxu1 %v5568_v62  ;;  %v5616_v62 = vld [vmem:[%s8085_s5 + $0xe8] ss:$16 sps:$4 sm:$0xff]  }
 0x10e   :  { %922 = vmatprep.subr.bf16.mxu1 %v5576_v0  ;;  %v5624_v0 = vld [vmem:[%s8085_s5 + $0x20c] ss:$16 sps:$4 sm:$0xff]  }
 0x110   :  { %5431 = vmatmul.mubr.msk.bf16.gmra.mrb[16].mxu1 %vm204_vm2, %v5522_v50  ;;  %v5612_v50 = vld [vmem:[%s8085_s5 + $0xcc] ss:$16 sps:$4 sm:$0xff]  }
 0x111   :  { %672 = vmatprep.mubr.bf16.mxu1 %v8103_v6 }
 0x1c3   :  { %v5416_v2 = vpop.f32.mrb[0].mxu1 }
 0x1c4   :  { %v269_v4 = vpop.f32.mrb[1].mxu1 }
 0x1c5   :  { %v5417_v5 = vpop.f32.mrb[2].mxu1 }
 0x1c6   :  { %v6110_v7 = vpack.c.bf16 %v5417_v5, %v5416_v2  ;;  %v272_v8 = vpop.f32.mrb[3].mxu1  ;;  %v5622_v2 = vld [vmem:[%s8085_s5 + $0x208] ss:$16 sps:$4 sm:$0xff]   ;;  %v5625_v5 = vld [vmem:[%s8085_s5 + $0x220] ss:$16 sps:$4 sm:$0xff]  }
 0x1c7   :  { %v6112_v9 = vpack.c.bf16 %v272_v8, %v269_v4  ;;  %v5630_v4 = vld [vmem:[%s8085_s5 + $0x22c] ss:$16 sps:$4 sm:$0xff]   ;;  %v5628_v8 = vld [vmem:[%s8085_s5 + $0x228] ss:$16 sps:$4 sm:$0xff]  }
 0x1cb   :  { %v5420_v10 = vpop.f32.mrb[4].mxu1 }
 0x1cc   :  { %v6114_v11 = vpop.f32.mrb[5].mxu1 }
 0x1cd   :  { %v5421_v12 = vpop.f32.mrb[6].mxu1 }
 0x1ce   :  { %v288_v13 = vpop.f32.mrb[7].mxu1 }
 0x1cf   :  { %v383_v16 = vpack.c.bf16 %v5420_v10, %v288_v13  ;;  %v5633_v10 = vld [vmem:[%s8085_s5 + $0x244] ss:$16 sps:$4 sm:$0xff]   ;;  %v5634_v13 = vld [vmem:[%s8085_s5 + $0x248] ss:$16 sps:$4 sm:$0xff]  }
 0x1d1   :  { %612 = vmatmul.mubr.bf16.vlgmr.msra.gmra.mrb[4].mxu0 %v383_v16  ;;  %673 = vmatmul.mubr.bf16.vlgmr.msra.gmra.mrb[20].mxu1 %v383_v16  ;;  %v5637_v16 = vld [vmem:[%s8085_s5 + $0x260] ss:$16 sps:$4 sm:$0xff]  }
 0x1d2   :  { %862 = vmatpush1.bf16.msra.mxu0 %v5571_v14  ;;  %923 = vmatpush1.bf16.msra.mxu1 %v5574_v15  ;;  %v5639_v14 = vld [vmem:[%s8085_s5 + $0x264] ss:$16 sps:$4 sm:$0xff]   ;;  %v5642_v15 = vld [vmem:[%s8085_s5 + $0x26c] ss:$16 sps:$4 sm:$0xff]  }
 0x1d3   :  { %v5424_v21 = vpop.f32.mrb[8].mxu1  ;;  %863 = vmatprep.subr.bf16.mxu0 %v5579_v17  ;;  %924 = vmatprep.subr.bf16.mxu1 %v5582_v18  ;;  %v5640_v17 = vld [vmem:[%s8085_s5 + $0x268] ss:$16 sps:$4 sm:$0xff]   ;;  %v5645_v18 = vld [vmem:[%s8085_s5 + $0x284] ss:$16 sps:$4 sm:$0xff]  }
 0x1d4   :  { %v301_v24 = vpop.f32.mrb[9].mxu1  ;;  %621 = vmatprep.mubr.bf16.mxu0 %v8103_v6  ;;  %682 = vmatprep.mubr.bf16.mxu1 %v8103_v6 }
 0x1d5   :  { %v384_v25 = vpack.c.bf16 %v301_v24, %v5421_v12  ;;  %v5425_v26 = vpop.f32.mrb[10].mxu1  ;;  %v5631_v12 = vld [vmem:[%s8085_s5 + $0x240] ss:$16 sps:$4 sm:$0xff]  }
 0x1d6   :  { %864 = vmatpush1.bf16.msra.mxu0 %v5577_v19  ;;  %925 = vmatpush1.bf16.msra.mxu1 %v5580_v20  ;;  %v6148_v29 = vpack.c.bf16 %v5425_v26, %v5424_v21  ;;  %v304_v30 = vpop.f32.mrb[11].mxu1  ;;  %v5643_v19 = vld [vmem:[%s8085_s5 + $0x280] ss:$16 sps:$4 sm:$0xff]   ;;  %v5646_v20 = vld [vmem:[%s8085_s5 + $0x288] ss:$16 sps:$4 sm:$0xff]   ;;  %v350_v21 = vpack.c.bf16 %v6114_v11, %v6114_v11 }
 0x1d7   :  { %865 = vmatprep.subr.bf16.mxu0 %v5585_v22  ;;  %926 = vmatprep.subr.bf16.mxu1 %v5588_v23  ;;  %v385_v39 = vpack.c.bf16 %v304_v30, %v304_v30  ;;  %v5651_v22 = vld [vmem:[%s8085_s5 + $0x2a4] ss:$16 sps:$4 sm:$0xff]   ;;  %v5654_v23 = vld [vmem:[%s8085_s5 + $0x2ac] ss:$16 sps:$4 sm:$0xff]   ;;  %v5649_v24 = vld [vmem:[%s8085_s5 + $0x2a0] ss:$16 sps:$4 sm:$0xff]  }
 0x1d8   :  { %v5652_v11 = vld [vmem:[%s8085_s5 + $0x2a8] ss:$16 sps:$4 sm:$0xff]   ;;  %v5660_v26 = vld [vmem:[%s8085_s5 + $0x2cc] ss:$16 sps:$4 sm:$0xff]   ;;  %v5663_v30 = vld [vmem:[%s8085_s5 + $0x2e4] ss:$16 sps:$4 sm:$0xff]  }
 0x1d9   :  { %622 = vmatmul.mubr.bf16.gmra.mrb[8].mxu0 %v384_v25  ;;  %683 = vmatmul.mubr.bf16.gmra.mrb[24].mxu1 %v384_v25  ;;  %v5657_v25 = vld [vmem:[%s8085_s5 + $0x2c4] ss:$16 sps:$4 sm:$0xff]  }
 0x1da   :  { %866 = vmatpush1.bf16.msra.mxu0 %v5583_v27  ;;  %927 = vmatpush1.bf16.msra.mxu1 %v5586_v28  ;;  %v5655_v27 = vld [vmem:[%s8085_s5 + $0x2c0] ss:$16 sps:$4 sm:$0xff]   ;;  %v5658_v28 = vld [vmem:[%s8085_s5 + $0x2c8] ss:$16 sps:$4 sm:$0xff]  }
 0x1db   :  { %867 = vmatprep.subr.bf16.mxu0 %v5591_v31  ;;  %928 = vmatprep.subr.bf16.mxu1 %v5594_v32  ;;  %v6168_v37 = vpop.f32.mrb[12].mxu1  ;;  %v5666_v31 = vld [vmem:[%s8085_s5 + $0x2ec] ss:$16 sps:$4 sm:$0xff]   ;;  %v5661_v32 = vld [vmem:[%s8085_s5 + $0x2e0] ss:$16 sps:$4 sm:$0xff]  }
 0x1dc   :  { %631 = vmatprep.mubr.bf16.mxu0 %v8103_v6  ;;  %692 = vmatprep.mubr.bf16.mxu1 %v8103_v6  ;;  %v317_v38 = vpop.f32.mrb[13].mxu1 }
 0x1dd   :  { %v5429_v40 = vpop.f32.mrb[14].mxu1 }
 0x1de   :  { %868 = vmatpush1.bf16.msra.mxu0 %v5589_v33  ;;  %929 = vmatpush1.bf16.msra.mxu1 %v5592_v34  ;;  %v320_v43 = vpop.f32.mrb[15].mxu1  ;;  %v5664_v33 = vld [vmem:[%s8085_s5 + $0x2e8] ss:$16 sps:$4 sm:$0xff]   ;;  %v5669_v34 = vld [vmem:[%s8085_s5 + $0x304] ss:$16 sps:$4 sm:$0xff]  }
 0x1df   :  { %869 = vmatprep.subr.bf16.mxu0 %v5597_v35  ;;  %930 = vmatprep.subr.bf16.mxu1 %v5600_v36  ;;  %v6184_v46 = vpack.c.bf16 %v320_v43, %v317_v38  ;;  %v5672_v35 = vld [vmem:[%s8085_s5 + $0x30c] ss:$16 sps:$4 sm:$0xff]   ;;  %v5667_v36 = vld [vmem:[%s8085_s5 + $0x300] ss:$16 sps:$4 sm:$0xff]   ;;  %v5670_v38 = vld [vmem:[%s8085_s5 + $0x308] ss:$16 sps:$4 sm:$0xff]  }
 0x1e0   :  { %v5681_v43 = vld [vmem:[%s8085_s5 + $0x344] ss:$16 sps:$4 sm:$0xff]  }
 0x1e1   :  { %632 = vmatmul.mubr.bf16.gmra.mrb[12].mxu0 %v385_v39  ;;  %693 = vmatmul.mubr.bf16.gmra.mrb[28].mxu1 %v385_v39  ;;  %v5675_v39 = vld [vmem:[%s8085_s5 + $0x324] ss:$16 sps:$4 sm:$0xff]  }
 0x1e2   :  { %870 = vmatpush1.bf16.msra.mxu0 %v5595_v41  ;;  %931 = vmatpush1.bf16.msra.mxu1 %v5598_v42  ;;  %v5673_v41 = vld [vmem:[%s8085_s5 + $0x320] ss:$16 sps:$4 sm:$0xff]   ;;  %v5676_v42 = vld [vmem:[%s8085_s5 + $0x328] ss:$16 sps:$4 sm:$0xff]  }
 0x1e3   :  { %871 = vmatprep.subr.bf16.mxu0 %v5603_v44  ;;  %932 = vmatprep.subr.bf16.mxu1 %v5606_v45  ;;  %v5432_v51 = vpop.f32.mrb[16].mxu1  ;;  %v5679_v44 = vld [vmem:[%s8085_s5 + $0x340] ss:$16 sps:$4 sm:$0xff]   ;;  %v5682_v45 = vld [vmem:[%s8085_s5 + $0x348] ss:$16 sps:$4 sm:$0xff]  }
 0x1e4   :  { %893 = vmatprep.mubr.bf16.mxu0 %v8103_v6  ;;  %954 = vmatprep.mubr.bf16.mxu1 %v8103_v6  ;;  %v333_v52 = vpop.f32.mrb[17].mxu1 }
 0x1e5   :  { %v6200_v53 = vpack.c.bf16 %v333_v52, %v5429_v40  ;;  %v6202_v54 = vpop.f32.mrb[18].mxu1  ;;  %v5678_v40 = vld [vmem:[%s8085_s5 + $0x32c] ss:$16 sps:$4 sm:$0xff]   ;;  %v5691_v52 = vld [vmem:[%s8085_s5 + $0x380] ss:$16 sps:$4 sm:$0xff]  }
 0x1e6   :  { %872 = vmatpush1.bf16.msra.mxu0 %v5601_v47  ;;  %933 = vmatpush1.bf16.msra.mxu1 %v5604_v48  ;;  %v336_v57 = vpop.f32.mrb[19].mxu1  ;;  %v5687_v47 = vld [vmem:[%s8085_s5 + $0x364] ss:$16 sps:$4 sm:$0xff]   ;;  %v5690_v48 = vld [vmem:[%s8085_s5 + $0x36c] ss:$16 sps:$4 sm:$0xff]  }
 0x1e7   :  { %873 = vmatprep.subr.bf16.mxu0 %v5609_v49  ;;  %934 = vmatprep.subr.bf16.mxu1 %v5612_v50  ;;  %v6216_v60 = vpack.c.bf16 %v5432_v51, %v336_v57  ;;  %v5685_v49 = vld [vmem:[%s8085_s5 + $0x360] ss:$16 sps:$4 sm:$0xff]   ;;  %v5688_v50 = vld [vmem:[%s8085_s5 + $0x368] ss:$16 sps:$4 sm:$0xff]   ;;  %v5693_v51 = vld [vmem:[%s8085_s5 + $0x384] ss:$16 sps:$4 sm:$0xff]  }
 0x1e8   :  { %v5699_v57 = vld [vmem:[%s8085_s5 + $0x3a4] ss:$16 sps:$4 sm:$0xff]  }
 0x1ea   :  { %874 = vmatpush1.bf16.msra.mxu0 %v5607_v55  ;;  %935 = vmatpush1.bf16.msra.mxu1 %v5610_v56  ;;  %v5694_v55 = vld [vmem:[%s8085_s5 + $0x388] ss:$16 sps:$4 sm:$0xff]   ;;  %v985_v56 = vpack.c.bf16 %v6168_v37, %v6168_v37 }
 0x1eb   :  { %875 = vmatprep.subr.bf16.mxu0 %v5615_v58  ;;  %936 = vmatprep.subr.bf16.mxu1 %v5618_v59  ;;  %v5702_v58 = vld [vmem:[%s8085_s5 + $0x3ac] ss:$16 sps:$4 sm:$0xff]   ;;  %v5697_v59 = vld [vmem:[%s8085_s5 + $0x3a0] ss:$16 sps:$4 sm:$0xff]   ;;  %v5700_v37 = vld [vmem:[%s8085_s5 + $0x3a8] ss:$16 sps:$4 sm:$0xff]  }
 0x1ee   :  { %876 = vmatpush1.bf16.msra.mxu0 %v5613_v61  ;;  %937 = vmatpush1.bf16.msra.mxu1 %v5616_v62  ;;  %v5705_v61 = vld [vmem:[%s8085_s5 + $0x3c4] ss:$16 sps:$4 sm:$0xff]   ;;  %v5708_v62 = vld [vmem:[%s8085_s5 + $0x3cc] ss:$16 sps:$4 sm:$0xff]  }
 0x1ef   :  { %1179 = vmatprep.subr.bf16.mxu0 %v5621_v63  ;;  %1240 = vmatprep.subr.bf16.mxu1 %v5624_v0  ;;  %v5703_v63 = vld [vmem:[%s8085_s5 + $0x3c0] ss:$16 sps:$4 sm:$0xff]   ;;  %v5706_v0 = vld [vmem:[%s8085_s5 + $0x3c8] ss:$16 sps:$4 sm:$0xff]  }
 0x1f1   :  { %894 = vmatmul.mubr.bf16.vlgmr.msra.gmra.mrb[4].mxu0 %v6112_v9  ;;  %955 = vmatmul.mubr.bf16.vlgmr.msra.gmra.mrb[20].mxu1 %v6112_v9  ;;  %v5636_v9 = vld [vmem:[%s8085_s5 + $0x24c] ss:$16 sps:$4 sm:$0xff]  }
 0x1f2   :  { %1180 = vmatpush1.bf16.msra.mxu0 %v5619_v1  ;;  %1241 = vmatpush1.bf16.msra.mxu1 %v5622_v2  ;;  %v5711_v1 = vld [vmem:[%s8085_s5 + $0x3e4] ss:$16 sps:$4 sm:$0xff]   ;;  %v5714_v2 = vld [vmem:[%s8085_s5 + $0x3ec] ss:$16 sps:$4 sm:$0xff]  }
 0x1f3   :  { %1181 = vmatprep.subr.bf16.mxu0 %v5627_v3  ;;  %1242 = vmatprep.subr.bf16.mxu1 %v5630_v4  ;;  %v5709_v3 = vld [vmem:[%s8085_s5 + $0x3e0] ss:$16 sps:$4 sm:$0xff]   ;;  %v5712_v4 = vld [vmem:[%s8085_s5 + $0x3e8] ss:$16 sps:$4 sm:$0xff]  }
 0x1f4   :  { %903 = vmatprep.mubr.bf16.mxu0 %v8103_v6  ;;  %964 = vmatprep.mubr.bf16.mxu1 %v8103_v6 }
 0x1f6   :  { %1182 = vmatpush1.bf16.msra.mxu0 %v5625_v5  ;;  %1243 = vmatpush1.bf16.msra.mxu1 %v5628_v8  ;;  %v1323_v5 = vpack.c.bf16 %v6202_v54, %v6202_v54 }
 0x1f7   :  { %1183 = vmatprep.subr.bf16.mxu0 %v5633_v10  ;;  %1244 = vmatprep.subr.bf16.mxu1 %v5636_v9 }
 0x1f9   :  { %904 = vmatmul.mubr.bf16.gmra.mrb[8].mxu0 %v6110_v7  ;;  %965 = vmatmul.mubr.bf16.gmra.mrb[24].mxu1 %v6110_v7  ;;  %v5648_v7 = vld [vmem:[%s8085_s5 + $0x28c] ss:$16 sps:$4 sm:$0xff]  }
 0x1fa   :  { %1184 = vmatpush1.bf16.msra.mxu0 %v5631_v12  ;;  %1245 = vmatpush1.bf16.msra.mxu1 %v5634_v13 }
 0x1fb   :  { %1185 = vmatprep.subr.bf16.mxu0 %v5639_v14  ;;  %1246 = vmatprep.subr.bf16.mxu1 %v5642_v15 }
 0x1fc   :  { %913 = vmatprep.mubr.bf16.mxu0 %v8103_v6  ;;  %974 = vmatprep.mubr.bf16.mxu1 %v8103_v6 }
 0x1fe   :  { %1186 = vmatpush1.bf16.msra.mxu0 %v5637_v16  ;;  %1247 = vmatpush1.bf16.msra.mxu1 %v5640_v17 }
 0x1ff   :  { %1187 = vmatprep.subr.bf16.mxu0 %v5645_v18  ;;  %1248 = vmatprep.subr.bf16.mxu1 %v5648_v7 }
 0x201   :  { %914 = vmatmul.mubr.bf16.gmra.mrb[16].mxu0 %v350_v21  ;;  %975 = vmatmul.mubr.bf16.gmra.mrb[32].mxu1 %v350_v21 }
 0x202   :  { %1188 = vmatpush1.bf16.msra.mxu0 %v5643_v19  ;;  %1249 = vmatpush1.bf16.msra.mxu1 %v5646_v20 }
 0x203   :  { %1189 = vmatprep.subr.bf16.mxu0 %v5651_v22  ;;  %1250 = vmatprep.subr.bf16.mxu1 %v5654_v23 }
 0x204   :  { %1211 = vmatprep.mubr.bf16.mxu0 %v8103_v6  ;;  %1272 = vmatprep.mubr.bf16.mxu1 %v8103_v6 }
 0x206   :  { %1190 = vmatpush1.bf16.msra.mxu0 %v5649_v24  ;;  %1251 = vmatpush1.bf16.msra.mxu1 %v5652_v11 }
 0x207   :  { %1191 = vmatprep.subr.bf16.mxu0 %v5657_v25  ;;  %1252 = vmatprep.subr.bf16.mxu1 %v5660_v26 }
 0x20a   :  { %1192 = vmatpush1.bf16.msra.mxu0 %v5655_v27  ;;  %1253 = vmatpush1.bf16.msra.mxu1 %v5658_v28 }
 0x20b   :  { %1193 = vmatprep.subr.bf16.mxu0 %v5663_v30  ;;  %1254 = vmatprep.subr.bf16.mxu1 %v5666_v31 }
 0x20e   :  { %1194 = vmatpush1.bf16.msra.mxu0 %v5661_v32  ;;  %1255 = vmatpush1.bf16.msra.mxu1 %v5664_v33 }
 0x20f   :  { %1517 = vmatprep.subr.bf16.mxu0 %v5669_v34  ;;  %1578 = vmatprep.subr.bf16.mxu1 %v5672_v35 }
 0x211   :  { %1212 = vmatmul.mubr.bf16.vlgmr.msra.gmra.mrb[4].mxu0 %v6148_v29  ;;  %1273 = vmatmul.mubr.bf16.vlgmr.msra.gmra.mrb[20].mxu1 %v6148_v29  ;;  %v5684_v29 = vld [vmem:[%s8085_s5 + $0x34c] ss:$16 sps:$4 sm:$0xff]  }
 0x212   :  { %1518 = vmatpush1.bf16.msra.mxu0 %v5667_v36  ;;  %1579 = vmatpush1.bf16.msra.mxu1 %v5670_v38  ;;  %v1672_v38 = vpop.permute.xlu1 %1671 }
 0x213   :  { %1519 = vmatprep.subr.bf16.mxu0 %v5675_v39  ;;  %1580 = vmatprep.subr.bf16.mxu1 %v5678_v40 }
 0x214   :  { %1221 = vmatprep.mubr.bf16.mxu0 %v8103_v6  ;;  %1282 = vmatprep.mubr.bf16.mxu1 %v8103_v6 }
 0x216   :  { %1520 = vmatpush1.bf16.msra.mxu0 %v5673_v41  ;;  %1581 = vmatpush1.bf16.msra.mxu1 %v5676_v42 }
 0x217   :  { %1521 = vmatprep.subr.bf16.mxu0 %v5681_v43  ;;  %1582 = vmatprep.subr.bf16.mxu1 %v5684_v29 }
 0x219   :  { %1222 = vmatmul.mubr.bf16.gmra.mrb[8].mxu0 %v6184_v46  ;;  %1283 = vmatmul.mubr.bf16.gmra.mrb[24].mxu1 %v6184_v46  ;;  %v5696_v46 = vld [vmem:[%s8085_s5 + $0x38c] ss:$16 sps:$4 sm:$0xff]   ;;  %s5808_s5 = smov 127  }
 0x21a   :  { %1522 = vmatpush1.bf16.msra.mxu0 %v5679_v44  ;;  %1583 = vmatpush1.bf16.msra.mxu1 %v5682_v45 }
 0x21b   :  { %1523 = vmatprep.subr.bf16.mxu0 %v5687_v47  ;;  %1584 = vmatprep.subr.bf16.mxu1 %v5690_v48 }
 0x21c   :  { %1231 = vmatprep.mubr.bf16.mxu0 %v8103_v6  ;;  %1292 = vmatprep.mubr.bf16.mxu1 %v8103_v6 }
 0x21e   :  { %1524 = vmatpush1.bf16.msra.mxu0 %v5685_v49  ;;  %1585 = vmatpush1.bf16.msra.mxu1 %v5688_v50 }
 0x21f   :  { %1525 = vmatprep.subr.bf16.mxu0 %v5693_v51  ;;  %1586 = vmatprep.subr.bf16.mxu1 %v5696_v46 }
 0x221   :  { %1232 = vmatmul.mubr.bf16.gmra.mrb[20].mxu0 %v985_v56  ;;  %1293 = vmatmul.mubr.bf16.gmra.mrb[36].mxu1 %v985_v56 }
 0x222   :  { %1526 = vmatpush1.bf16.msra.mxu0 %v5691_v52  ;;  %1587 = vmatpush1.bf16.msra.mxu1 %v5694_v55 }
 0x223   :  { %1527 = vmatprep.subr.bf16.mxu0 %v5699_v57  ;;  %1588 = vmatprep.subr.bf16.mxu1 %v5702_v58 }
 0x224   :  { %1549 = vmatprep.mubr.bf16.mxu0 %v8103_v6  ;;  %1610 = vmatprep.mubr.bf16.mxu1 %v8103_v6 }
 0x226   :  { %1528 = vmatpush1.bf16.msra.mxu0 %v5697_v59  ;;  %1589 = vmatpush1.bf16.msra.mxu1 %v5700_v37 }
 0x227   :  { %1529 = vmatprep.subr.bf16.mxu0 %v5705_v61  ;;  %1590 = vmatprep.subr.bf16.mxu1 %v5708_v62 }
 0x22a   :  { %1530 = vmatpush1.bf16.msra.mxu0 %v5703_v63  ;;  %1591 = vmatpush1.bf16.msra.mxu1 %v5706_v0 }
 0x22b   :  { %1531 = vmatprep.subr.bf16.mxu0 %v5711_v1  ;;  %1592 = vmatprep.subr.bf16.mxu1 %v5714_v2 }
 0x22e   :  { %1532 = vmatpush1.bf16.msra.mxu0 %v5709_v3  ;;  %1593 = vmatpush1.bf16.msra.mxu1 %v5712_v4 }
 0x231   :  { %1550 = vmatmul.mubr.bf16.vlgmr.msra.gmra.mrb[4].mxu0 %v6200_v53  ;;  %1611 = vmatmul.mubr.bf16.vlgmr.msra.gmra.mrb[20].mxu1 %v6200_v53 }
 0x232   :  { %1559 = vmatprep.mubr.bf16.mxu0 %v8103_v6  ;;  %1620 = vmatprep.mubr.bf16.mxu1 %v8103_v6 }
 0x239   :  { %1560 = vmatmul.mubr.bf16.gmra.mrb[8].mxu0 %v6216_v60  ;;  %1621 = vmatmul.mubr.bf16.gmra.mrb[24].mxu1 %v6216_v60 }
 0x23a   :  { %1569 = vmatprep.mubr.bf16.mxu0 %v8103_v6  ;;  %1630 = vmatprep.mubr.bf16.mxu1 %v8103_v6 }
 0x241   :  { %1570 = vmatmul.mubr.bf16.gmra.mrb[24].mxu0 %v1323_v5  ;;  %1631 = vmatmul.mubr.bf16.gmra.mrb[40].mxu1 %v1323_v5 }
 0x242   :  { %2107 = vmatprep.mubr.bf16.mxu0 %v8103_v6  ;;  %2148 = vmatprep.mubr.bf16.mxu1 %v8103_v6 }
 0x2b4   :  { %v633_v53 = vpop.f32.mrb[12].mxu0  ;;  %v694_v8 = vpop.f32.mrb[28].mxu1 }
 0x2b5   :  { %v635_v10 = vpop.f32.mrb[13].mxu0  ;;  %v696_v9 = vpop.f32.mrb[29].mxu1 }
 0x2b6   :  { %v637_v12 = vpop.f32.mrb[14].mxu0  ;;  %v698_v13 = vpop.f32.mrb[30].mxu1 }
 0x2b7   :  { %v638_v60 = vpop.f32.mrb[15].mxu0  ;;  %v699_v14 = vpop.f32.mrb[31].mxu1 }
 0x2b8   :  { %v6586_v14 = vpop.permute.xlu0 %1681 }
 0x2b9   :  { %8150 = vst [vmem:[#allocation14_spill] sm:$0xff] %v6586_v14 }
 0x2d4   :  { %v915_v15 = vpop.f32.mrb[16].mxu0  ;;  %v976_v16 = vpop.f32.mrb[32].mxu1 }
 0x2d5   :  { %v916_v17 = vadd.f32 %v915_v15, %v633_v53  ;;  %v977_v18 = vadd.f32 %v976_v16, %v694_v8  ;;  %v917_v7 = vpop.f32.mrb[17].mxu0  ;;  %v978_v54 = vpop.f32.mrb[33].mxu1 }
 0x2d6   :  { %v918_v19 = vadd.f32 %v917_v7, %v635_v10  ;;  %v979_v20 = vadd.f32 %v978_v54, %v696_v9  ;;  %v919_v21 = vpop.f32.mrb[18].mxu0  ;;  %v980_v22 = vpop.f32.mrb[34].mxu1 }
 0x2d7   :  { %v920_v23 = vpop.f32.mrb[19].mxu0  ;;  %v981_v24 = vpop.f32.mrb[35].mxu1 }
 0x2d8   :  { %v1677_v10 = vpop.permute.xlu1 %1676 }
 0x2f4   :  { %v1233_v11 = vpop.f32.mrb[20].mxu0  ;;  %v1294_v25 = vpop.f32.mrb[36].mxu1 }
 0x2f5   :  { %v1317_v26 = vadd.f32 %v1233_v11, %v916_v17  ;;  %v1319_v27 = vadd.f32 %v1294_v25, %v977_v18  ;;  %v1235_v28 = vpop.f32.mrb[21].mxu0  ;;  %v1296_v30 = vpop.f32.mrb[37].mxu1 }
 0x2f6   :  { %v1318_v31 = vadd.f32 %v1235_v28, %v918_v19  ;;  %v1320_v32 = vadd.f32 %v1296_v30, %v979_v20  ;;  %v1237_v33 = vpop.f32.mrb[22].mxu0  ;;  %v1298_v34 = vpop.f32.mrb[38].mxu1 }
 0x2f7   :  { %v1238_v35 = vpop.f32.mrb[23].mxu0  ;;  %v1299_v36 = vpop.f32.mrb[39].mxu1  ;;  %v5165_v34 = vld [vmem:[%s8086_s18 + $0x18] sm:$0xf] }
 0x2f8   :  { %v5166_v35 = vld [vmem:[%s8086_s18 + $0x1c] sm:$0xf] }
 0x304   :  { %v6452_v39 = vpop.f32.mrb[4].mxu0  ;;  %v6454_v40 = vpop.f32.mrb[20].mxu1 }
 0x305   :  { %8138 = vst [vmem:[#allocation2_spill] sm:$0xff] %v6452_v39  ;;  %8139 = vst [vmem:[#allocation3_spill] sm:$0xff] %v6454_v40  ;;  %v6456_v41 = vpop.f32.mrb[5].mxu0  ;;  %v6458_v42 = vpop.f32.mrb[21].mxu1 }
 0x306   :  { %8140 = vst [vmem:[#allocation4_spill] sm:$0xff] %v6456_v41  ;;  %8141 = vst [vmem:[#allocation5_spill] sm:$0xff] %v6458_v42  ;;  %v1555_v43 = vpop.f32.mrb[6].mxu0  ;;  %v1616_v29 = vpop.f32.mrb[22].mxu1 }
 0x307   :  { %v6460_v44 = vadd.f32 %v1672_v38, %v1555_v43  ;;  %v1557_v45 = vpop.f32.mrb[7].mxu0  ;;  %v1618_v47 = vpop.f32.mrb[23].mxu1  ;;  %v6466_v48 = vadd.f32 %v1672_v38, %v1616_v29 }
 0x308   :  { %v6516_v53 = vadd.f32 %v1672_v38, %v1557_v45  ;;  %v6522_v8 = vadd.f32 %v1672_v38, %v1618_v47 }
 0x309   :  { %1871 = vrot.lane.b32.xlu1 %v6460_v44, %s5808_s5  ;;  %1709 = vrot.lane.b32.xlu0 %v6460_v44, %s5809_s21 }
 0x30c   :  { %v1561_v49 = vpop.f32.mrb[8].mxu0  ;;  %v6468_v50 = vpop.f32.mrb[24].mxu1 }
 0x30d   :  { %v6470_v51 = vpop.f32.mrb[25].mxu1  ;;  %1875 = vrot.lane.b32.xlu1 %v6466_v48, %s5808_s5  ;;  %1713 = vrot.lane.b32.xlu0 %v6466_v48, %s5809_s21  ;;  %v1563_v46 = vpop.f32.mrb[9].mxu0  ;;  %v6552_v9 = vadd.f32 %v1677_v10, %v1561_v49  ;;  %v6559_v13 = vadd.f32 %v1677_v10, %v6468_v50 }
 0x30e   :  { %v6476_v52 = vpop.f32.mrb[10].mxu0  ;;  %v6478_v55 = vpop.f32.mrb[26].mxu1  ;;  %v6554_v12 = vadd.f32 %v1677_v10, %v1563_v46  ;;  %v6562_v60 = vadd.f32 %v1677_v10, %v6470_v51 }
 0x30f   :  { %8142 = vst [vmem:[#allocation6_spill] sm:$0xff] %v6476_v52  ;;  %8143 = vst [vmem:[#allocation7_spill] sm:$0xff] %v6478_v55  ;;  %v6480_v56 = vpop.f32.mrb[11].mxu0  ;;  %v6482_v57 = vpop.f32.mrb[27].mxu1 }
 0x310   :  { %8144 = vst [vmem:[#allocation8_spill] sm:$0xff] %v6480_v56  ;;  %8145 = vst [vmem:[#allocation9_spill] sm:$0xff] %v6482_v57 }
 0x311   :  { %1911 = vrot.lane.b32.xlu1 %v6460_v44, %s5810_s22  ;;  %1751 = vrot.lane.b32.xlu0 %v6460_v44, %s5811_s1 }
 0x314   :  { %v1571_v58 = vpop.f32.mrb[24].mxu0  ;;  %v1632_v59 = vpop.f32.mrb[40].mxu1 }
 0x315   :  { %v6488_v37 = vadd.f32 %v1571_v58, %v1317_v26  ;;  %v6490_v61 = vadd.f32 %v1632_v59, %v1319_v27  ;;  %v1634_v62 = vpop.f32.mrb[41].mxu1  ;;  %1915 = vrot.lane.b32.xlu1 %v6466_v48, %s5810_s22  ;;  %v1573_v63 = vpop.f32.mrb[25].mxu0  ;;  %1755 = vrot.lane.b32.xlu0 %v6466_v48, %s5811_s1  ;;  %v1717_v26 = vlaneseq }
 0x316   :  { %v1575_v0 = vpop.f32.mrb[26].mxu0  ;;  %v1636_v1 = vpop.f32.mrb[42].mxu1  ;;  %v6496_v2 = vadd.f32 %v1634_v62, %v1320_v32  ;;  %v6498_v3 = vadd.f32 %v1573_v63, %v1318_v31 }
 0x317   :  { %8146 = vst [vmem:[#allocation10_spill] sm:$0xff] %v6488_v37  ;;  %8147 = vst [vmem:[#allocation11_spill] sm:$0xff] %v6490_v61  ;;  %v1576_v4 = vpop.f32.mrb[27].mxu0  ;;  %v1637_v5 = vpop.f32.mrb[43].mxu1  ;;  %v6650_v30 = vshrl.u32 %v1717_v26, 7  ;;  %v6652_v31 = vand.u32 127, %v1717_v26 }
 0x318   :  { %8148 = vst [vmem:[#allocation12_spill] sm:$0xff] %v6496_v2  ;;  %8149 = vst [vmem:[#allocation13_spill] sm:$0xff] %v6498_v3 }
 0x319   :  { %1951 = vrot.lane.b32.xlu1 %v6460_v44, %s5812_s23  ;;  %1791 = vrot.lane.b32.xlu0 %v6460_v44, %s5813_s24  ;;  %8151 = vst [vmem:[#allocation15_spill] sm:$0xff] %v6650_v30  ;;  %v6665_v36 = vsub.s32 1, %v6650_v30  ;;  %vm1719_vm3 = vcmp.lt.s32.totalorder %v6652_v31, 17  ;;  %v6669_v43 = vsub.s32 3, %v6650_v30  ;;  %v6674_v45 = vsub.s32 0, %v6650_v30 }
 0x31a   :  { %vm1759_vm4 = vcmp.lt.s32.totalorder %v6652_v31, 16  ;;  %v6686_v50 = vsub.s32 2, %v6650_v30  ;;  %vm1879_vm5 = vcmp.lt.s32.totalorder %v6652_v31, 127  ;;  %vm1919_vm6 = vcmp.lt.s32.totalorder %v6652_v31, 113 }
 0x31b   :  { %v6677_v47 = vrot.slane %v5165_v34, %v6665_v36  ;;  %v6683_v49 = vrot.slane %v5166_v35, %v6665_v36  ;;  %v6694_v46 = vrot.slane %v5165_v34, %v6674_v45  ;;  %v6697_v59 = vrot.slane %v5165_v34, %v6669_v43 }
 0x31c   :  { %8154 = vst [vmem:[#allocation18_spill] sm:$0xff] %v6686_v50  ;;  %v6702_v63 = vrot.slane %v5166_v35, %v6686_v50  ;;  %v6708_v1 = vrot.slane %v5166_v35, %v6674_v45  ;;  %v6718_v26 = vrot.slane %v5166_v35, %v6669_v43  ;;  %vm1959_vm7 = vcmp.lt.s32.totalorder %v6652_v31, 112 }
 0x31d   :  { %1955 = vrot.lane.b32.xlu1 %v6466_v48, %s5812_s23  ;;  %1795 = vrot.lane.b32.xlu0 %v6466_v48, %s5813_s24  ;;  %8152 = vst [vmem:[#allocation16_spill] sm:$0xff] %v6677_v47  ;;  %8153 = vst [vmem:[#allocation17_spill] sm:$0xff] %v6683_v49  ;;  %vm1799_vm8 = vcmp.lt.s32.totalorder %v6652_v31, 15  ;;  %vm1839_vm9 = vcmp.lt.s32.totalorder %v6652_v31, 1  ;;  %vm1999_vm10 = vcmp.lt.s32.totalorder %v6652_v31, 111  ;;  %vm2165_vm11 = vcmp.lt.s32.totalorder %v6652_v31, 34 }
 0x31e   :  { %8155 = vst [vmem:[#allocation19_spill] sm:$0xff] %v6694_v46  ;;  %8156 = vst [vmem:[#allocation20_spill] sm:$0xff] %v6697_v59  ;;  %vm2204_vm12 = vcmp.lt.s32.totalorder %v6652_v31, 33  ;;  %vm2244_vm15 = vcmp.lt.s32.totalorder %v6652_v31, 32  ;;  %vm2284_vm0 = vcmp.lt.s32.totalorder %v6652_v31, 31  ;;  %vm2324_vm2 = vcmp.lt.s32.totalorder %v6652_v31, 30 }
 0x31f   :  { %8157 = vst [vmem:[#allocation21_spill] sm:$0xff] %v6702_v63  ;;  %8158 = vst [vmem:[#allocation22_spill] sm:$0xff] %v6708_v1 }
 0x320   :  { %8159 = vst [vmem:[#allocation23_spill] sm:$0xff] %v6718_v26 }
 0x321   :  { %1991 = vrot.lane.b32.xlu1 %v6460_v44, %s5814_s25  ;;  %1831 = vrot.lane.b32.xlu0 %v6460_v44, %s5815_s4 }
 0x325   :  { %1995 = vrot.lane.b32.xlu1 %v6466_v48, %s5814_s25  ;;  %1835 = vrot.lane.b32.xlu0 %v6466_v48, %s5815_s4 }
 0x329   :  { %1711 = vrot.lane.b32.xlu1 %v6516_v53, %s5809_s21  ;;  %1873 = vrot.lane.b32.xlu0 %v6516_v53, %s5808_s5 }
 0x32d   :  { %1715 = vrot.lane.b32.xlu1 %v6522_v8, %s5809_s21  ;;  %1877 = vrot.lane.b32.xlu0 %v6522_v8, %s5808_s5 }
 0x331   :  { %1753 = vrot.lane.b32.xlu1 %v6516_v53, %s5811_s1  ;;  %1913 = vrot.lane.b32.xlu0 %v6516_v53, %s5810_s22 }
 0x335   :  { %1757 = vrot.lane.b32.xlu1 %v6522_v8, %s5811_s1  ;;  %1917 = vrot.lane.b32.xlu0 %v6522_v8, %s5810_s22 }
 0x339   :  { %1793 = vrot.lane.b32.xlu1 %v6516_v53, %s5813_s24  ;;  %1953 = vrot.lane.b32.xlu0 %v6516_v53, %s5812_s23 }
 0x33d   :  { %1797 = vrot.lane.b32.xlu1 %v6522_v8, %s5813_s24  ;;  %1957 = vrot.lane.b32.xlu0 %v6522_v8, %s5812_s23 }
 0x341   :  { %1833 = vrot.lane.b32.xlu1 %v6516_v53, %s5815_s4  ;;  %1993 = vrot.lane.b32.xlu0 %v6516_v53, %s5814_s25 }
 0x345   :  { %1837 = vrot.lane.b32.xlu1 %v6522_v8, %s5815_s4  ;;  %1997 = vrot.lane.b32.xlu0 %v6522_v8, %s5814_s25 }
 0x349   :  { %2157 = vrot.lane.b32.xlu1 %v6552_v9, %s5816_s26  ;;  %2159 = vrot.lane.b32.xlu0 %v6554_v12, %s5816_s26 }
 0x34d   :  { %2161 = vrot.lane.b32.xlu1 %v6559_v13, %s5816_s26  ;;  %2163 = vrot.lane.b32.xlu0 %v6562_v60, %s5816_s26  ;;  %s5830_s26 = smov 95  }
 0x351   :  { %2196 = vrot.lane.b32.xlu1 %v6552_v9, %s5817_s27  ;;  %2198 = vrot.lane.b32.xlu0 %v6554_v12, %s5817_s27 }
 0x355   :  { %2200 = vrot.lane.b32.xlu1 %v6559_v13, %s5817_s27  ;;  %2202 = vrot.lane.b32.xlu0 %v6562_v60, %s5817_s27 }
 0x359   :  { %2236 = vrot.lane.b32.xlu1 %v6552_v9, %s5818_s28  ;;  %2238 = vrot.lane.b32.xlu0 %v6554_v12, %s5818_s28 }
 0x35d   :  { %2240 = vrot.lane.b32.xlu1 %v6559_v13, %s5818_s28  ;;  %2242 = vrot.lane.b32.xlu0 %v6562_v60, %s5818_s28 }
 0x361   :  { %2276 = vrot.lane.b32.xlu1 %v6552_v9, %s5819_s29  ;;  %2278 = vrot.lane.b32.xlu0 %v6554_v12, %s5819_s29 }
 0x365   :  { %2280 = vrot.lane.b32.xlu1 %v6559_v13, %s5819_s29  ;;  %2282 = vrot.lane.b32.xlu0 %v6562_v60, %s5819_s29 }
 0x369   :  { %2316 = vrot.lane.b32.xlu1 %v6552_v9, %s5820_s0  ;;  %2318 = vrot.lane.b32.xlu0 %v6554_v12, %s5820_s0 }
 0x36d   :  { %2320 = vrot.lane.b32.xlu1 %v6559_v13, %s5820_s0  ;;  %2322 = vrot.lane.b32.xlu0 %v6562_v60, %s5820_s0  ;;  %s5826_s0 = smov 110  }
 0x371   :  { %2356 = vrot.lane.b32.xlu1 %v6552_v9, %s5821_s30  ;;  %2358 = vrot.lane.b32.xlu0 %v6554_v12, %s5821_s30 }
 0x375   :  { %2360 = vrot.lane.b32.xlu1 %v6559_v13, %s5821_s30  ;;  %2362 = vrot.lane.b32.xlu0 %v6562_v60, %s5821_s30 }
 0x379   :  { %2396 = vrot.lane.b32.xlu1 %v6552_v9, %s5809_s21  ;;  %2398 = vrot.lane.b32.xlu0 %v6554_v12, %s5809_s21 }
 0x37b   :  { %v6592_v15 = vpop.permute.xlu1 %1871  ;;  %v6594_v16 = vpop.permute.xlu0 %1709 }
 0x37d   :  { %2400 = vrot.lane.b32.xlu1 %v6559_v13, %s5809_s21  ;;  %2402 = vrot.lane.b32.xlu0 %v6562_v60, %s5809_s21  ;;  %s5827_s21 = smov 98  }
 0x37f   :  { %v6600_v17 = vpop.permute.xlu1 %1875  ;;  %v6602_v18 = vpop.permute.xlu0 %1713 }
 0x381   :  { %2412 = vrot.lane.b32.xlu1 %v6552_v9, %s5811_s1  ;;  %2414 = vrot.lane.b32.xlu0 %v6554_v12, %s5811_s1 }
 0x383   :  { %v6608_v7 = vpop.permute.xlu1 %1911  ;;  %v6610_v54 = vpop.permute.xlu0 %1751 }
 0x385   :  { %2416 = vrot.lane.b32.xlu1 %v6559_v13, %s5811_s1  ;;  %2418 = vrot.lane.b32.xlu0 %v6562_v60, %s5811_s1 }
 0x387   :  { %v6616_v19 = vpop.permute.xlu1 %1915  ;;  %v6618_v20 = vpop.permute.xlu0 %1755 }
 0x389   :  { %2428 = vrot.lane.b32.xlu1 %v6552_v9, %s5813_s24  ;;  %2430 = vrot.lane.b32.xlu0 %v6554_v12, %s5813_s24 }
 0x38b   :  { %v6624_v21 = vpop.permute.xlu1 %1951  ;;  %v6626_v22 = vpop.permute.xlu0 %1791 }
 0x38d   :  { %2432 = vrot.lane.b32.xlu1 %v6559_v13, %s5813_s24  ;;  %2434 = vrot.lane.b32.xlu0 %v6562_v60, %s5813_s24  ;;  %s5828_s24 = smov 97  }
 0x38f   :  { %v6632_v23 = vpop.permute.xlu1 %1955  ;;  %v6634_v24 = vpop.permute.xlu0 %1795 }
 0x391   :  { %2444 = vrot.lane.b32.xlu1 %v6552_v9, %s5822_s3  ;;  %2446 = vrot.lane.b32.xlu0 %v6554_v12, %s5822_s3 }
 0x393   :  { %v6638_v11 = vpop.permute.xlu1 %1991  ;;  %v6640_v25 = vpop.permute.xlu0 %1831 }
 0x395   :  { %2448 = vrot.lane.b32.xlu1 %v6559_v13, %s5822_s3  ;;  %2450 = vrot.lane.b32.xlu0 %v6562_v60, %s5822_s3  ;;  %s5824_s3 = smov 126  }
 0x397   :  { %v6644_v27 = vpop.permute.xlu1 %1995  ;;  %v6646_v28 = vpop.permute.xlu0 %1835 }
 0x399   :  { %2484 = vrot.lane.b32.xlu1 %v6552_v9, %s5823_s20  ;;  %2486 = vrot.lane.b32.xlu0 %v6554_v12, %s5823_s20 }
 0x39b   :  { %v1712_v32 = vpop.permute.xlu1 %1711  ;;  %v6654_v33 = vpop.permute.xlu0 %1873 }
 0x39c   :  { %v1722_v51 = vsel %vm1719_vm3, %v6594_v16, %v1712_v32 }
 0x39d   :  { %2488 = vrot.lane.b32.xlu1 %v6559_v13, %s5823_s20  ;;  %2490 = vrot.lane.b32.xlu0 %v6562_v60, %s5823_s20  ;;  %v1748_v4 = vmul.f32 %v6677_v47, %v1722_v51  ;;  %s5825_s20 = smov 114  }
 0x39f   :  { %v1716_v38 = vpop.permute.xlu1 %1715  ;;  %v6671_v29 = vpop.permute.xlu0 %1877 }
 0x3a0   :  { %v1723_v5 = vsel %vm1719_vm3, %v1716_v38, %v6594_v16  ;;  %v1720_v6 = vsel %vm1719_vm3, %v6602_v18, %v1716_v38  ;;  %v5169_v16 = vld [vmem:[%s8086_s18 + $0x34] sm:$0xf]  ;;  %v1721_v38 = vsel %vm1719_vm3, %v1712_v32, %v6602_v18 }
 0x3a1   :  { %2524 = vrot.lane.b32.xlu1 %v6552_v9, %s5815_s4  ;;  %2526 = vrot.lane.b32.xlu0 %v6554_v12, %s5815_s4  ;;  %v1747_v40 = vmul.f32 %v6694_v46, %v1723_v5  ;;  %v6777_v2 = vrot.slane %v5169_v16, %v6669_v43 }
 0x3a3   :  { %v1754_v58 = vpop.permute.xlu1 %1753  ;;  %v6699_v62 = vpop.permute.xlu0 %1913 }
 0x3a4   :  { %v1762_v0 = vsel %vm1759_vm4, %v6610_v54, %v1754_v58  ;;  %v1761_v51 = vsel %vm1759_vm4, %v1754_v58, %v6618_v20 }
 0x3a5   :  { %v1788_v10 = vmul.f32 %v6683_v49, %v1762_v0  ;;  %2528 = vrot.lane.b32.xlu1 %v6559_v13, %s5815_s4  ;;  %2530 = vrot.lane.b32.xlu0 %v6562_v60, %s5815_s4  ;;  %v6732_v0 = vrot.slane %v5165_v34, %v6686_v50  ;;  %v1750_v34 = vmul.f32 %v6697_v59, %v1720_v6  ;;  %v5171_v6 = vld [vmem:[%s8086_s18 + $0x44] sm:$0xf] }
 0x3a6   :  { %v1789_v18 = vmul.f32 %v6702_v63, %v1761_v51  ;;  %v5167_v51 = vld [vmem:[%s8086_s18 + $0x20] sm:$0xf]  ;;  %v6830_v55 = vrot.slane %v5171_v6, %v6669_v43 }
 0x3a7   :  { %8160 = vst [vmem:[#allocation24_spill] sm:$0xff] %v6732_v0  ;;  %v1758_v35 = vpop.permute.xlu1 %1757  ;;  %v2033_v42 = vpack.c.bf16 %v1788_v10, %v1748_v4  ;;  %v6738_v41 = vpop.permute.xlu0 %1917  ;;  %v5170_v4 = vld [vmem:[%s8086_s18 + $0x40] sm:$0xf]  ;;  %v6822_v30 = vrot.slane %v5167_v51, %v6686_v50  ;;  %v6838_v14 = vrot.slane %v5167_v51, %v6669_v43 }
 0x3a8   :  { %v1760_v58 = vsel %vm1759_vm4, %v6618_v20, %v1758_v35  ;;  %v1763_v39 = vsel %vm1759_vm4, %v1758_v35, %v6610_v54  ;;  %v6755_v20 = vrot.slane %v5169_v16, %v6674_v45  ;;  %v6758_v54 = vrot.slane %v5169_v16, %v6665_v36 }
 0x3a9   :  { %v1787_v32 = vmul.f32 %v6708_v1, %v1763_v39  ;;  %v1790_v5 = vmul.f32 %v6718_v26, %v1760_v58  ;;  %2075 = vmatprep.subr.bf16.mxu0 %v2033_v42  ;;  %2540 = vrot.lane.b32.xlu1 %v6552_v9, %s5808_s5  ;;  %v1749_v39 = vmul.f32 %v6732_v0, %v1721_v38  ;;  %v6856_v1 = vld [vmem:[%s8086_s18] sm:$0xf] }
 0x3aa   :  { %8161 = vst [vmem:[#allocation25_spill] sm:$0xff] %v6755_v20  ;;  %8162 = vst [vmem:[#allocation26_spill] sm:$0xff] %v6758_v54  ;;  %2542 = vrot.lane.b32.xlu0 %v6554_v12, %s5808_s5  ;;  %v6769_v42 = vrot.slane %v5169_v16, %v6686_v50  ;;  %v6781_v61 = vrot.slane %v5170_v4, %v6674_v45  ;;  %v6784_v38 = vrot.slane %v5170_v4, %v6665_v36 }
 0x3ab   :  { %v2032_v10 = vpack.c.bf16 %v1787_v32, %v1747_v40  ;;  %v6774_v35 = vpop.permute.xlu1 %1793  ;;  %v2035_v58 = vpack.c.bf16 %v1790_v5, %v1750_v34  ;;  %v6786_v3 = vpop.permute.xlu0 %1953  ;;  %v2034_v40 = vpack.c.bf16 %v1789_v18, %v1749_v39  ;;  %v6789_v32 = vrot.slane %v5170_v4, %v6686_v50  ;;  %v5172_v34 = vld [vmem:[%s8086_s18 + $0x48] sm:$0xf]  ;;  %v5168_v39 = vld [vmem:[%s8086_s18 + $0x2c] sm:$0xf] }
 0x3ac   :  { %v6792_v37 = vrot.slane %v5170_v4, %v6669_v43  ;;  %v6795_v16 = vrot.slane %v5171_v6, %v6674_v45  ;;  %v1882_v5 = vsel %vm1879_vm5, %v6592_v15, %v6654_v33  ;;  %v6806_v18 = vrot.slane %v5171_v6, %v6665_v36 }
 0x3ad   :  { %8163 = vst [vmem:[#allocation27_spill] sm:$0xff] %v6789_v32  ;;  %2076 = vmatpush1.bf16.msra.mxu0 %v2032_v10  ;;  %v6809_v4 = vrot.slane %v5167_v51, %v6665_v36  ;;  %2116 = vmatprep.subr.bf16.mxu1 %v2035_v58  ;;  %v1881_v10 = vsel %vm1879_vm5, %v6654_v33, %v6600_v17 }
 0x3ae   :  { %2544 = vrot.lane.b32.xlu1 %v6559_v13, %s5808_s5  ;;  %2546 = vrot.lane.b32.xlu0 %v6562_v60, %s5808_s5  ;;  %v6827_v58 = vrot.slane %v5171_v6, %v6686_v50  ;;  %v6835_v33 = vrot.slane %v5167_v51, %v6674_v45  ;;  %v6841_v52 = vrot.slane %v5172_v34, %v6674_v45 }
 0x3af   :  { %2117 = vmatpush1.bf16.msra.mxu1 %v2034_v40  ;;  %v1798_v57 = vpop.permute.xlu1 %1797  ;;  %v6832_v56 = vpop.permute.xlu0 %1957  ;;  %v6844_v40 = vmul.f32 %v6755_v20, %v1882_v5  ;;  %v6847_v26 = vrot.slane %v5172_v34, %v6665_v36  ;;  %v6851_v6 = vrot.slane %v5168_v39, %v6665_v36  ;;  %v6859_v51 = vmul.f32 %v6758_v54, %v1881_v10 }
 0x3b0   :  { %8164 = vst [vmem:[#allocation28_spill] sm:$0xff] %v6827_v58  ;;  %v1802_v5 = vsel %vm1799_vm8, %v6626_v22, %v6774_v35  ;;  %v6868_v20 = vrot.slane %v5168_v39, %v6686_v50  ;;  %v6871_v59 = vrot.slane %v5172_v34, %v6686_v50  ;;  %v1883_v10 = vsel %vm1879_vm5, %v6671_v29, %v6592_v15 }
 0x3b1   :  { %v6879_v63 = vrot.slane %v5172_v34, %v6669_v43  ;;  %v6882_v46 = vrot.slane %v5168_v39, %v6674_v45  ;;  %v6885_v0 = vrot.slane %v5168_v39, %v6669_v43  ;;  %v1828_v39 = vmul.f32 %v6809_v4, %v1802_v5 }
 0x3b2   :  { %2556 = vrot.lane.b32.xlu1 %v6552_v9, %s5824_s3  ;;  %8165 = vst [vmem:[#allocation29_spill] sm:$0xff] %v6871_v59  ;;  %2558 = vrot.lane.b32.xlu0 %v6554_v12, %s5824_s3  ;;  %v1910_v58 = vmul.f32 %v6777_v2, %v1883_v10  ;;  %v1800_v32 = vsel %vm1799_vm8, %v6634_v24, %v1798_v57 }
 0x3b3   :  { %v1834_v54 = vpop.permute.xlu1 %1833  ;;  %8166 = vst [vmem:[#allocation30_spill] sm:$0xff] %v6879_v63  ;;  %v1994_v49 = vpop.permute.xlu0 %1993  ;;  %v1803_v63 = vsel %vm1799_vm8, %v1798_v57, %v6626_v22  ;;  %v2041_v5 = vpack.c.bf16 %v6859_v51, %v6516_v53  ;;  %v1880_v22 = vsel %vm1879_vm5, %v6600_v17, %v6671_v29  ;;  %v1801_v57 = vsel %vm1799_vm8, %v6774_v35, %v6634_v24 }
 0x3b4   :  { %v1842_v47 = vsel %vm1839_vm9, %v6640_v25, %v1834_v54  ;;  %v1841_v34 = vsel %vm1839_vm9, %v1834_v54, %v6646_v28  ;;  %v1961_v53 = vsel %vm1959_vm7, %v6786_v3, %v6632_v23  ;;  %v1827_v17 = vmul.f32 %v6835_v33, %v1803_v63 }
 0x3b5   :  { %v1868_v59 = vmul.f32 %v6851_v6, %v1842_v47  ;;  %v1921_v47 = vsel %vm1919_vm6, %v6699_v62, %v6616_v19  ;;  %v1830_v35 = vmul.f32 %v6838_v14, %v1800_v32  ;;  %v1909_v63 = vmul.f32 %v6769_v42, %v1880_v22 }
 0x3b6   :  { %2560 = vrot.lane.b32.xlu1 %v6559_v13, %s5824_s3  ;;  %2562 = vrot.lane.b32.xlu0 %v6562_v60, %s5824_s3  ;;  %v1948_v50 = vmul.f32 %v6784_v38, %v1921_v47  ;;  %v1829_v32 = vmul.f32 %v6822_v30, %v1801_v57  ;;  %v1960_v47 = vsel %vm1959_vm7, %v6632_v23, %v6832_v56 }
 0x3b7   :  { %v1838_v54 = vpop.permute.xlu1 %1837  ;;  %v2037_v10 = vpack.c.bf16 %v1868_v59, %v1828_v39  ;;  %v1998_v29 = vpop.permute.xlu0 %1997  ;;  %v1869_v59 = vmul.f32 %v6868_v20, %v1841_v34  ;;  %v1963_v34 = vsel %vm1959_vm7, %v6832_v56, %v6624_v21  ;;  %v2042_v23 = vpack.c.bf16 %v1909_v63, %v6466_v48 }
 0x3b8   :  { %v1840_v51 = vsel %vm1839_vm9, %v6646_v28, %v1838_v54  ;;  %v1843_v24 = vsel %vm1839_vm9, %v1838_v54, %v6640_v25  ;;  %v1922_v28 = vsel %vm1919_vm6, %v6608_v7, %v6699_v62  ;;  %v2043_v25 = vpack.c.bf16 %v1910_v58, %v6522_v8 }
 0x3b9   :  { %v1867_v39 = vmul.f32 %v6882_v46, %v1843_v24  ;;  %v1870_v15 = vmul.f32 %v6885_v0, %v1840_v51  ;;  %2077 = vmatprep.subr.bf16.mxu0 %v2037_v10  ;;  %v1923_v62 = vsel %vm1919_vm6, %v6738_v41, %v6608_v7  ;;  %v1962_v8 = vsel %vm1959_vm7, %v6624_v21, %v6786_v3  ;;  %v8167_v24 = vld [vmem:[#allocation28_spill] sm:$0xff] }
 0x3ba   :  { %2596 = vrot.lane.b32.xlu1 %v6552_v9, %s5825_s20  ;;  %2598 = vrot.lane.b32.xlu0 %v6554_v12, %s5825_s20  ;;  %v1988_v58 = vmul.f32 %v6806_v18, %v1961_v53  ;;  %v2002_v7 = vsel %vm1999_vm10, %v6638_v11, %v1994_v49  ;;  %v1990_v3 = vmul.f32 %v6830_v55, %v1963_v34  ;;  %v8169_v63 = vld [vmem:[#allocation30_spill] sm:$0xff] }
 0x3bb   :  { %v2036_v22 = vpack.c.bf16 %v1867_v39, %v1827_v17  ;;  %v2158_v54 = vpop.permute.xlu1 %2157  ;;  %v2039_v10 = vpack.c.bf16 %v1870_v15, %v1830_v35  ;;  %v6968_v57 = vpop.permute.xlu0 %2159  ;;  %v2001_v15 = vsel %vm1999_vm10, %v1994_v49, %v6644_v27  ;;  %v2038_v17 = vpack.c.bf16 %v1869_v59, %v1829_v32  ;;  %v8168_v59 = vld [vmem:[#allocation29_spill] sm:$0xff] }
 0x3bc   :  { %v2000_v21 = vsel %vm1999_vm10, %v6644_v27, %v1998_v29  ;;  %v2003_v56 = vsel %vm1999_vm10, %v1998_v29, %v6638_v11  ;;  %v1920_v49 = vsel %vm1919_vm6, %v6616_v19, %v6738_v41  ;;  %v1987_v53 = vmul.f32 %v6795_v16, %v1962_v8  ;;  %v6995_v11 = vld [vmem:[%s8086_s18 + $0x4] sm:$0xf] }
 0x3bd   :  { %2078 = vmatpush1.bf16.msra.mxu0 %v2036_v22  ;;  %2118 = vmatprep.subr.bf16.mxu1 %v2039_v10  ;;  %v1950_v48 = vmul.f32 %v6792_v37, %v1923_v62  ;;  %v2028_v29 = vmul.f32 %v6847_v26, %v2001_v15  ;;  %v2045_v19 = vpack.c.bf16 %v1988_v58, %v1948_v50  ;;  %v8172_v10 = vld [vmem:[#allocation27_spill] sm:$0xff] }
 0x3be   :  { %2600 = vrot.lane.b32.xlu1 %v6559_v13, %s5825_s20  ;;  %2079 = vmatprep.subr.bf16.mxu0 %v2041_v5  ;;  %v2027_v5 = vmul.f32 %v6841_v52, %v2002_v7  ;;  %v1947_v51 = vmul.f32 %v6781_v61, %v1922_v28  ;;  %v1989_v35 = vmul.f32 %v8167_v24, %v1960_v47  ;;  %v8171_v28 = vld [vmem:[#allocation18_spill] sm:$0xff] }
 0x3bf   :  { %2602 = vrot.lane.b32.xlu0 %v6562_v60, %s5825_s20  ;;  %2119 = vmatpush1.bf16.msra.mxu1 %v2038_v17  ;;  %v2162_v27 = vpop.permute.xlu1 %2161  ;;  %v2164_v41 = vpop.permute.xlu0 %2163  ;;  %v2029_v39 = vmul.f32 %v8168_v59, %v2000_v21  ;;  %v2030_v32 = vmul.f32 %v8169_v63, %v2003_v56  ;;  %v8170_v34 = vpack.c.bf16 %v6844_v40, %v6460_v44 }
 0x3c0   :  { %2120 = vmatprep.subr.bf16.mxu1 %v2043_v25  ;;  %v2047_v22 = vpack.c.bf16 %v1990_v3, %v1950_v48  ;;  %v2219_v50 = vrot.slane %v6995_v11, %v6665_v36  ;;  %v2223_v25 = vrot.slane %v6995_v11, %v8171_v28  ;;  %v1949_v62 = vmul.f32 %v8172_v10, %v1920_v49 }
 0x3c1   :  { %2080 = vmatpush1.bf16.msra.mxu0 %v8170_v34  ;;  %v2044_v8 = vpack.c.bf16 %v1987_v53, %v1947_v51  ;;  %v2168_v44 = vsel %vm2165_vm11, %v2158_v54, %v6968_v57  ;;  %v2048_v58 = vpack.c.bf16 %v2027_v5, %v2027_v5  ;;  %v2049_v47 = vpack.c.bf16 %v2028_v29, %v2028_v29 }
 0x3c2   :  { %2636 = vrot.lane.b32.xlu1 %v6552_v9, %s5810_s22  ;;  %2081 = vmatprep.subr.bf16.mxu0 %v2045_v19  ;;  %v2215_v7 = vrot.slane %v6995_v11, %v6674_v45  ;;  %v2227_v17 = vrot.slane %v6995_v11, %v6669_v43  ;;  %v2046_v3 = vpack.c.bf16 %v1989_v35, %v1949_v62 }
 0x3c3   :  { %2638 = vrot.lane.b32.xlu0 %v6554_v12, %s5810_s22  ;;  %2121 = vmatpush1.bf16.msra.mxu1 %v2042_v23  ;;  %v2197_v40 = vpop.permute.xlu1 %2196  ;;  %v2199_v15 = vpop.permute.xlu0 %2198  ;;  %v2050_v21 = vpack.c.bf16 %v2029_v39, %v2029_v39  ;;  %v2051_v56 = vpack.c.bf16 %v2030_v32, %v2030_v32  ;;  %v8173_v23 = vrot.slane %v6856_v1, %v6665_v36  ;;  %v2064_v39 = vsel %vm2062_vm13, %v2048_v58, 0 }
 0x3c4   :  { %2122 = vmatprep.subr.bf16.mxu1 %v2047_v22  ;;  %v2207_v49 = vsel %vm2204_vm12, %v2197_v40, %v2199_v15  ;;  %v2169_v48 = vsel %vm2165_vm11, %v2164_v41, %v2158_v54  ;;  %v2183_v11 = vrot.slane %v6856_v1, %v8171_v28  ;;  %v2166_v29 = vsel %vm2165_vm11, %v2162_v27, %v2164_v41 }
 0x3c5   :  { %2082 = vmatpush1.bf16.msra.mxu0 %v2044_v8  ;;  %v2193_v53 = vmul.f32 %v8173_v23, %v2168_v44  ;;  %v2233_v5 = vmul.f32 %v2219_v50, %v2207_v49  ;;  %v2167_v54 = vsel %vm2165_vm11, %v6968_v57, %v2162_v27  ;;  %v8174_v41 = vrot.slane %v6856_v1, %v6674_v45  ;;  %v2031_v27 = vld [vmem:[%s8087_s6] sm:$0xf] }
 0x3c6   :  { %2640 = vrot.lane.b32.xlu1 %v6559_v13, %s5810_s22  ;;  %5173 = vmatprep.subr.msk.bf16.mxu0 %vm2062_vm13, %v2049_v47  ;;  %v8175_v62 = vrot.slane %v6856_v1, %v6669_v43  ;;  %v2194_v47 = vmul.f32 %v2183_v11, %v2167_v54  ;;  %vm2364_vm11 = vcmp.lt.s32.totalorder %v6652_v31, 18 }
 0x3c7   :  { %2642 = vrot.lane.b32.xlu0 %v6562_v60, %s5810_s22  ;;  %2123 = vmatpush1.bf16.msra.mxu1 %v2046_v3  ;;  %v2201_v19 = vpop.permute.xlu1 %2200  ;;  %v2203_v35 = vpop.permute.xlu0 %2202  ;;  %v2926_v32 = vpack.c.bf16 %v2233_v5, %v2193_v53  ;;  %v2192_v34 = vmul.f32 %v8174_v41, %v2169_v48  ;;  %s5829_s22 = smov 96  }
 0x3c8   :  { %5175 = vmatprep.subr.msk.bf16.mxu1 %vm2062_vm13, %v2051_v56  ;;  %v2206_v51 = vsel %vm2204_vm12, %v2199_v15, %v2201_v19  ;;  %v2205_v50 = vsel %vm2204_vm12, %v2201_v19, %v2203_v35  ;;  %v2208_v57 = vsel %vm2204_vm12, %v2203_v35, %v2197_v40  ;;  %v2195_v8 = vmul.f32 %v8175_v62, %v2166_v29 }
 0x3c9   :  { %v2234_v22 = vmul.f32 %v2223_v25, %v2206_v51  ;;  %2084 = vmatpush1.bf16.msra.mxu0 %v2064_v39  ;;  %v2232_v44 = vmul.f32 %v2215_v7, %v2208_v57  ;;  %v2235_v58 = vmul.f32 %v2227_v17, %v2205_v50  ;;  %v2070_v25 = vsel %vm2062_vm13, %v2050_v21, 0  ;;  %v5178_v7 = vld [vmem:[%s8086_s18 + $0x8] sm:$0xf]  ;;  %v5179_v21 = vld [vmem:[%s8086_s18 + $0xc] sm:$0xf] }
 0x3ca   :  { %2652 = vrot.lane.b32.xlu1 %v6552_v9, %s5812_s23  ;;  %3004 = vmatprep.subr.bf16.mxu0 %v2926_v32  ;;  %v2259_v23 = vrot.slane %v5178_v7, %v6665_v36  ;;  %v2299_v53 = vrot.slane %v5179_v21, %v6665_v36  ;;  %v2263_v11 = vrot.slane %v5178_v7, %v8171_v28  ;;  %vm2564_vm12 = vcmp.lt.s32.totalorder %v6652_v31, 126 }
 0x3cb   :  { %2654 = vrot.lane.b32.xlu0 %v6554_v12, %s5812_s23  ;;  %2125 = vmatpush1.bf16.msra.mxu1 %v2070_v25  ;;  %v2237_v40 = vpop.permute.xlu1 %2236  ;;  %v2925_v15 = vpack.c.bf16 %v2232_v44, %v2192_v34  ;;  %v2239_v3 = vpop.permute.xlu0 %2238  ;;  %v2928_v1 = vpack.c.bf16 %v2235_v58, %v2195_v8  ;;  %v2927_v56 = vpack.c.bf16 %v2234_v22, %v2194_v47 }
 0x3cc   :  { %5174 = vmatmul.mubr.msk.bf16.vlgmr.msra.gmra.mrb[28].mxu0 %vm2058_vm14, %v2031_v27  ;;  %v2247_v48 = vsel %vm2244_vm15, %v2237_v40, %v2239_v3  ;;  %v2255_v29 = vrot.slane %v5178_v7, %v6674_v45  ;;  %v2267_v19 = vrot.slane %v5178_v7, %v6669_v43  ;;  %v2303_v39 = vrot.slane %v5179_v21, %v8171_v28 }
 0x3cd   :  { %3005 = vmatpush1.bf16.msra.mxu0 %v2925_v15  ;;  %3045 = vmatprep.subr.bf16.mxu1 %v2928_v1  ;;  %v2295_v32 = vrot.slane %v5179_v21, %v6674_v45  ;;  %v2273_v41 = vmul.f32 %v2259_v23, %v2247_v48  ;;  %v2307_v50 = vrot.slane %v5179_v21, %v6669_v43 }
 0x3ce   :  { %2656 = vrot.lane.b32.xlu1 %v6559_v13, %s5812_s23  ;;  %5176 = vmatmul.mubr.msk.bf16.vlgmr.msra.gmra.mrb[44].mxu1 %vm2058_vm14, %v2031_v27 }
 0x3cf   :  { %2658 = vrot.lane.b32.xlu0 %v6562_v60, %s5812_s23  ;;  %v2241_v17 = vpop.permute.xlu1 %2240  ;;  %v2243_v49 = vpop.permute.xlu0 %2242  ;;  %3046 = vmatpush1.bf16.msra.mxu1 %v2927_v56 }
 0x3d0   :  { %v2246_v51 = vsel %vm2244_vm15, %v2239_v3, %v2241_v17  ;;  %v2248_v34 = vsel %vm2244_vm15, %v2243_v49, %v2237_v40  ;;  %v2245_v57 = vsel %vm2244_vm15, %v2241_v17, %v2243_v49  ;;  %vm2772_vm15 = vcmp.lt.s32.totalorder %v6652_v31, 97 }
 0x3d1   :  { %v2274_v62 = vmul.f32 %v2263_v11, %v2246_v51  ;;  %v2272_v25 = vmul.f32 %v2255_v29, %v2248_v34  ;;  %v2275_v3 = vmul.f32 %v2267_v19, %v2245_v57 }
 0x3d2   :  { %2668 = vrot.lane.b32.xlu1 %v6552_v9, %s5814_s25 }
 0x3d3   :  { %2670 = vrot.lane.b32.xlu0 %v6554_v12, %s5814_s25  ;;  %v2277_v5 = vpop.permute.xlu1 %2276  ;;  %v2279_v54 = vpop.permute.xlu0 %2278 }
 0x3d4   :  { %v2287_v35 = vsel %vm2284_vm0, %v2277_v5, %v2279_v54 }
 0x3d5   :  { %v2313_v22 = vmul.f32 %v2299_v53, %v2287_v35  ;;  %v5180_v53 = vld [vmem:[%s8086_s18 + $0x10] sm:$0xf] }
 0x3d6   :  { %2672 = vrot.lane.b32.xlu1 %v6559_v13, %s5814_s25  ;;  %v2339_v29 = vrot.slane %v5180_v53, %v6665_v36  ;;  %v2343_v35 = vrot.slane %v5180_v53, %v8171_v28 }
 0x3d7   :  { %2674 = vrot.lane.b32.xlu0 %v6562_v60, %s5814_s25  ;;  %v2281_v27 = vpop.permute.xlu1 %2280  ;;  %v2283_v44 = vpop.permute.xlu0 %2282  ;;  %v2930_v58 = vpack.c.bf16 %v2313_v22, %v2273_v41 }
 0x3d8   :  { %v2286_v8 = vsel %vm2284_vm0, %v2279_v54, %v2281_v27  ;;  %v2285_v40 = vsel %vm2284_vm0, %v2281_v27, %v2283_v44  ;;  %v2288_v15 = vsel %vm2284_vm0, %v2283_v44, %v2277_v5  ;;  %v5181_v5 = vld [vmem:[%s8086_s18 + $0x14] sm:$0xf]  ;;  %vm2812_vm0 = vcmp.lt.s32.totalorder %v6652_v31, 96 }
 0x3d9   :  { %v2314_v47 = vmul.f32 %v2303_v39, %v2286_v8  ;;  %v2312_v1 = vmul.f32 %v2295_v32, %v2288_v15  ;;  %v2315_v56 = vmul.f32 %v2307_v50, %v2285_v40  ;;  %3006 = vmatprep.subr.bf16.mxu0 %v2930_v58  ;;  %v2379_v19 = vrot.slane %v5181_v5, %v6665_v36 }
 0x3da   :  { %2684 = vrot.lane.b32.xlu1 %v6552_v9, %s5826_s0  ;;  %v2335_v39 = vrot.slane %v5180_v53, %v6674_v45  ;;  %v2347_v32 = vrot.slane %v5180_v53, %v6669_v43  ;;  %v2383_v50 = vrot.slane %v5181_v5, %v8171_v28  ;;  %v2375_v57 = vrot.slane %v5181_v5, %v6674_v45 }
 0x3db   :  { %2686 = vrot.lane.b32.xlu0 %v6554_v12, %s5826_s0  ;;  %v2317_v7 = vpop.permute.xlu1 %2316  ;;  %v2931_v17 = vpack.c.bf16 %v2314_v47, %v2274_v62  ;;  %v2929_v21 = vpack.c.bf16 %v2312_v1, %v2272_v25  ;;  %v2319_v49 = vpop.permute.xlu0 %2318  ;;  %v2932_v23 = vpack.c.bf16 %v2315_v56, %v2275_v3  ;;  %v2387_v44 = vrot.slane %v5181_v5, %v6669_v43 }
 0x3dc   :  { %v2327_v54 = vsel %vm2324_vm2, %v2317_v7, %v2319_v49 }
 0x3dd   :  { %3007 = vmatpush1.bf16.msra.mxu0 %v2929_v21  ;;  %3047 = vmatprep.subr.bf16.mxu1 %v2932_v23  ;;  %v2353_v27 = vmul.f32 %v2339_v29, %v2327_v54 }
 0x3de   :  { %2688 = vrot.lane.b32.xlu1 %v6559_v13, %s5826_s0  ;;  %3048 = vmatpush1.bf16.msra.mxu1 %v2931_v17 }
 0x3df   :  { %2690 = vrot.lane.b32.xlu0 %v6562_v60, %s5826_s0  ;;  %v2321_v48 = vpop.permute.xlu1 %2320  ;;  %v2323_v11 = vpop.permute.xlu0 %2322  ;;  %s5831_s0 = smov 94  }
 0x3e0   :  { %v2326_v34 = vsel %vm2324_vm2, %v2319_v49, %v2321_v48  ;;  %v2328_v62 = vsel %vm2324_vm2, %v2323_v11, %v2317_v7  ;;  %v2325_v58 = vsel %vm2324_vm2, %v2321_v48, %v2323_v11  ;;  %vm2852_vm2 = vcmp.lt.s32.totalorder %v6652_v31, 95 }
 0x3e1   :  { %v2354_v47 = vmul.f32 %v2343_v35, %v2326_v34  ;;  %v2352_v1 = vmul.f32 %v2335_v39, %v2328_v62  ;;  %v2355_v21 = vmul.f32 %v2347_v32, %v2325_v58  ;;  %v8176_v34 = vld [vmem:[#allocation16_spill] sm:$0xff] }
 0x3e2   :  { %2724 = vrot.lane.b32.xlu1 %v6552_v9, %s5827_s21 }
 0x3e3   :  { %2726 = vrot.lane.b32.xlu0 %v6554_v12, %s5827_s21  ;;  %v2357_v51 = vpop.permute.xlu1 %2356  ;;  %v2359_v41 = vpop.permute.xlu0 %2358 }
 0x3e4   :  { %v2367_v22 = vsel %vm2364_vm11, %v2357_v51, %v2359_v41 }
 0x3e5   :  { %v2393_v8 = vmul.f32 %v2379_v19, %v2367_v22 }
 0x3e6   :  { %2728 = vrot.lane.b32.xlu1 %v6559_v13, %s5827_s21 }
 0x3e7   :  { %2730 = vrot.lane.b32.xlu0 %v6562_v60, %s5827_s21  ;;  %v2361_v25 = vpop.permute.xlu1 %2360  ;;  %v2363_v15 = vpop.permute.xlu0 %2362  ;;  %v2934_v3 = vpack.c.bf16 %v2393_v8, %v2353_v27 }
 0x3e8   :  { %v2366_v40 = vsel %vm2364_vm11, %v2359_v41, %v2361_v25  ;;  %v2365_v7 = vsel %vm2364_vm11, %v2361_v25, %v2363_v15  ;;  %v2368_v17 = vsel %vm2364_vm11, %v2363_v15, %v2357_v51  ;;  %v8179_v15 = vld [vmem:[#allocation19_spill] sm:$0xff]  ;;  %vm2892_vm11 = vcmp.lt.s32.totalorder %v6652_v31, 94 }
 0x3e9   :  { %v2394_v56 = vmul.f32 %v2383_v50, %v2366_v40  ;;  %v2392_v49 = vmul.f32 %v2375_v57, %v2368_v17  ;;  %v2395_v23 = vmul.f32 %v2387_v44, %v2365_v7  ;;  %3008 = vmatprep.subr.bf16.mxu0 %v2934_v3  ;;  %v8177_v57 = vld [vmem:[#allocation17_spill] sm:$0xff]  ;;  %v8178_v44 = vld [vmem:[#allocation24_spill] sm:$0xff] }
 0x3ea   :  { %2764 = vrot.lane.b32.xlu1 %v6552_v9, %s5828_s24 }
 0x3eb   :  { %2766 = vrot.lane.b32.xlu0 %v6554_v12, %s5828_s24  ;;  %v2397_v53 = vpop.permute.xlu1 %2396  ;;  %v2935_v48 = vpack.c.bf16 %v2394_v56, %v2354_v47  ;;  %v2933_v5 = vpack.c.bf16 %v2392_v49, %v2352_v1  ;;  %v2399_v11 = vpop.permute.xlu0 %2398  ;;  %v2936_v29 = vpack.c.bf16 %v2395_v23, %v2355_v21  ;;  %v8180_v1 = vld [vmem:[#allocation21_spill] sm:$0xff]  ;;  %v8181_v21 = vld [vmem:[#allocation20_spill] sm:$0xff]  ;;  %v8182_v23 = vld [vmem:[#allocation22_spill] sm:$0xff] }
 0x3ec   :  { %v2406_v51 = vsel %vm1719_vm3, %v2397_v53, %v2399_v11 }
 0x3ed   :  { %3009 = vmatpush1.bf16.msra.mxu0 %v2933_v5  ;;  %3049 = vmatprep.subr.bf16.mxu1 %v2936_v29  ;;  %v2409_v22 = vmul.f32 %v2406_v51, %v8176_v34 }
 0x3ee   :  { %2768 = vrot.lane.b32.xlu1 %v6559_v13, %s5828_s24  ;;  %3050 = vmatpush1.bf16.msra.mxu1 %v2935_v48  ;;  %v8183_v48 = vld [vmem:[#allocation23_spill] sm:$0xff] }
 0x3ef   :  { %2770 = vrot.lane.b32.xlu0 %v6562_v60, %s5828_s24  ;;  %v2401_v19 = vpop.permute.xlu1 %2400  ;;  %v2403_v54 = vpop.permute.xlu0 %2402 }
 0x3f0   :  { %v2405_v32 = vsel %vm1719_vm3, %v2399_v11, %v2401_v19  ;;  %v2407_v50 = vsel %vm1719_vm3, %v2403_v54, %v2397_v53  ;;  %v2404_v62 = vsel %vm1719_vm3, %v2401_v19, %v2403_v54  ;;  %vm2452_vm3 = vcmp.lt.s32.totalorder %v6652_v31, 14 }
 0x3f1   :  { %v2410_v58 = vmul.f32 %v2405_v32, %v8178_v44  ;;  %v2408_v3 = vmul.f32 %v2407_v50, %v8179_v15  ;;  %v2411_v49 = vmul.f32 %v2404_v62, %v8181_v21 }
 0x3f2   :  { %2804 = vrot.lane.b32.xlu1 %v6552_v9, %s5829_s22 }
 0x3f3   :  { %2806 = vrot.lane.b32.xlu0 %v6554_v12, %s5829_s22  ;;  %v2413_v35 = vpop.permute.xlu1 %2412  ;;  %v2415_v39 = vpop.permute.xlu0 %2414 }
 0x3f4   :  { %v2422_v41 = vsel %vm1759_vm4, %v2413_v35, %v2415_v39 }
 0x3f5   :  { %v2425_v27 = vmul.f32 %v2422_v41, %v8177_v57  ;;  %v7193_v41 = vld [vmem:[%s8088_s8] sm:$0xff] }
 0x3f6   :  { %2808 = vrot.lane.b32.xlu1 %v6559_v13, %s5829_s22  ;;  %v5193_v34 = vcombine.high %v7193_v41, %v7193_v41 }
 0x3f7   :  { %2810 = vrot.lane.b32.xlu0 %v6562_v60, %s5829_s22  ;;  %v2417_v8 = vpop.permute.xlu1 %2416  ;;  %v2419_v47 = vpop.permute.xlu0 %2418  ;;  %v2938_v40 = vpack.c.bf16 %v2425_v27, %v2409_v22 }
 0x3f8   :  { %v2421_v25 = vsel %vm1759_vm4, %v2415_v39, %v2417_v8  ;;  %v2420_v7 = vsel %vm1759_vm4, %v2417_v8, %v2419_v47  ;;  %v2423_v17 = vsel %vm1759_vm4, %v2419_v47, %v2413_v35  ;;  %v5182_v39 = vld [vmem:[%s8086_s18 + $0x24] sm:$0xf]  ;;  %5195 = vmatprep.mubr.msk.bf16.mxu0 %vm2058_vm14, %v5193_v34  ;;  %5197 = vmatprep.mubr.msk.bf16.mxu1 %vm2058_vm14, %v5193_v34  ;;  %vm2604_vm14 = vcmp.lt.s32.totalorder %v6652_v31, 114 }
 0x3f9   :  { %v2426_v56 = vmul.f32 %v2421_v25, %v8180_v1  ;;  %v2424_v53 = vmul.f32 %v2423_v17, %v8182_v23  ;;  %v2427_v5 = vmul.f32 %v2420_v7, %v8183_v48  ;;  %3010 = vmatprep.subr.bf16.mxu0 %v2938_v40  ;;  %v2467_v22 = vrot.slane %v5182_v39, %v6665_v36  ;;  %v8185_v7 = vld [vmem:[#allocation14_spill] sm:$0xff] }
 0x3fa   :  { %2844 = vrot.lane.b32.xlu1 %v6552_v9, %s5830_s26  ;;  %v2463_v25 = vrot.slane %v5182_v39, %v6674_v45 }
 0x3fb   :  { %2846 = vrot.lane.b32.xlu0 %v6554_v12, %s5830_s26  ;;  %v2429_v11 = vpop.permute.xlu1 %2428  ;;  %v2939_v29 = vpack.c.bf16 %v2426_v56, %v2410_v58  ;;  %v2937_v19 = vpack.c.bf16 %v2424_v53, %v2408_v3  ;;  %v2431_v54 = vpop.permute.xlu0 %2430  ;;  %v2940_v51 = vpack.c.bf16 %v2427_v5, %v2411_v49  ;;  %v2471_v58 = vrot.slane %v5182_v39, %v8171_v28  ;;  %v8184_v56 = vld [vmem:[#allocation6_spill] sm:$0xff]  ;;  %v8186_v53 = vld [vmem:[#allocation8_spill] sm:$0xff] }
 0x3fc   :  { %v2438_v50 = vsel %vm1799_vm8, %v2429_v11, %v2431_v54  ;;  %v2475_v3 = vrot.slane %v5182_v39, %v6669_v43  ;;  %v7218_v17 = vadd.f32 %v8185_v7, %v8184_v56 }
 0x3fd   :  { %3011 = vmatpush1.bf16.msra.mxu0 %v2937_v19  ;;  %3051 = vmatprep.subr.bf16.mxu1 %v2940_v51  ;;  %v2441_v47 = vmul.f32 %v2438_v50, %v6809_v4  ;;  %v7225_v4 = vadd.f32 %v8185_v7, %v8186_v53 }
 0x3fe   :  { %2848 = vrot.lane.b32.xlu1 %v6559_v13, %s5830_s26  ;;  %3052 = vmatpush1.bf16.msra.mxu1 %v2939_v29 }
 0x3ff   :  { %2850 = vrot.lane.b32.xlu0 %v6562_v60, %s5830_s26  ;;  %v2433_v35 = vpop.permute.xlu1 %2432  ;;  %v2435_v32 = vpop.permute.xlu0 %2434 }
 0x400   :  { %v2437_v8 = vsel %vm1799_vm8, %v2431_v54, %v2433_v35  ;;  %v2439_v40 = vsel %vm1799_vm8, %v2435_v32, %v2429_v11  ;;  %v2436_v21 = vsel %vm1799_vm8, %v2433_v35, %v2435_v32  ;;  %vm2492_vm8 = vcmp.lt.s32.totalorder %v6652_v31, 2 }
 0x401   :  { %v2442_v5 = vmul.f32 %v2437_v8, %v6822_v30  ;;  %v2440_v54 = vmul.f32 %v2439_v40, %v6835_v33  ;;  %v2443_v32 = vmul.f32 %v2436_v21, %v6838_v14 }
 0x402   :  { %2884 = vrot.lane.b32.xlu1 %v6552_v9, %s5831_s0 }
 0x403   :  { %2886 = vrot.lane.b32.xlu0 %v6554_v12, %s5831_s0  ;;  %v2445_v27 = vpop.permute.xlu1 %2444  ;;  %v2447_v62 = vpop.permute.xlu0 %2446 }
 0x404   :  { %v2455_v44 = vsel %vm2452_vm3, %v2445_v27, %v2447_v62 }
 0x405   :  { %v2481_v15 = vmul.f32 %v2467_v22, %v2455_v44  ;;  %v8187_v44 = vld [vmem:[#allocation7_spill] sm:$0xff] }
 0x406   :  { %2888 = vrot.lane.b32.xlu1 %v6559_v13, %s5831_s0 }
 0x407   :  { %2890 = vrot.lane.b32.xlu0 %v6562_v60, %s5831_s0  ;;  %v2449_v49 = vpop.permute.xlu1 %2448  ;;  %v2451_v29 = vpop.permute.xlu0 %2450  ;;  %v2942_v19 = vpack.c.bf16 %v2481_v15, %v2441_v47 }
 0x408   :  { %v2454_v11 = vsel %vm2452_vm3, %v2447_v62, %v2449_v49  ;;  %v2453_v35 = vsel %vm2452_vm3, %v2449_v49, %v2451_v29  ;;  %v2456_v39 = vsel %vm2452_vm3, %v2451_v29, %v2445_v27  ;;  %v8188_v27 = vld [vmem:[#allocation9_spill] sm:$0xff] }
 0x409   :  { %v2482_v51 = vmul.f32 %v2471_v58, %v2454_v11  ;;  %v2480_v34 = vmul.f32 %v2463_v25, %v2456_v39  ;;  %v2483_v22 = vmul.f32 %v2475_v3, %v2453_v35  ;;  %3012 = vmatprep.subr.bf16.mxu0 %v2942_v19  ;;  %v7242_v58 = vadd.f32 %v8185_v7, %v8187_v44  ;;  %v5183_v25 = vld [vmem:[%s8086_s18 + $0x28] sm:$0xf] }
 0x40a   :  { %3086 = vrot.lane.b32.xlu1 %v7218_v17, %s5811_s1  ;;  %v7246_v14 = vadd.f32 %v8185_v7, %v8188_v27  ;;  %v2507_v15 = vrot.slane %v5183_v25, %v6665_v36  ;;  %v2511_v21 = vrot.slane %v5183_v25, %v8171_v28  ;;  %v2503_v49 = vrot.slane %v5183_v25, %v6674_v45 }
 0x40b   :  { %3088 = vrot.lane.b32.xlu0 %v7225_v4, %s5811_s1  ;;  %v2485_v30 = vpop.permute.xlu1 %2484  ;;  %v2943_v33 = vpack.c.bf16 %v2482_v51, %v2442_v5  ;;  %v2941_v50 = vpack.c.bf16 %v2480_v34, %v2440_v54  ;;  %v2487_v62 = vpop.permute.xlu0 %2486  ;;  %v2944_v8 = vpack.c.bf16 %v2483_v22, %v2443_v32  ;;  %v2515_v29 = vrot.slane %v5183_v25, %v6669_v43  ;;  %v1663_v22 = vld [vmem:[%s8137_s2 + $0x20] sm:$0xff] }
 0x40c   :  { %v2495_v3 = vsel %vm2492_vm8, %v2485_v30, %v2487_v62 }
 0x40d   :  { %3013 = vmatpush1.bf16.msra.mxu0 %v2941_v50  ;;  %3053 = vmatprep.subr.bf16.mxu1 %v2944_v8  ;;  %v2521_v5 = vmul.f32 %v2507_v15, %v2495_v3 }
 0x40e   :  { %3090 = vrot.lane.b32.xlu1 %v7242_v58, %s5811_s1  ;;  %3054 = vmatpush1.bf16.msra.mxu1 %v2943_v33 }
 0x40f   :  { %3092 = vrot.lane.b32.xlu0 %v7246_v14, %s5811_s1  ;;  %v2489_v47 = vpop.permute.xlu1 %2488  ;;  %v2491_v40 = vpop.permute.xlu0 %2490 }
 0x410   :  { %v2494_v11 = vsel %vm2492_vm8, %v2487_v62, %v2489_v47  ;;  %v2493_v54 = vsel %vm2492_vm8, %v2489_v47, %v2491_v40  ;;  %v2496_v51 = vsel %vm2492_vm8, %v2491_v40, %v2485_v30 }
 0x411   :  { %v2522_v33 = vmul.f32 %v2511_v21, %v2494_v11  ;;  %v2520_v8 = vmul.f32 %v2503_v49, %v2496_v51  ;;  %v2523_v44 = vmul.f32 %v2515_v29, %v2493_v54  ;;  %v8189_v49 = vld [vmem:[#allocation25_spill] sm:$0xff]  ;;  %v8190_v29 = vld [vmem:[#allocation26_spill] sm:$0xff] }
 0x412   :  { %3299 = vrot.lane.b32.xlu1 %v7218_v17, %s5812_s23 }
 0x413   :  { %3301 = vrot.lane.b32.xlu0 %v7225_v4, %s5812_s23  ;;  %v2525_v56 = vpop.permute.xlu1 %2524  ;;  %v2527_v7 = vpop.permute.xlu0 %2526 }
 0x414   :  { %v2534_v53 = vsel %vm1839_vm9, %v2525_v56, %v2527_v7 }
 0x415   :  { %v2537_v19 = vmul.f32 %v2534_v53, %v6851_v6 }
 0x416   :  { %3303 = vrot.lane.b32.xlu1 %v7242_v58, %s5812_s23 }
 0x417   :  { %3305 = vrot.lane.b32.xlu0 %v7246_v14, %s5812_s23  ;;  %v2529_v35 = vpop.permute.xlu1 %2528  ;;  %v2531_v32 = vpop.permute.xlu0 %2530  ;;  %v2946_v34 = vpack.c.bf16 %v2537_v19, %v2521_v5 }
 0x418   :  { %v2533_v39 = vsel %vm1839_vm9, %v2527_v7, %v2529_v35  ;;  %v2532_v30 = vsel %vm1839_vm9, %v2529_v35, %v2531_v32  ;;  %v2535_v62 = vsel %vm1839_vm9, %v2531_v32, %v2525_v56 }
 0x419   :  { %v2538_v50 = vmul.f32 %v2533_v39, %v6868_v20  ;;  %v2536_v27 = vmul.f32 %v2535_v62, %v6882_v46  ;;  %v2539_v25 = vmul.f32 %v2532_v30, %v6885_v0  ;;  %3014 = vmatprep.subr.bf16.mxu0 %v2946_v34 }
 0x41a   :  { %1686 = vperm.xlu1 %5511, %v1663_v22  }
 0x41b   :  { %v2947_v47 = vpack.c.bf16 %v2538_v50, %v2522_v33  ;;  %v2945_v40 = vpack.c.bf16 %v2536_v27, %v2520_v8  ;;  %v2541_v15 = vpop.permute.xlu1 %2540  ;;  %v2948_v7 = vpack.c.bf16 %v2539_v25, %v2523_v44  ;;  %v5184_v44 = vld [vmem:[%s8086_s18 + $0x38] sm:$0xf] }
 0x41c   :  { %v2543_v3 = vpop.permute.xlu0 %2542 }
 0x41d   :  { %v2550_v21 = vsel %vm1879_vm5, %v2541_v15, %v2543_v3  ;;  %3015 = vmatpush1.bf16.msra.mxu0 %v2945_v40  ;;  %3055 = vmatprep.subr.bf16.mxu1 %v2948_v7  ;;  %v2583_v40 = vrot.slane %v5184_v44, %v8171_v28 }
 0x41e   :  { %3056 = vmatpush1.bf16.msra.mxu1 %v2947_v47  ;;  %v2552_v53 = vmul.f32 %v2550_v21, %v8189_v49  ;;  %v2587_v21 = vrot.slane %v5184_v44, %v6669_v43 }
 0x420   :  { %v2545_v56 = vpop.permute.xlu1 %2544  ;;  %v2547_v11 = vpop.permute.xlu0 %2546  ;;  %v2949_v22 = vpack.c.bf16 %v2552_v53, %v6552_v9 }
 0x421   :  { %v2549_v5 = vsel %vm1879_vm5, %v2543_v3, %v2545_v56  ;;  %v2548_v54 = vsel %vm1879_vm5, %v2545_v56, %v2547_v11  ;;  %v2551_v51 = vsel %vm1879_vm5, %v2547_v11, %v2541_v15 }
 0x422   :  { %v2553_v19 = vmul.f32 %v2549_v5, %v8190_v29  ;;  %v2554_v35 = vmul.f32 %v2548_v54, %v6769_v42  ;;  %v2555_v39 = vmul.f32 %v2551_v51, %v6777_v2 }
 0x424   :  { %v2557_v32 = vpop.permute.xlu1 %2556  ;;  %v2950_v34 = vpack.c.bf16 %v2553_v19, %v6554_v12  ;;  %v2951_v33 = vpack.c.bf16 %v2554_v35, %v6559_v13  ;;  %v2559_v50 = vpop.permute.xlu0 %2558  ;;  %v2952_v30 = vpack.c.bf16 %v2555_v39, %v6562_v60  ;;  %v5185_v12 = vld [vmem:[%s8086_s18 + $0x3c] sm:$0xf]  ;;  %v2575_v13 = vrot.slane %v5184_v44, %v6674_v45 }
 0x425   :  { %v2579_v60 = vrot.slane %v5184_v44, %v6665_v36  ;;  %v2615_v27 = vrot.slane %v5185_v12, %v6674_v45  ;;  %v2567_v47 = vsel %vm2564_vm12, %v2557_v32, %v2559_v50  ;;  %v2619_v3 = vrot.slane %v5185_v12, %v6665_v36 }
 0x426   :  { %3016 = vmatprep.subr.bf16.mxu0 %v2950_v34  ;;  %3057 = vmatprep.subr.bf16.mxu1 %v2952_v30  ;;  %v2623_v56 = vrot.slane %v5185_v12, %v8171_v28  ;;  %v2627_v53 = vrot.slane %v5185_v12, %v6669_v43  ;;  %v2592_v54 = vmul.f32 %v2575_v13, %v2567_v47 }
 0x427   :  { %3017 = vmatpush1.bf16.msra.mxu0 %v2949_v22  ;;  %3058 = vmatpush1.bf16.msra.mxu1 %v2951_v33 }
 0x428   :  { %v2561_v62 = vpop.permute.xlu1 %2560  ;;  %v2563_v8 = vpop.permute.xlu0 %2562 }
 0x429   :  { %v2566_v7 = vsel %vm2564_vm12, %v2559_v50, %v2561_v62  ;;  %v2565_v5 = vsel %vm2564_vm12, %v2561_v62, %v2563_v8  ;;  %v2568_v11 = vsel %vm2564_vm12, %v2563_v8, %v2557_v32 }
 0x42a   :  { %v2593_v34 = vmul.f32 %v2579_v60, %v2566_v7  ;;  %v2594_v30 = vmul.f32 %v2583_v40, %v2565_v5  ;;  %v2595_v62 = vmul.f32 %v2587_v21, %v2568_v11 }
 0x42c   :  { %v2597_v9 = vpop.permute.xlu1 %2596  ;;  %v2599_v25 = vpop.permute.xlu0 %2598 }
 0x42d   :  { %v2607_v15 = vsel %vm2604_vm14, %v2597_v9, %v2599_v25 }
 0x42e   :  { %v2632_v51 = vmul.f32 %v2615_v27, %v2607_v15 }
 0x430   :  { %v2601_v19 = vpop.permute.xlu1 %2600  ;;  %v2953_v13 = vpack.c.bf16 %v2632_v51, %v2592_v54 }
 0x431   :  { %v2606_v35 = vsel %vm2604_vm14, %v2599_v25, %v2601_v19  ;;  %v2603_v39 = vpop.permute.xlu0 %2602 }
 0x432   :  { %v2633_v22 = vmul.f32 %v2619_v3, %v2606_v35  ;;  %v2605_v33 = vsel %vm2604_vm14, %v2601_v19, %v2603_v39  ;;  %v2608_v50 = vsel %vm2604_vm14, %v2603_v39, %v2597_v9 }
 0x433   :  { %v2634_v44 = vmul.f32 %v2623_v56, %v2605_v33  ;;  %v2635_v12 = vmul.f32 %v2627_v53, %v2608_v50 }
 0x434   :  { %v2637_v32 = vpop.permute.xlu1 %2636  ;;  %v2954_v8 = vpack.c.bf16 %v2633_v22, %v2593_v34 }
 0x435   :  { %v2955_v27 = vpack.c.bf16 %v2634_v44, %v2594_v30  ;;  %v2639_v47 = vpop.permute.xlu0 %2638  ;;  %v2956_v15 = vpack.c.bf16 %v2635_v12, %v2595_v62 }
 0x436   :  { %3018 = vmatprep.subr.bf16.mxu0 %v2954_v8  ;;  %v2646_v9 = vsel %vm1919_vm6, %v2637_v32, %v2639_v47 }
 0x437   :  { %3059 = vmatprep.subr.bf16.mxu1 %v2956_v15  ;;  %3019 = vmatpush1.bf16.msra.mxu0 %v2953_v13  ;;  %v2648_v11 = vmul.f32 %v2646_v9, %v6781_v61 }
 0x438   :  { %3060 = vmatpush1.bf16.msra.mxu1 %v2955_v27  ;;  %v2641_v60 = vpop.permute.xlu1 %2640 }
 0x439   :  { %v2643_v25 = vpop.permute.xlu0 %2642  ;;  %v2645_v21 = vsel %vm1919_vm6, %v2639_v47, %v2641_v60 }
 0x43a   :  { %v2644_v56 = vsel %vm1919_vm6, %v2641_v60, %v2643_v25  ;;  %v2647_v53 = vsel %vm1919_vm6, %v2643_v25, %v2637_v32  ;;  %v2649_v35 = vmul.f32 %v2645_v21, %v6784_v38  ;;  %vm2692_vm6 = vcmp.lt.s32.totalorder %v6652_v31, 110 }
 0x43b   :  { %v2650_v33 = vmul.f32 %v2644_v56, %v8172_v10  ;;  %v2651_v61 = vmul.f32 %v2647_v53, %v6792_v37  ;;  %v5186_v37 = vld [vmem:[%s8086_s18 + $0x4c] sm:$0xf] }
 0x43c   :  { %v2653_v3 = vpop.permute.xlu1 %2652  ;;  %v2703_v47 = vrot.slane %v5186_v37, %v6674_v45  ;;  %v2711_v9 = vrot.slane %v5186_v37, %v8171_v28 }
 0x43d   :  { %v2655_v7 = vpop.permute.xlu0 %2654 }
 0x43e   :  { %v2662_v40 = vsel %vm1959_vm7, %v2653_v3, %v2655_v7 }
 0x43f   :  { %v2664_v19 = vmul.f32 %v2662_v40, %v6795_v16  ;;  %v2715_v40 = vrot.slane %v5186_v37, %v6669_v43 }
 0x440   :  { %v2657_v5 = vpop.permute.xlu1 %2656 }
 0x441   :  { %v2661_v54 = vsel %vm1959_vm7, %v2655_v7, %v2657_v5  ;;  %v2659_v51 = vpop.permute.xlu0 %2658  ;;  %v2957_v12 = vpack.c.bf16 %v2664_v19, %v2648_v11 }
 0x442   :  { %v2665_v39 = vmul.f32 %v2661_v54, %v6806_v18  ;;  %v2660_v34 = vsel %vm1959_vm7, %v2657_v5, %v2659_v51  ;;  %v2663_v22 = vsel %vm1959_vm7, %v2659_v51, %v2653_v3  ;;  %v2707_v3 = vrot.slane %v5186_v37, %v6665_v36 }
 0x443   :  { %v2666_v50 = vmul.f32 %v2660_v34, %v8167_v24  ;;  %v2667_v30 = vmul.f32 %v2663_v22, %v6830_v55 }
 0x444   :  { %v2669_v62 = vpop.permute.xlu1 %2668  ;;  %v2958_v44 = vpack.c.bf16 %v2665_v39, %v2649_v35 }
 0x445   :  { %v2959_v38 = vpack.c.bf16 %v2666_v50, %v2650_v33  ;;  %v2671_v32 = vpop.permute.xlu0 %2670  ;;  %v2960_v8 = vpack.c.bf16 %v2667_v30, %v2651_v61 }
 0x446   :  { %3020 = vmatprep.subr.bf16.mxu0 %v2958_v44  ;;  %v2678_v60 = vsel %vm1999_vm10, %v2669_v62, %v2671_v32 }
 0x447   :  { %3061 = vmatprep.subr.bf16.mxu1 %v2960_v8  ;;  %3021 = vmatpush1.bf16.msra.mxu0 %v2957_v12  ;;  %v2680_v5 = vmul.f32 %v2678_v60, %v6841_v52 }
 0x448   :  { %3062 = vmatpush1.bf16.msra.mxu1 %v2959_v38  ;;  %v2673_v13 = vpop.permute.xlu1 %2672 }
 0x449   :  { %v2675_v27 = vpop.permute.xlu0 %2674  ;;  %v2677_v7 = vsel %vm1999_vm10, %v2671_v32, %v2673_v13 }
 0x44a   :  { %v2676_v21 = vsel %vm1999_vm10, %v2673_v13, %v2675_v27  ;;  %v2679_v56 = vsel %vm1999_vm10, %v2675_v27, %v2669_v62  ;;  %v2681_v51 = vmul.f32 %v2677_v7, %v6847_v26  ;;  %vm2732_vm10 = vcmp.lt.s32.totalorder %v6652_v31, 98 }
 0x44b   :  { %v2682_v22 = vmul.f32 %v2676_v21, %v8168_v59  ;;  %v2683_v33 = vmul.f32 %v2679_v56, %v8169_v63  ;;  %v5187_v59 = vld [vmem:[%s8086_s18 + $0x50] sm:$0xf]  ;;  %v5188_v63 = vld [vmem:[%s8086_s18 + $0x54] sm:$0xf] }
 0x44c   :  { %v2685_v10 = vpop.permute.xlu1 %2684  ;;  %v2743_v13 = vrot.slane %v5187_v59, %v6674_v45  ;;  %v2747_v27 = vrot.slane %v5187_v59, %v6665_v36  ;;  %v2783_v37 = vrot.slane %v5188_v63, %v6674_v45  ;;  %v2755_v7 = vrot.slane %v5187_v59, %v6669_v43 }
 0x44d   :  { %v2687_v15 = vpop.permute.xlu0 %2686 }
 0x44e   :  { %v2695_v25 = vsel %vm2692_vm6, %v2685_v10, %v2687_v15 }
 0x44f   :  { %v2720_v11 = vmul.f32 %v2703_v47, %v2695_v25  ;;  %v2787_v25 = vrot.slane %v5188_v63, %v6665_v36 }
 0x450   :  { %v2689_v53 = vpop.permute.xlu1 %2688 }
 0x451   :  { %v2694_v19 = vsel %vm2692_vm6, %v2687_v15, %v2689_v53  ;;  %v2691_v54 = vpop.permute.xlu0 %2690  ;;  %v2961_v62 = vpack.c.bf16 %v2720_v11, %v2680_v5  ;;  %v2751_v15 = vrot.slane %v5187_v59, %v8171_v28  ;;  %v5189_v59 = vld [vmem:[%s8086_s18 + $0x58] sm:$0xf] }
 0x452   :  { %v2721_v35 = vmul.f32 %v2707_v3, %v2694_v19  ;;  %v2693_v39 = vsel %vm2692_vm6, %v2689_v53, %v2691_v54  ;;  %v2696_v34 = vsel %vm2692_vm6, %v2691_v54, %v2685_v10 }
 0x453   :  { %v2722_v61 = vmul.f32 %v2711_v9, %v2693_v39  ;;  %v2723_v52 = vmul.f32 %v2715_v40, %v2696_v34  ;;  %v2791_v9 = vrot.slane %v5188_v63, %v8171_v28  ;;  %v2795_v40 = vrot.slane %v5188_v63, %v6669_v43  ;;  %v5190_v63 = vld [vmem:[%s8086_s18 + $0x5c] sm:$0xf] }
 0x454   :  { %v2725_v50 = vpop.permute.xlu1 %2724  ;;  %v2962_v30 = vpack.c.bf16 %v2721_v35, %v2681_v51 }
 0x455   :  { %v2963_v44 = vpack.c.bf16 %v2722_v61, %v2682_v22  ;;  %v2727_v12 = vpop.permute.xlu0 %2726  ;;  %v2964_v38 = vpack.c.bf16 %v2723_v52, %v2683_v33 }
 0x456   :  { %3022 = vmatprep.subr.bf16.mxu0 %v2962_v30  ;;  %v2735_v47 = vsel %vm2732_vm10, %v2725_v50, %v2727_v12 }
 0x457   :  { %3063 = vmatprep.subr.bf16.mxu1 %v2964_v38  ;;  %3023 = vmatpush1.bf16.msra.mxu0 %v2961_v62  ;;  %v2760_v5 = vmul.f32 %v2743_v13, %v2735_v47  ;;  %v2823_v13 = vrot.slane %v5189_v59, %v6674_v45 }
 0x458   :  { %3064 = vmatpush1.bf16.msra.mxu1 %v2963_v44  ;;  %v2729_v26 = vpop.permute.xlu1 %2728 }
 0x459   :  { %v2731_v32 = vpop.permute.xlu0 %2730  ;;  %v2734_v3 = vsel %vm2732_vm10, %v2727_v12, %v2729_v26 }
 0x45a   :  { %v2733_v21 = vsel %vm2732_vm10, %v2729_v26, %v2731_v32  ;;  %v2736_v56 = vsel %vm2732_vm10, %v2731_v32, %v2725_v50  ;;  %v2761_v51 = vmul.f32 %v2747_v27, %v2734_v3  ;;  %v2827_v27 = vrot.slane %v5189_v59, %v6665_v36  ;;  %v5191_v3 = vld [vmem:[%s8086_s18 + $0x60] sm:$0xf] }
 0x45b   :  { %v2762_v22 = vmul.f32 %v2751_v15, %v2733_v21  ;;  %v2763_v33 = vmul.f32 %v2755_v7, %v2736_v56  ;;  %v2831_v15 = vrot.slane %v5189_v59, %v8171_v28  ;;  %v2875_v21 = vrot.slane %v5190_v63, %v6669_v43 }
 0x45c   :  { %v2765_v8 = vpop.permute.xlu1 %2764  ;;  %v5832_v56 = vmov 1983009808  }
 0x45d   :  { %v2767_v10 = vpop.permute.xlu0 %2766 }
 0x45e   :  { %v2775_v60 = vsel %vm2772_vm15, %v2765_v8, %v2767_v10 }
 0x45f   :  { %v2800_v11 = vmul.f32 %v2783_v37, %v2775_v60  ;;  %v2863_v37 = vrot.slane %v5190_v63, %v6674_v45 }
 0x460   :  { %v2769_v53 = vpop.permute.xlu1 %2768 }
 0x461   :  { %v2774_v19 = vsel %vm2772_vm15, %v2767_v10, %v2769_v53  ;;  %v2771_v54 = vpop.permute.xlu0 %2770  ;;  %v2965_v62 = vpack.c.bf16 %v2800_v11, %v2760_v5 }
 0x462   :  { %v2801_v35 = vmul.f32 %v2787_v25, %v2774_v19  ;;  %v2773_v39 = vsel %vm2772_vm15, %v2769_v53, %v2771_v54  ;;  %v2776_v34 = vsel %vm2772_vm15, %v2771_v54, %v2765_v8  ;;  %v2867_v25 = vrot.slane %v5190_v63, %v6665_v36 }
 0x463   :  { %v2802_v61 = vmul.f32 %v2791_v9, %v2773_v39  ;;  %v2803_v52 = vmul.f32 %v2795_v40, %v2776_v34  ;;  %v2835_v9 = vrot.slane %v5189_v59, %v6669_v43  ;;  %v2871_v40 = vrot.slane %v5190_v63, %v8171_v28 }
 0x464   :  { %v2805_v50 = vpop.permute.xlu1 %2804  ;;  %v2966_v30 = vpack.c.bf16 %v2801_v35, %v2761_v51  ;;  %v3127_v53 = vunpack.c.l.s4 %v5832_v56  ;;  %v2903_v34 = vrot.slane %v5191_v3, %v6674_v45  ;;  %v3250_v59 = vrot.slane %v7218_v17, %v6665_v36  ;;  %v8191_v56 = vld [vmem:[#allocation15_spill] sm:$0xff] }
 0x465   :  { %v2967_v44 = vpack.c.bf16 %v2802_v61, %v2762_v22  ;;  %v2807_v12 = vpop.permute.xlu0 %2806  ;;  %v2968_v38 = vpack.c.bf16 %v2803_v52, %v2763_v33 }
 0x466   :  { %3024 = vmatprep.subr.bf16.mxu0 %v2966_v30  ;;  %v2815_v47 = vsel %vm2812_vm0, %v2805_v50, %v2807_v12 }
 0x467   :  { %3065 = vmatprep.subr.bf16.mxu1 %v2968_v38  ;;  %3025 = vmatpush1.bf16.msra.mxu0 %v2965_v62  ;;  %v2840_v54 = vmul.f32 %v2823_v13, %v2815_v47  ;;  %v3128_v38 = vunpack.c.0.s8 %v3127_v53 }
 0x468   :  { %3066 = vmatpush1.bf16.msra.mxu1 %v2967_v44  ;;  %v2809_v26 = vpop.permute.xlu1 %2808 }
 0x469   :  { %v2811_v32 = vpop.permute.xlu0 %2810  ;;  %v2814_v7 = vsel %vm2812_vm0, %v2807_v12, %v2809_v26  ;;  %v3206_v12 = vrot.slane %v7218_v17, %v6674_v45  ;;  %v2911_v17 = vrot.slane %v5191_v3, %v8171_v28  ;;  %v7482_v53 = vsub.s32 %v3128_v38, %v8191_v56 }
 0x46a   :  { %v2813_v5 = vsel %vm2812_vm0, %v2809_v26, %v2811_v32  ;;  %v2816_v11 = vsel %vm2812_vm0, %v2811_v32, %v2805_v50  ;;  %v2841_v22 = vmul.f32 %v2827_v27, %v2814_v7  ;;  %v3214_v7 = vrot.slane %v7242_v58, %v6674_v45 }
 0x46b   :  { %v2842_v50 = vmul.f32 %v2831_v15, %v2813_v5  ;;  %v2843_v30 = vmul.f32 %v2835_v9, %v2816_v11  ;;  %v2907_v15 = vrot.slane %v5191_v3, %v6665_v36  ;;  %v3258_v9 = vrot.slane %v7242_v58, %v6665_v36 }
 0x46c   :  { %v2845_v8 = vpop.permute.xlu1 %2844  ;;  %v5192_v38 = vcombine.low %v7193_v41, %v7193_v41  ;;  %v5720_v41 = vld [vmem:[%s8089_s14 + $0x80] sm:$0xff]  }
 0x46d   :  { %v2847_v10 = vpop.permute.xlu0 %2846 }
 0x46e   :  { %v2855_v60 = vsel %vm2852_vm2, %v2845_v8, %v2847_v10 }
 0x46f   :  { %v2880_v51 = vmul.f32 %v2863_v37, %v2855_v60 }
 0x470   :  { %v2849_v19 = vpop.permute.xlu1 %2848 }
 0x471   :  { %v2854_v35 = vsel %vm2852_vm2, %v2847_v10, %v2849_v19  ;;  %v2851_v39 = vpop.permute.xlu0 %2850  ;;  %v2969_v63 = vpack.c.bf16 %v2880_v51, %v2840_v54  ;;  %v3254_v10 = vrot.slane %v7225_v4, %v6665_v36 }
 0x472   :  { %v2881_v33 = vmul.f32 %v2867_v25, %v2854_v35  ;;  %v2853_v61 = vsel %vm2852_vm2, %v2849_v19, %v2851_v39  ;;  %v2856_v52 = vsel %vm2852_vm2, %v2851_v39, %v2845_v8  ;;  %v3210_v8 = vrot.slane %v7225_v4, %v6674_v45 }
 0x473   :  { %v2882_v62 = vmul.f32 %v2871_v40, %v2853_v61  ;;  %v2883_v44 = vmul.f32 %v2875_v21, %v2856_v52  ;;  %v2915_v25 = vrot.slane %v5191_v3, %v6669_v43  ;;  %v3218_v4 = vrot.slane %v7246_v14, %v6674_v45  ;;  %v5717_v61 = vld [vmem:[%s8089_s14 + $0x40] sm:$0xff]  }
 0x474   :  { %v2885_v26 = vpop.permute.xlu1 %2884  ;;  %v2970_v32 = vpack.c.bf16 %v2881_v33, %v2841_v22  ;;  %v3262_v40 = vrot.slane %v7246_v14, %v6665_v36  ;;  %v3223_v54 = vcombine.low %v3206_v12, %v3210_v8  ;;  %v3267_v51 = vcombine.low %v3250_v59, %v3254_v10  ;;  %v5721_v8 = vld [vmem:[%s8089_s14 + $0x48] sm:$0xff]  }
 0x475   :  { %v2971_v13 = vpack.c.bf16 %v2882_v62, %v2842_v50  ;;  %v2887_v27 = vpop.permute.xlu0 %2886  ;;  %v2972_v37 = vpack.c.bf16 %v2883_v44, %v2843_v30  ;;  %v3224_v39 = vcombine.low %v3214_v7, %v3218_v4  ;;  %v5718_v62 = vld [vmem:[%s8089_s14 + $0xc0] sm:$0xff]   ;;  %v5723_v4 = vld [vmem:[%s8089_s14 + $0x8] sm:$0xff]  }
 0x476   :  { %v2895_v47 = vsel %vm2892_vm11, %v2885_v26, %v2887_v27  ;;  %3026 = vmatprep.subr.bf16.mxu0 %v2970_v32  ;;  %v3275_v32 = vrot.slane %v3267_v51, %v7482_v53  ;;  %v7554_v51 = vld [vmem:[%s8090_s10 + $0x18] sm:$0xff] }
 0x477   :  { %v2920_v60 = vmul.f32 %v2903_v34, %v2895_v47  ;;  %3067 = vmatprep.subr.bf16.mxu1 %v2972_v37  ;;  %3027 = vmatpush1.bf16.msra.mxu0 %v2969_v63  ;;  %v3268_v34 = vcombine.low %v3258_v9, %v3262_v40  ;;  %v5719_v63 = vld [vmem:[%s8089_s14] sm:$0xff]  }
 0x478   :  { %3068 = vmatpush1.bf16.msra.mxu1 %v2971_v13  ;;  %v2889_v21 = vpop.permute.xlu1 %2888  ;;  %v3238_v13 = vrot.slane %v3224_v39, %v7482_v53 }
 0x479   :  { %v2894_v43 = vsel %vm2892_vm11, %v2887_v27, %v2889_v21  ;;  %v2891_v3 = vpop.permute.xlu0 %2890  ;;  %v2973_v5 = vpack.c.bf16 %v2920_v60, %v2920_v60  ;;  %v3282_v27 = vrot.slane %v3268_v34, %v7482_v53 }
 0x47a   :  { %v2921_v11 = vmul.f32 %v2907_v15, %v2894_v43  ;;  %v2893_v58 = vsel %vm2892_vm11, %v2889_v21, %v2891_v3  ;;  %v2896_v19 = vsel %vm2892_vm11, %v2891_v3, %v2885_v26  ;;  %v3231_v26 = vrot.slane %v3223_v54, %v7482_v53  ;;  %v5722_v15 = vld [vmem:[%s8089_s14 + $0xc8] sm:$0xff]   ;;  %v5726_v54 = vld [vmem:[%s8089_s14 + $0xd0] sm:$0xff]  }
 0x47b   :  { %v2922_v14 = vmul.f32 %v2911_v17, %v2893_v58  ;;  %v2923_v35 = vmul.f32 %v2915_v25, %v2896_v19  ;;  %v2993_v12 = vsel %vm2062_vm13, %v2973_v5, 0  ;;  %v7535_v21 = vcombine.low %v3275_v32, %v3282_v27 }
 0x47c   :  { %v2974_v22 = vpack.c.bf16 %v2921_v11, %v2921_v11  ;;  %v3087_v33 = vpop.permute.xlu1 %3086  ;;  %v7533_v40 = vcombine.low %v3231_v26, %v3238_v13 }
 0x47d   :  { %v2975_v52 = vpack.c.bf16 %v2922_v14, %v2922_v14  ;;  %v2976_v50 = vpack.c.bf16 %v2923_v35, %v2923_v35  ;;  %v3089_v30 = vpop.permute.xlu0 %3088 }
 0x47e   :  { %v3096_v44 = vsel %vm1759_vm4, %v3087_v33, %v3089_v30  ;;  %5194 = vmatprep.subr.msk.bf16.mxu0 %vm2062_vm13, %v2974_v22 }
 0x47f   :  { %5196 = vmatprep.subr.msk.bf16.mxu1 %vm2062_vm13, %v2976_v50  ;;  %3029 = vmatpush1.bf16.msra.mxu0 %v2993_v12  ;;  %v2999_v59 = vsel %vm2062_vm13, %v2975_v52, 0  ;;  %v3099_v37 = vmul.f32 %v3096_v44, %v8177_v57  ;;  %v5729_v44 = vld [vmem:[%s8089_s14 + $0x58] sm:$0xff]   ;;  %v3240_v12 = vrot.slane %v7533_v40, 1 }
 0x480   :  { %3070 = vmatpush1.bf16.msra.mxu1 %v2999_v59  ;;  %5316 = vmatprep.subr.bf16.mxu0 %v5717_v61  ;;  %v3091_v10 = vpop.permute.xlu1 %3090  ;;  %v5727_v61 = vld [vmem:[%s8089_s14 + $0x10] sm:$0xff]  }
 0x481   :  { %v3093_v47 = vpop.permute.xlu0 %3092  ;;  %5338 = vmatprep.subr.bf16.mxu1 %v5718_v62  ;;  %v3095_v57 = vsel %vm1759_vm4, %v3089_v30, %v3091_v10  ;;  %v3111_v43 = vrot.slane %v3099_v37, %v6674_v45  ;;  %v3155_v14 = vrot.slane %v3099_v37, %v6665_v36  ;;  %v5728_v62 = vld [vmem:[%s8089_s14 + $0x90] sm:$0xff]  }
 0x482   :  { %v3094_v60 = vsel %vm1759_vm4, %v3091_v10, %v3093_v47  ;;  %v3097_v17 = vsel %vm1759_vm4, %v3093_v47, %v3087_v33  ;;  %3037 = vmatmul.mubr.bf16.vlgmr.msra.gmra.mrb[32].mxu0 %v5192_v38  ;;  %v3100_v25 = vmul.f32 %v3095_v57, %v8180_v1  ;;  %v5724_v1 = vld [vmem:[%s8089_s14 + $0x88] sm:$0xff]   ;;  %vm3545_vm4 = vcmask 1041409  }
 0x483   :  { %v3098_v7 = vmul.f32 %v3097_v17, %v8182_v23  ;;  %v3101_v9 = vmul.f32 %v3094_v60, %v8183_v48  ;;  %3078 = vmatmul.mubr.bf16.vlgmr.msra.gmra.mrb[48].mxu1 %v5192_v38  ;;  %5317 = vmatpush3.bf16.msra.mxu0 %v5719_v63  ;;  %v5725_v23 = vld [vmem:[%s8089_s14 + $0x50] sm:$0xff]   ;;  %v7574_v38 = vmul.f32 %v7554_v51, %v7535_v21  ;;  %v5730_v63 = vld [vmem:[%s8089_s14 + $0xd8] sm:$0xff]   ;;  %v3284_v17 = vrot.slane %v7535_v21, 7 }
 0x484   :  { %5339 = vmatpush3.bf16.msra.mxu1 %v5720_v41  ;;  %5318 = vmatprep.subr.bf16.mxu0 %v5721_v8  ;;  %v3115_v48 = vrot.slane %v3100_v25, %v6674_v45  ;;  %v3159_v3 = vrot.slane %v3100_v25, %v6665_v36  ;;  %v3300_v58 = vpop.permute.xlu1 %3299  ;;  %v3103_v8 = vld [vmem:[%s8090_s10 + $0x8] sm:$0xff]  ;;  %v5731_v60 = vld [vmem:[%s8089_s14 + $0x18] sm:$0xff]  }
 0x485   :  { %v3107_v5 = vrot.slane %v3098_v7, %v6674_v45  ;;  %v3119_v11 = vrot.slane %v3101_v9, %v6674_v45  ;;  %v3302_v19 = vpop.permute.xlu0 %3301  ;;  %5340 = vmatprep.subr.bf16.mxu1 %v5722_v15  ;;  %v3151_v35 = vrot.slane %v3098_v7, %v6665_v36  ;;  %v3163_v39 = vrot.slane %v3101_v9, %v6665_v36 }
 0x486   :  { %v3309_v34 = vsel %vm1959_vm7, %v3300_v58, %v3302_v19 }
 0x487   :  { %v3124_v22 = vcombine.low %v3107_v5, %v3111_v43  ;;  %v3125_v33 = vcombine.low %v3115_v48, %v3119_v11  ;;  %5319 = vmatpush3.bf16.msra.mxu0 %v5723_v4  ;;  %v3168_v52 = vcombine.low %v3151_v35, %v3155_v14  ;;  %v3169_v50 = vcombine.low %v3159_v3, %v3163_v39  ;;  %v5735_v35 = vld [vmem:[%s8089_s14 + $0x20] sm:$0xff]   ;;  %v5200_v39 = vld [vmem:[%s8090_s10 + $0x10] sm:$0xff] }
 0x488   :  { %v3311_v30 = vmul.f32 %v3309_v34, %v6795_v16  ;;  %5341 = vmatpush3.bf16.msra.mxu1 %v5724_v1  ;;  %5320 = vmatprep.subr.bf16.mxu0 %v5725_v23  ;;  %v3304_v32 = vpop.permute.xlu1 %3303  ;;  %v3102_v23 = vld [vmem:[%s8090_s10] sm:$0xff] }
 0x489   :  { %v3132_v26 = vrot.slane %v3124_v22, %v7482_v53  ;;  %v3139_v16 = vrot.slane %v3125_v33, %v7482_v53  ;;  %v3306_v59 = vpop.permute.xlu0 %3305  ;;  %5342 = vmatprep.subr.bf16.mxu1 %v5726_v54  ;;  %v3176_v13 = vrot.slane %v3168_v52, %v7482_v53  ;;  %v3183_v27 = vrot.slane %v3169_v50, %v7482_v53  ;;  %v5736_v52 = vld [vmem:[%s8089_s14 + $0xa0] sm:$0xff]  }
 0x48a   :  { %v3308_v37 = vsel %vm1959_vm7, %v3302_v19, %v3304_v32  ;;  %v3307_v41 = vsel %vm1959_vm7, %v3304_v32, %v3306_v59  ;;  %v3310_v15 = vsel %vm1959_vm7, %v3306_v59, %v3300_v58  ;;  %v3321_v7 = vrot.slane %v3311_v30, %v6674_v45 }
 0x48b   :  { %v3140_v10 = vcombine.low %v3132_v26, %v3139_v16  ;;  %v3312_v47 = vmul.f32 %v3308_v37, %v6806_v18  ;;  %v3313_v57 = vmul.f32 %v3307_v41, %v8167_v24  ;;  %5321 = vmatpush3.bf16.msra.mxu0 %v5727_v61  ;;  %v3184_v25 = vcombine.low %v3176_v13, %v3183_v27  ;;  %v5732_v18 = vld [vmem:[%s8089_s14 + $0x98] sm:$0xff]   ;;  %v5733_v24 = vld [vmem:[%s8089_s14 + $0x60] sm:$0xff]   ;;  %v5737_v26 = vld [vmem:[%s8089_s14 + $0x68] sm:$0xff]  }
 0x48c   :  { %v3314_v9 = vmul.f32 %v3310_v15, %v6830_v55  ;;  %5343 = vmatpush3.bf16.msra.mxu1 %v5728_v62  ;;  %5322 = vmatprep.subr.bf16.mxu0 %v5729_v44  ;;  %v3365_v43 = vrot.slane %v3311_v30, %v6665_v36  ;;  %v5734_v55 = vld [vmem:[%s8089_s14 + $0xe0] sm:$0xff]   ;;  %v3244_v50 = vmul.f32 %v7554_v51, %v3240_v12  ;;  %v5738_v16 = vld [vmem:[%s8089_s14 + $0xe8] sm:$0xff]   ;;  %v5203_v15 = vrot.slane %v7574_v38, 9  ;;  %v5743_v38 = vld [vmem:[%s8089_s14 + $0x30] sm:$0xff]  }
 0x48d   :  { %v3141_v4 = vrot.slane %v3140_v10, 1  ;;  %v3325_v21 = vrot.slane %v3312_v47, %v6674_v45  ;;  %v3369_v1 = vrot.slane %v3312_v47, %v6665_v36  ;;  %5344 = vmatprep.subr.bf16.mxu1 %v5730_v63  ;;  %v3185_v48 = vrot.slane %v3184_v25, 7  ;;  %v5739_v27 = vld [vmem:[%s8089_s14 + $0x28] sm:$0xff]  }
 0x48e   :  { %v3189_v3 = vmul.f32 %v3184_v25, %v3103_v8  ;;  %v3329_v5 = vrot.slane %v3313_v57, %v6674_v45  ;;  %v3333_v11 = vrot.slane %v3314_v9, %v6674_v45  ;;  %v3373_v14 = vrot.slane %v3313_v57, %v6665_v36  ;;  %v5740_v47 = vld [vmem:[%s8089_s14 + $0xa8] sm:$0xff]   ;;  %v5204_v57 = vld [vmem:[%s8090_s10 + $0x20] sm:$0xff] }
 0x48f   :  { %v3145_v58 = vmul.f32 %v3141_v4, %v3103_v8  ;;  %v3338_v19 = vcombine.low %v3321_v7, %v3325_v21  ;;  %v3382_v54 = vcombine.low %v3365_v43, %v3369_v1  ;;  %5323 = vmatpush3.bf16.msra.mxu0 %v5731_v60  ;;  %v3188_v34 = vmul.f32 %v3185_v48, %v3102_v23  ;;  %v5742_v60 = vld [vmem:[%s8089_s14 + $0xf0] sm:$0xff]   ;;  %v5205_v25 = vld [vmem:[%s8090_s10 + $0x28] sm:$0xff] }
 0x490   :  { %v5199_v22 = vrot.slane %v3189_v3, 9  ;;  %v3339_v33 = vcombine.low %v3329_v5, %v3333_v11  ;;  %v3377_v61 = vrot.slane %v3314_v9, %v6665_v36  ;;  %5345 = vmatpush3.bf16.msra.mxu1 %v5732_v18  ;;  %5324 = vmatprep.subr.bf16.mxu0 %v5733_v24  ;;  %v3287_v30 = vmul.f32 %v5200_v39, %v3284_v17  ;;  %v5744_v1 = vld [vmem:[%s8089_s14 + $0xb0] sm:$0xff]  }
 0x491   :  { %v3144_v62 = vmul.f32 %v3140_v10, %v3102_v23  ;;  %v3346_v44 = vrot.slane %v3338_v19, %v7482_v53  ;;  %5346 = vmatprep.subr.bf16.mxu1 %v5734_v55  ;;  %v5198_v32 = vrot.slane %v3188_v34, 9  ;;  %v3243_v51 = vmul.f32 %v5200_v39, %v7533_v40  ;;  %v5741_v40 = vld [vmem:[%s8089_s14 + $0x70] sm:$0xff]   ;;  %v5745_v55 = vld [vmem:[%s8089_s14 + $0x78] sm:$0xff]  }
 0x492   :  { %v3199_v59 = vadd.f32 %v5199_v22, %v3145_v58  ;;  %v3353_v63 = vrot.slane %v3339_v33, %v7482_v53  ;;  %v3383_v13 = vcombine.low %v3373_v14, %v3377_v61  ;;  %v3390_v12 = vrot.slane %v3382_v54, %v7482_v53  ;;  %v5746_v58 = vld [vmem:[%s8089_s14 + $0xf8] sm:$0xff]   ;;  %v8192_v14 = vld [vmem:[#allocation10_spill] sm:$0xff]  ;;  %v8194_v33 = vld [vmem:[#allocation11_spill] sm:$0xff] }
 0x493   :  { %5325 = vmatpush3.bf16.msra.mxu0 %v5735_v35  ;;  %v3198_v37 = vadd.f32 %v5198_v32, %v3144_v62  ;;  %v5202_v7 = vrot.slane %v3287_v30, 9  ;;  %v8193_v39 = vld [vmem:[#allocation13_spill] sm:$0xff]  ;;  %v7686_v62 = vsub.s32 6, %v8191_v56 }
 0x494   :  { %v3246_v41 = vadd.f32 %v3244_v50, %v3199_v59  ;;  %v3354_v8 = vcombine.low %v3346_v44, %v3353_v63  ;;  %v3397_v10 = vrot.slane %v3383_v13, %v7482_v53  ;;  %5347 = vmatpush3.bf16.msra.mxu1 %v5736_v52  ;;  %5326 = vmatprep.subr.bf16.mxu0 %v5737_v26  ;;  %v5747_v22 = vld [vmem:[%s8089_s14 + $0x38] sm:$0xff]   ;;  %v8195_v52 = vld [vmem:[#allocation12_spill] sm:$0xff] }
 0x495   :  { %5348 = vmatprep.subr.bf16.mxu1 %v5738_v16  ;;  %v3245_v17 = vadd.f32 %v3243_v51, %v3198_v37  ;;  %v5748_v30 = vld [vmem:[%s8089_s14 + $0xb8] sm:$0xff]  }
 0x496   :  { %v3355_v9 = vrot.slane %v3354_v8, 1  ;;  %v3298_v18 = vadd.f32 %v5203_v15, %v3246_v41  ;;  %v3398_v24 = vcombine.low %v3390_v12, %v3397_v10  ;;  %v3358_v43 = vmul.f32 %v5204_v57, %v3354_v8 }
 0x497   :  { %5327 = vmatpush3.bf16.msra.mxu0 %v5739_v27  ;;  %v3297_v4 = vadd.f32 %v5202_v7, %v3245_v17  ;;  %v7711_v17 = vsub.s32 4, %v8191_v56 }
 0x498   :  { %v3359_v21 = vmul.f32 %v5205_v25, %v3355_v9  ;;  %5349 = vmatpush3.bf16.msra.mxu1 %v5740_v47  ;;  %5328 = vmatprep.subr.bf16.mxu0 %v5741_v40  ;;  %v3399_v23 = vrot.slane %v3398_v24, 7  ;;  %v3403_v48 = vmul.f32 %v5205_v25, %v3398_v24 }
 0x499   :  { %5350 = vmatprep.subr.bf16.mxu1 %v5742_v60  ;;  %v3360_v3 = vadd.f32 %v3358_v43, %v3297_v4  ;;  %v1687_v11 = vpop.permute.xlu1 %1686 }
 0x49a   :  { %v3361_v5 = vadd.f32 %v3359_v21, %v3298_v18  ;;  %v3402_v19 = vmul.f32 %v5204_v57, %v3399_v23  ;;  %v5207_v54 = vrot.slane %v3403_v48, 9  ;;  %v1705_v35 = vadd.f32 %v1687_v11, %v8192_v14 }
 0x49b   :  { %v1706_v34 = vadd.f32 %v1687_v11, %v8193_v39  ;;  %5329 = vmatpush3.bf16.msra.mxu0 %v5743_v38  ;;  %v7677_v61 = vadd.f32 %v1687_v11, %v8194_v33  ;;  %v7680_v50 = vadd.f32 %v1687_v11, %v8195_v52 }
 0x49c   :  { %5351 = vmatpush3.bf16.msra.mxu1 %v5744_v1  ;;  %5330 = vmatprep.subr.bf16.mxu0 %v5745_v55  ;;  %v5206_v44 = vrot.slane %v3402_v19, 9  ;;  %v3413_v26 = vadd.f32 %v5207_v54, %v3361_v5  ;;  %v4093_v16 = vrot.slane %v1705_v35, %v6674_v45  ;;  %v4137_v13 = vrot.slane %v1705_v35, %v6665_v36 }
 0x49d   :  { %v4097_v32 = vrot.slane %v1706_v34, %v6674_v45  ;;  %3975 = vrot.lane.b32.xlu1 %v1706_v34, %s5815_s4  ;;  %3973 = vrot.lane.b32.xlu0 %v1705_v35, %s5815_s4  ;;  %v4101_v59 = vrot.slane %v7677_v61, %v6674_v45  ;;  %v4105_v63 = vrot.slane %v7680_v50, %v6674_v45 }
 0x49e   :  { %v4141_v51 = vrot.slane %v1706_v34, %v6665_v36  ;;  %5352 = vmatprep.subr.bf16.mxu1 %v5746_v58  ;;  %v3412_v12 = vadd.f32 %v5206_v44, %v3360_v3  ;;  %v4145_v37 = vrot.slane %v7677_v61, %v6665_v36  ;;  %v4149_v41 = vrot.slane %v7680_v50, %v6665_v36 }
 0x49f   :  { %v4110_v27 = vcombine.low %v4093_v16, %v4097_v32  ;;  %5331 = vmatpush3.bf16.msra.mxu0 %v5747_v22  ;;  %v4111_v8 = vcombine.low %v4101_v59, %v4105_v63  ;;  %v3439_v47 = vrot.slane %v3413_v26, %v8171_v28  ;;  %v3447_v40 = vrot.slane %v3413_v26, %v7686_v62  ;;  %v2052_v59 = vld [vmem:[%s8092_s7] sm:$0xff] }
 0x4a0   :  { %v4154_v10 = vcombine.low %v4137_v13, %v4141_v51  ;;  %5353 = vmatpush3.bf16.msra.mxu1 %v5748_v30  ;;  %v4155_v57 = vcombine.low %v4145_v37, %v4149_v41  ;;  %v3423_v60 = vrot.slane %v3412_v12, %v8171_v28  ;;  %v3431_v18 = vrot.slane %v3412_v12, %v7686_v62  ;;  %v7747_v41 = vpop.f32.mrb[28].mxu0 }
 0x4a1   :  { %v4118_v15 = vrot.slane %v4110_v27, %v7482_v53  ;;  %3979 = vrot.lane.b32.xlu1 %v7680_v50, %s5815_s4  ;;  %3977 = vrot.lane.b32.xlu0 %v7677_v61, %s5815_s4  ;;  %v4125_v25 = vrot.slane %v4111_v8, %v7482_v53  ;;  %v3461_v9 = vpack.c.bf16 %v3439_v47, %v3439_v47  ;;  %v4728_v27 = vld [vmem:[%s8093_s13] sm:$0x3]  ;;  %v7749_v8 = vpop.f32.mrb[44].mxu1  ;;  %v7751_v47 = vpop.f32.mrb[29].mxu0 }
 0x4a2   :  { %v4162_v7 = vrot.slane %v4154_v10, %v7482_v53  ;;  %v4169_v24 = vrot.slane %v4155_v57, %v7482_v53  ;;  %v3457_v38 = vpack.c.bf16 %v3423_v60, %v3423_v60  ;;  %v3463_v4 = vpack.c.bf16 %v3447_v40, %v3447_v40  ;;  %v7753_v40 = vpop.f32.mrb[45].mxu1  ;;  %v2113_v57 = vpop.f32.mrb[30].mxu0 }
 0x4a3   :  { %v3419_v43 = vrot.slane %v3412_v12, %v6674_v45  ;;  %v7718_v21 = vcombine.low %v4118_v15, %v4125_v25  ;;  %v3541_v1 = vunpack.c.l.b16 %v3461_v9  ;;  %v3459_v55 = vpack.c.bf16 %v3431_v18, %v3431_v18  ;;  %v2154_v60 = vpop.f32.mrb[46].mxu1  ;;  %v2977_v25 = vld [vmem:[%s8094_s9] sm:$0xff] }
 0x4a4   :  { %v3435_v56 = vrot.slane %v3413_v26, %v6674_v45  ;;  %v7721_v23 = vcombine.low %v4162_v7, %v4169_v24  ;;  %v3537_v48 = vunpack.c.l.b16 %v3457_v38  ;;  %v3543_v3 = vunpack.c.l.b16 %v3463_v4  ;;  %v2114_v7 = vpop.f32.mrb[31].mxu0  ;;  %v2155_v9 = vpop.f32.mrb[47].mxu1  ;;  %v5749_v18 = vld [vmem:[%s8095_s15] ss:$16 sps:$4 sm:$0xff]   ;;  %v5751_v24 = vld [vmem:[%s8095_s15 + $0x4] ss:$16 sps:$4 sm:$0xff]  }
 0x4a5   :  { %4188 = vrot.lane.b32.xlu1 %v1706_v34, %s5808_s5  ;;  %4186 = vrot.lane.b32.xlu0 %v1705_v35, %s5808_s5  ;;  %v3547_v5 = vrot.slane %v3541_v1, 7  ;;  %v3456_v11 = vpack.c.bf16 %v3419_v43, %v3419_v43  ;;  %v3427_v19 = vrot.slane %v3412_v12, %v7711_v17  ;;  %v3539_v54 = vunpack.c.l.b16 %v3459_v55  ;;  %v5752_v38 = vld [vmem:[%s8095_s15 + $0x8] ss:$16 sps:$4 sm:$0xff]   ;;  %v5754_v4 = vld [vmem:[%s8095_s15 + $0xc] ss:$16 sps:$4 sm:$0xff]  }
 0x4a6   :  { %v3460_v58 = vpack.c.bf16 %v3435_v56, %v3435_v56  ;;  %v3551_v14 = vrot.slane %v3543_v3, 7  ;;  %v3443_v39 = vrot.slane %v3413_v26, %v7711_v17  ;;  %v3842_v26 = vld [vmem:[%s8091_s11] sm:$0x3]  ;;  %v8196_v15 = vmov 0   ;;  %3891 = vmatprep.subr.bf16.mxu0 %v5751_v24  ;;  %3932 = vmatprep.subr.bf16.mxu1 %v5754_v4  ;;  %v5757_v43 = vld [vmem:[%s8095_s15 + $0x24] ss:$16 sps:$4 sm:$0xff]  }
 0x4a7   :  { %v3548_v22 = vsel %vm3545_vm4, %v3547_v5, %v3537_v48  ;;  %v3458_v52 = vpack.c.bf16 %v3427_v19, %v3427_v19  ;;  %v3536_v16 = vunpack.c.l.b16 %v3456_v11  ;;  %v5760_v1 = vld [vmem:[%s8095_s15 + $0x2c] ss:$16 sps:$4 sm:$0xff]   ;;  %v5755_v55 = vld [vmem:[%s8095_s15 + $0x20] ss:$16 sps:$4 sm:$0xff]   ;;  %v5758_v56 = vld [vmem:[%s8095_s15 + $0x28] ss:$16 sps:$4 sm:$0xff]  }
 0x4a8   :  { %v3540_v33 = vunpack.c.l.b16 %v3460_v58  ;;  %v3554_v30 = vpack.c.b16 %v3548_v22, %v3548_v22  ;;  %v3552_v34 = vsel %vm3545_vm4, %v3551_v14, %v3539_v54  ;;  %v3462_v35 = vpack.c.bf16 %v3443_v39, %v3443_v39  ;;  %v5761_v48 = vld [vmem:[%s8096_s16 + $0x40] sm:$0xff]   ;;  %v3990_v4 = vld [vmem:[%s8097_s12 + $0x8] sm:$0xff] }
 0x4a9   :  { %4192 = vrot.lane.b32.xlu1 %v7680_v50, %s5808_s5  ;;  %4190 = vrot.lane.b32.xlu0 %v7677_v61, %s5808_s5  ;;  %v3556_v44 = vpack.c.b16 %v3552_v34, %v3552_v34  ;;  %v3538_v51 = vunpack.c.l.b16 %v3458_v52  ;;  %v1659_v61 = vld [vmem:[%s8137_s2] sm:$0xff]  ;;  %v4171_v24 = vrot.slane %v7721_v23, 7 }
 0x4aa   :  { %v3544_v32 = vrot.slane %v3540_v33, 7  ;;  %3785 = vmatprep.mubr.bf16.mxu0 %v3554_v30  ;;  %v3542_v63 = vunpack.c.l.b16 %v3462_v35  ;;  %v5762_v3 = vld [vmem:[%s8096_s16 + $0xc0] sm:$0xff]  }
 0x4ab   :  { %3825 = vmatprep.mubr.bf16.mxu1 %v3556_v44 }
 0x4ac   :  { %v3546_v13 = vsel %vm3545_vm4, %v3544_v32, %v3536_v16  ;;  %v3549_v12 = vrot.slane %v3542_v63, 7 }
 0x4ad   :  { %v3553_v50 = vpack.c.b16 %v3546_v13, %v3546_v13  ;;  %3845 = vperm.xlu1 %5511, %v3842_v26   ;;  %2055 = vperm.xlu0 %5510, %v2052_v59  }
 0x4ae   :  { %v3550_v37 = vsel %vm3545_vm4, %v3549_v12, %v3538_v51 }
 0x4af   :  { %3786 = vmatmul.mubr.bf16.vlgmr.msra.gmra.mrb[36].mxu0 %v3553_v50  ;;  %v3555_v10 = vpack.c.b16 %v3550_v37, %v3550_v37 }
 0x4b0   :  { %3923 = vmatprep.mubr.bf16.mxu0 %v8196_v15  ;;  %3892 = vmatpush1.bf16.msra.mxu0 %v5749_v18 }
 0x4b1   :  { %1666 = vperm.xlu1 %5511, %v1659_v61   ;;  %4731 = vperm.xlu0 %5510, %v4728_v27   ;;  %v4127_v61 = vrot.slane %v7718_v21, 1 }
 0x4b2   :  { %3826 = vmatmul.mubr.bf16.vlgmr.msra.gmra.mrb[52].mxu1 %v3555_v10  ;;  %3893 = vmatprep.subr.bf16.mxu0 %v5757_v43  ;;  %v5253_v10 = vld [vmem:[%s8097_s12 + $0x18] sm:$0xff] }
 0x4b3   :  { %3964 = vmatprep.mubr.bf16.mxu1 %v8196_v15  ;;  %3933 = vmatpush1.bf16.msra.mxu1 %v5752_v38 }
 0x4b4   :  { %3934 = vmatprep.subr.bf16.mxu1 %v5760_v1  ;;  %3894 = vmatpush1.bf16.msra.mxu0 %v5755_v55 }
 0x4b5   :  { %2980 = vperm.xlu0 %5510, %v2977_v25   ;;  %5360 = vmatprep.subr.bf16.mxu0 %v5761_v48  ;;  %v4131_v48 = vmul.f32 %v5253_v10, %v4127_v61 }
 0x4b7   :  { %3935 = vmatpush1.bf16.msra.mxu1 %v5758_v56 }
 0x4b8   :  { %5382 = vmatprep.subr.bf16.mxu1 %v5762_v3  ;;  %v4175_v3 = vmul.f32 %v5253_v10, %v7721_v23 }
 0x4ba   :  { %v5255_v61 = vrot.slane %v4175_v3, 9 }
 0x50f   :  { %v3976_v5 = vpop.permute.xlu1 %3975  ;;  %v3974_v11 = vpop.permute.xlu0 %3973 }
 0x510   :  { %v3983_v58 = vsel %vm1839_vm9, %v3974_v11, %v3976_v5 }
 0x511   :  { %v3986_v19 = vmul.f32 %v3983_v58, %v6851_v6 }
 0x513   :  { %v3980_v54 = vpop.permute.xlu1 %3979  ;;  %v3978_v14 = vpop.permute.xlu0 %3977  ;;  %v3998_v35 = vrot.slane %v3986_v19, %v6674_v45  ;;  %v4042_v6 = vrot.slane %v3986_v19, %v6665_v36 }
 0x514   :  { %v3984_v39 = vsel %vm1839_vm9, %v3980_v54, %v3974_v11  ;;  %v3981_v22 = vsel %vm1839_vm9, %v3978_v14, %v3980_v54  ;;  %v3982_v33 = vsel %vm1839_vm9, %v3976_v5, %v3978_v14 }
 0x515   :  { %v3985_v52 = vmul.f32 %v3984_v39, %v6882_v46  ;;  %v3987_v30 = vmul.f32 %v3982_v33, %v6868_v20  ;;  %v3988_v34 = vmul.f32 %v3981_v22, %v6885_v0 }
 0x517   :  { %v3994_v44 = vrot.slane %v3985_v52, %v6674_v45  ;;  %v4038_v16 = vrot.slane %v3985_v52, %v6665_v36  ;;  %v4002_v32 = vrot.slane %v3987_v30, %v6674_v45  ;;  %v4006_v26 = vrot.slane %v3988_v34, %v6674_v45  ;;  %v4189_v59 = vpop.permute.xlu1 %4188  ;;  %v4187_v63 = vpop.permute.xlu0 %4186  ;;  %v5252_v52 = vld [vmem:[%s8097_s12 + $0x10] sm:$0xff] }
 0x518   :  { %v4046_v46 = vrot.slane %v3987_v30, %v6665_v36  ;;  %v4050_v20 = vrot.slane %v3988_v34, %v6665_v36  ;;  %v4196_v0 = vsel %vm1879_vm5, %v4187_v63, %v4189_v59 }
 0x519   :  { %v4011_v13 = vcombine.low %v3994_v44, %v3998_v35  ;;  %v4055_v50 = vcombine.low %v4038_v16, %v4042_v6  ;;  %v4012_v51 = vcombine.low %v4002_v32, %v4006_v26  ;;  %v4198_v60 = vmul.f32 %v4196_v0, %v8189_v49 }
 0x51a   :  { %v4056_v12 = vcombine.low %v4046_v46, %v4050_v20  ;;  %v4174_v16 = vmul.f32 %v5252_v52, %v4171_v24 }
 0x51b   :  { %v4019_v27 = vrot.slane %v4011_v13, %v7482_v53  ;;  %v4063_v37 = vrot.slane %v4055_v50, %v7482_v53  ;;  %v4026_v57 = vrot.slane %v4012_v51, %v7482_v53  ;;  %v4193_v25 = vpop.permute.xlu1 %4192  ;;  %v4191_v7 = vpop.permute.xlu0 %4190  ;;  %v4208_v58 = vrot.slane %v4198_v60, %v6674_v45 }
 0x51c   :  { %v4070_v9 = vrot.slane %v4056_v12, %v7482_v53  ;;  %v4197_v18 = vsel %vm1879_vm5, %v4193_v25, %v4187_v63  ;;  %v4194_v38 = vsel %vm1879_vm5, %v4191_v7, %v4193_v25  ;;  %v4195_v49 = vsel %vm1879_vm5, %v4189_v59, %v4191_v7  ;;  %v5257_v12 = vld [vmem:[%s8097_s12 + $0x28] sm:$0xff] }
 0x51d   :  { %v4027_v43 = vcombine.low %v4019_v27, %v4026_v57  ;;  %v4201_v1 = vmul.f32 %v4197_v18, %v6777_v2  ;;  %v4200_v55 = vmul.f32 %v4194_v38, %v6769_v42  ;;  %v4199_v5 = vmul.f32 %v4195_v49, %v8190_v29  ;;  %v3989_v2 = vld [vmem:[%s8097_s12] sm:$0xff] }
 0x51e   :  { %v4071_v56 = vcombine.low %v4063_v37, %v4070_v9  ;;  %v4252_v29 = vrot.slane %v4198_v60, %v6665_v36  ;;  %v5256_v37 = vld [vmem:[%s8097_s12 + $0x20] sm:$0xff]  ;;  %v5254_v60 = vrot.slane %v4174_v16, 9 }
 0x51f   :  { %v4028_v11 = vrot.slane %v4027_v43, 1  ;;  %v4220_v19 = vrot.slane %v4201_v1, %v6674_v45  ;;  %v4264_v54 = vrot.slane %v4201_v1, %v6665_v36  ;;  %v4212_v42 = vrot.slane %v4199_v5, %v6674_v45 }
 0x520   :  { %v4072_v31 = vrot.slane %v4071_v56, 7  ;;  %v4076_v14 = vmul.f32 %v4071_v56, %v3990_v4  ;;  %v4216_v39 = vrot.slane %v4200_v55, %v6674_v45  ;;  %v4256_v22 = vrot.slane %v4199_v5, %v6665_v36 }
 0x521   :  { %v4032_v23 = vmul.f32 %v4028_v11, %v3990_v4  ;;  %v4260_v33 = vrot.slane %v4200_v55, %v6665_v36  ;;  %v4225_v35 = vcombine.low %v4208_v58, %v4212_v42  ;;  %v4031_v44 = vmul.f32 %v4027_v43, %v3989_v2 }
 0x522   :  { %v4075_v30 = vmul.f32 %v4072_v31, %v3989_v2  ;;  %v5251_v34 = vrot.slane %v4076_v14, 9  ;;  %v4226_v6 = vcombine.low %v4216_v39, %v4220_v19  ;;  %v4269_v32 = vcombine.low %v4252_v29, %v4256_v22  ;;  %v8199_v22 = vld [vmem:[#allocation3_spill] sm:$0xff] }
 0x523   :  { %v4270_v26 = vcombine.low %v4260_v33, %v4264_v54  ;;  %v4233_v46 = vrot.slane %v4225_v35, %v7482_v53  ;;  %v4130_v36 = vmul.f32 %v5252_v52, %v7718_v21  ;;  %v8200_v52 = vld [vmem:[#allocation5_spill] sm:$0xff] }
 0x524   :  { %v5250_v59 = vrot.slane %v4075_v30, 9  ;;  %v4086_v63 = vadd.f32 %v5251_v34, %v4032_v23  ;;  %v4240_v20 = vrot.slane %v4226_v6, %v7482_v53  ;;  %v4277_v0 = vrot.slane %v4269_v32, %v7482_v53 }
 0x525   :  { %v4284_v13 = vrot.slane %v4270_v26, %v7482_v53 }
 0x526   :  { %v4085_v50 = vadd.f32 %v5250_v59, %v4031_v44  ;;  %v4133_v51 = vadd.f32 %v4131_v48, %v4086_v63  ;;  %v4241_v27 = vcombine.low %v4233_v46, %v4240_v20 }
 0x527   :  { %v4285_v10 = vcombine.low %v4277_v0, %v4284_v13 }
 0x528   :  { %v4132_v57 = vadd.f32 %v4130_v36, %v4085_v50  ;;  %v4185_v21 = vadd.f32 %v5255_v61, %v4133_v51  ;;  %v4242_v25 = vrot.slane %v4241_v27, 1  ;;  %v4245_v18 = vmul.f32 %v5256_v37, %v4241_v27 }
 0x529   :  { %v4286_v7 = vrot.slane %v4285_v10, 7  ;;  %v4290_v9 = vmul.f32 %v5257_v12, %v4285_v10 }
 0x52a   :  { %v4184_v53 = vadd.f32 %v5254_v60, %v4132_v57  ;;  %v4246_v24 = vmul.f32 %v5257_v12, %v4242_v25 }
 0x52b   :  { %v4289_v38 = vmul.f32 %v5256_v37, %v4286_v7  ;;  %v5259_v1 = vrot.slane %v4290_v9, 9 }
 0x52c   :  { %v4247_v4 = vadd.f32 %v4245_v18, %v4184_v53  ;;  %v4248_v43 = vadd.f32 %v4246_v24, %v4185_v21  ;;  %v7860_v49 = vpop.permute.xlu1 %3845  ;;  %v2056_v55 = vpop.permute.xlu0 %2055 }
 0x52d   :  { %v5258_v56 = vrot.slane %v4289_v38, 9  ;;  %v2110_v48 = vadd.f32 %v7747_v41, %v2056_v55  ;;  %v2112_v3 = vadd.f32 %v7751_v47, %v2056_v55  ;;  %v2151_v5 = vadd.f32 %v7749_v8, %v2056_v55  ;;  %v8197_v41 = vld [vmem:[#allocation2_spill] sm:$0xff]  ;;  %v8198_v47 = vld [vmem:[#allocation4_spill] sm:$0xff] }
 0x52e   :  { %v4300_v11 = vadd.f32 %v5259_v1, %v4248_v43  ;;  %v2153_v58 = vadd.f32 %v7753_v40, %v2056_v55 }
 0x52f   :  { %v4299_v19 = vadd.f32 %v5258_v56, %v4247_v4  ;;  %v4867_v54 = vrot.slane %v2110_v48, 4  ;;  %v4868_v2 = vrot.slane %v2112_v3, 4  ;;  %v4869_v31 = vrot.slane %v2151_v5, 4 }
 0x530   :  { %v4870_v14 = vrot.slane %v2153_v58, 4  ;;  %v1667_v42 = vpop.permute.xlu1 %1666  ;;  %v4326_v39 = vrot.slane %v4300_v11, %v8171_v28  ;;  %v4334_v23 = vrot.slane %v4300_v11, %v7686_v62  ;;  %v4322_v29 = vrot.slane %v4300_v11, %v6674_v45  ;;  %v7910_v7 = vpop.permute.xlu0 %4731 }
 0x531   :  { %4875 = vst [vmem:[%s8098_s19] sm:$0xf0] %v4867_v54  ;;  %4876 = vst [vmem:[%s8098_s19 + $0x8] sm:$0xf0] %v4868_v2  ;;  %v1689_v8 = vadd.f32 %v1667_v42, %v8197_v41  ;;  %v1690_v40 = vadd.f32 %v1667_v42, %v8198_v47  ;;  %v1691_v33 = vadd.f32 %v1667_v42, %v8199_v22  ;;  %v5763_v41 = vld [vmem:[%s8096_s16] sm:$0xff]   ;;  %v5766_v22 = vld [vmem:[%s8096_s16 + $0xc8] sm:$0xff]  }
 0x532   :  { %4877 = vst [vmem:[%s8098_s19 + $0x10] sm:$0xf0] %v4869_v31  ;;  %v1692_v30 = vadd.f32 %v1667_v42, %v8200_v52  ;;  %4878 = vst [vmem:[%s8098_s19 + $0x18] sm:$0xf0] %v4870_v14  ;;  %v4310_v34 = vrot.slane %v4299_v19, %v8171_v28  ;;  %v4348_v35 = vpack.c.bf16 %v4326_v39, %v4326_v39 }
 0x533   :  { %v4318_v6 = vrot.slane %v4299_v19, %v7686_v62  ;;  %v4350_v44 = vpack.c.bf16 %v4334_v23, %v4334_v23  ;;  %4859 = vst [vmem:[%s8098_s19] sm:$0xf] %v1689_v8  ;;  %4860 = vst [vmem:[%s8098_s19 + $0x8] sm:$0xf] %v1690_v40  ;;  %v4306_v28 = vrot.slane %v4299_v19, %v6674_v45  ;;  %v5764_v8 = vld [vmem:[%s8096_s16 + $0x80] sm:$0xff]   ;;  %v5765_v40 = vld [vmem:[%s8096_s16 + $0x48] sm:$0xff]  }
 0x534   :  { %4861 = vst [vmem:[%s8098_s19 + $0x10] sm:$0xf] %v1691_v33  ;;  %4862 = vst [vmem:[%s8098_s19 + $0x18] sm:$0xf] %v1692_v30  ;;  %v4347_v62 = vpack.c.bf16 %v4322_v29, %v4322_v29  ;;  %v4314_v16 = vrot.slane %v4299_v19, %v7711_v17  ;;  %v4330_v32 = vrot.slane %v4300_v11, %v7711_v17  ;;  %v4428_v59 = vunpack.c.l.b16 %v4348_v35  ;;  %v2981_v9 = vpop.permute.xlu0 %2980  ;;  %v5767_v30 = vld [vmem:[%s8096_s16 + $0x8] sm:$0xff]   ;;  %v5769_v35 = vld [vmem:[%s8096_s16 + $0x50] sm:$0xff]  }
 0x535   :  { %v4344_v26 = vpack.c.bf16 %v4310_v34, %v4310_v34  ;;  %v4346_v63 = vpack.c.bf16 %v4318_v6, %v4318_v6  ;;  %v4430_v46 = vunpack.c.l.b16 %v4350_v44  ;;  %v4343_v20 = vpack.c.bf16 %v4306_v28, %v4306_v28  ;;  %v5768_v34 = vld [vmem:[%s8096_s16 + $0x88] sm:$0xff]   ;;  %v5770_v6 = vld [vmem:[%s8096_s16 + $0xd0] sm:$0xff]  }
 0x536   :  { %v4427_v36 = vunpack.c.l.b16 %v4347_v62  ;;  %v4345_v0 = vpack.c.bf16 %v4314_v16, %v4314_v16  ;;  %v4349_v13 = vpack.c.bf16 %v4330_v32, %v4330_v32  ;;  %v4433_v51 = vrot.slane %v4428_v59, 7  ;;  %v5771_v44 = vld [vmem:[%s8096_s16 + $0x10] sm:$0xff]   ;;  %v5773_v62 = vld [vmem:[%s8096_s16 + $0x58] sm:$0xff]   ;;  %v5777_v59 = vld [vmem:[%s8096_s16 + $0x60] sm:$0xff]  }
 0x537   :  { %v4424_v50 = vunpack.c.l.b16 %v4344_v26  ;;  %v4426_v12 = vunpack.c.l.b16 %v4346_v63  ;;  %v4437_v61 = vrot.slane %v4430_v46, 7  ;;  %v4423_v27 = vunpack.c.l.b16 %v4343_v20  ;;  %v5772_v28 = vld [vmem:[%s8096_s16 + $0x90] sm:$0xff]   ;;  %v5774_v16 = vld [vmem:[%s8096_s16 + $0xd8] sm:$0xff]   ;;  %v5778_v63 = vld [vmem:[%s8096_s16 + $0xe0] sm:$0xff]  }
 0x538   :  { %v4431_v37 = vrot.slane %v4427_v36, 7  ;;  %v4429_v45 = vunpack.c.l.b16 %v4349_v13  ;;  %v4425_v60 = vunpack.c.l.b16 %v4345_v0  ;;  %v5775_v32 = vld [vmem:[%s8096_s16 + $0x18] sm:$0xff]   ;;  %v5779_v46 = vld [vmem:[%s8096_s16 + $0x20] sm:$0xff]   ;;  %v5781_v36 = vld [vmem:[%s8096_s16 + $0x68] sm:$0xff]  }
 0x539   :  { %v4434_v10 = vsel %vm3545_vm4, %v4433_v51, %v4424_v50  ;;  %v4438_v57 = vsel %vm3545_vm4, %v4437_v61, %v4426_v12  ;;  %v5776_v26 = vld [vmem:[%s8096_s16 + $0x98] sm:$0xff]   ;;  %v5780_v20 = vld [vmem:[%s8096_s16 + $0xa0] sm:$0xff]   ;;  %v5782_v0 = vld [vmem:[%s8096_s16 + $0xe8] sm:$0xff]  }
 0x53a   :  { %v7905_v17 = vsel %vm3545_vm4, %v4431_v37, %v4423_v27  ;;  %v4435_v21 = vrot.slane %v4429_v45, 7  ;;  %v4440_v33 = vpack.c.b16 %v4434_v10, %v4434_v10  ;;  %v4442_v52 = vpack.c.b16 %v4438_v57, %v4438_v57  ;;  %v5783_v13 = vld [vmem:[%s8096_s16 + $0x28] sm:$0xff]   ;;  %v5785_v51 = vld [vmem:[%s8096_s16 + $0x70] sm:$0xff]   ;;  %v5789_v37 = vld [vmem:[%s8096_s16 + $0x78] sm:$0xff]  }
 0x53b   :  { %v5784_v50 = vld [vmem:[%s8096_s16 + $0xa8] sm:$0xff]   ;;  %v5786_v12 = vld [vmem:[%s8096_s16 + $0xf0] sm:$0xff]   ;;  %v5790_v45 = vld [vmem:[%s8096_s16 + $0xf8] sm:$0xff]  }
 0x53c   :  { %v7908_v25 = vsel %vm3545_vm4, %v4435_v21, %v4425_v60  ;;  %v5787_v61 = vld [vmem:[%s8096_s16 + $0x30] sm:$0xff]   ;;  %v5791_v10 = vld [vmem:[%s8096_s16 + $0x38] sm:$0xff]   ;;  %v4439_v60 = vpack.c.b16 %v7905_v17, %v7905_v17 }
 0x53d   :  { %v5788_v27 = vld [vmem:[%s8096_s16 + $0xb0] sm:$0xff]   ;;  %v5792_v57 = vld [vmem:[%s8096_s16 + $0xb8] sm:$0xff]   ;;  %v4441_v21 = vpack.c.b16 %v7908_v25, %v7908_v25 }
 0x53e   :  { %v5796_v17 = vld [vmem:[%s8099_s17 + $0x8] ss:$16 sps:$4 sm:$0xff]   ;;  %v5798_v25 = vld [vmem:[%s8099_s17 + $0xc] ss:$16 sps:$4 sm:$0xff]  }
 0x555   :  { %v3038_v53 = vpop.f32.mrb[32].mxu0 }
 0x556   :  { %v3039_v18 = vadd.f32 %v3038_v53, %v2981_v9  ;;  %v3079_v24 = vpop.f32.mrb[48].mxu1  ;;  %v3040_v38 = vpop.f32.mrb[33].mxu0  ;;  %v5795_v53 = vld [vmem:[%s8099_s17 + $0x4] ss:$16 sps:$4 sm:$0xff]  }
 0x557   :  { %v3080_v4 = vadd.f32 %v3079_v24, %v2981_v9  ;;  %v3041_v43 = vadd.f32 %v3040_v38, %v2981_v9  ;;  %v3081_v1 = vpop.f32.mrb[49].mxu1  ;;  %v3042_v55 = vpop.f32.mrb[34].mxu0  ;;  %v5799_v24 = vld [vmem:[%s8099_s17 + $0x20] ss:$16 sps:$4 sm:$0xff]   ;;  %v5802_v38 = vld [vmem:[%s8099_s17 + $0x28] ss:$16 sps:$4 sm:$0xff]  }
 0x558   :  { %4879 = vst [vmem:[%s8098_s19 + $0x20] sm:$0xf] %v3039_v18  ;;  %v3082_v56 = vadd.f32 %v3081_v1, %v2981_v9  ;;  %v3083_v48 = vpop.f32.mrb[50].mxu1  ;;  %v3043_v3 = vpop.f32.mrb[35].mxu0  ;;  %v5793_v9 = vld [vmem:[%s8099_s17] ss:$16 sps:$4 sm:$0xff]  }
 0x559   :  { %4881 = vst [vmem:[%s8098_s19 + $0x30] sm:$0xf] %v3080_v4  ;;  %4880 = vst [vmem:[%s8098_s19 + $0x28] sm:$0xf] %v3041_v43  ;;  %v3084_v5 = vpop.f32.mrb[51].mxu1 }
 0x55a   :  { %4882 = vst [vmem:[%s8098_s19 + $0x38] sm:$0xf] %v3082_v56  ;;  %v5804_v18 = vld [vmem:[%s8099_s17 + $0x2c] ss:$16 sps:$4 sm:$0xff]  }
 0x582   :  { %v5332_v11 = vpop.f32.mrb[36].mxu0 }
 0x583   :  { %v5333_v58 = vpop.f32.mrb[37].mxu0 }
 0x584   :  { %v5334_v19 = vadd.f32 %v5333_v58, %v5332_v11  ;;  %v5335_v54 = vpop.f32.mrb[38].mxu0 }
 0x585   :  { %v5354_v2 = vpop.f32.mrb[52].mxu1  ;;  %v5336_v31 = vpop.f32.mrb[39].mxu0 }
 0x586   :  { %v5355_v14 = vpop.f32.mrb[53].mxu1 }
 0x587   :  { %v5356_v42 = vadd.f32 %v5355_v14, %v5354_v2  ;;  %v5357_v39 = vpop.f32.mrb[54].mxu1 }
 0x588   :  { %v5358_v23 = vpop.f32.mrb[55].mxu1 }
 0x589   :  { %v3828_v29 = vadd.f32 %v5356_v42, %v5334_v19 }
 0x58b   :  { %v3833_v47 = vpack.c.bf16 %v3828_v29, %v3828_v29 }
 0x58d   :  { %5248 = vmatmul.mubr.msk.bf16.vlgmr.msra.gmra.mrb[40].mxu0 %vm88_vm1, %v3833_v47  ;;  %5249 = vmatmul.mubr.msk.bf16.vlgmr.msra.gmra.mrb[56].mxu1 %vm88_vm1, %v3833_v47 }
 0x58e   :  { %5361 = vmatpush3.bf16.msra.mxu0 %v5763_v41  ;;  %5383 = vmatpush3.bf16.msra.mxu1 %v5764_v8 }
 0x58f   :  { %4671 = vmatprep.mubr.bf16.mxu0 %v4440_v33  ;;  %4711 = vmatprep.mubr.bf16.mxu1 %v4442_v52 }
 0x590   :  { %5362 = vmatprep.subr.bf16.mxu0 %v5765_v40  ;;  %5384 = vmatprep.subr.bf16.mxu1 %v5766_v22 }
 0x592   :  { %5363 = vmatpush3.bf16.msra.mxu0 %v5767_v30  ;;  %5385 = vmatpush3.bf16.msra.mxu1 %v5768_v34 }
 0x593   :  { %5364 = vmatprep.subr.bf16.mxu0 %v5769_v35  ;;  %5386 = vmatprep.subr.bf16.mxu1 %v5770_v6 }
 0x596   :  { %5365 = vmatpush3.bf16.msra.mxu0 %v5771_v44  ;;  %5387 = vmatpush3.bf16.msra.mxu1 %v5772_v28 }
 0x597   :  { %5366 = vmatprep.subr.bf16.mxu0 %v5773_v62  ;;  %5388 = vmatprep.subr.bf16.mxu1 %v5774_v16 }
 0x59a   :  { %5367 = vmatpush3.bf16.msra.mxu0 %v5775_v32  ;;  %5389 = vmatpush3.bf16.msra.mxu1 %v5776_v26 }
 0x59b   :  { %5368 = vmatprep.subr.bf16.mxu0 %v5777_v59  ;;  %5390 = vmatprep.subr.bf16.mxu1 %v5778_v63 }
 0x59e   :  { %5369 = vmatpush3.bf16.msra.mxu0 %v5779_v46  ;;  %5391 = vmatpush3.bf16.msra.mxu1 %v5780_v20 }
 0x59f   :  { %5370 = vmatprep.subr.bf16.mxu0 %v5781_v36  ;;  %5392 = vmatprep.subr.bf16.mxu1 %v5782_v0 }
 0x5a2   :  { %5371 = vmatpush3.bf16.msra.mxu0 %v5783_v13  ;;  %5393 = vmatpush3.bf16.msra.mxu1 %v5784_v50 }
 0x5a3   :  { %5372 = vmatprep.subr.bf16.mxu0 %v5785_v51  ;;  %5394 = vmatprep.subr.bf16.mxu1 %v5786_v12 }
 0x5a6   :  { %5373 = vmatpush3.bf16.msra.mxu0 %v5787_v61  ;;  %5395 = vmatpush3.bf16.msra.mxu1 %v5788_v27 }
 0x5a7   :  { %5374 = vmatprep.subr.bf16.mxu0 %v5789_v37  ;;  %5396 = vmatprep.subr.bf16.mxu1 %v5790_v45 }
 0x5aa   :  { %5375 = vmatpush3.bf16.msra.mxu0 %v5791_v10  ;;  %5397 = vmatpush3.bf16.msra.mxu1 %v5792_v57 }
 0x5ab   :  { %4777 = vmatprep.subr.bf16.mxu0 %v5795_v53  ;;  %4818 = vmatprep.subr.bf16.mxu1 %v5798_v25 }
 0x5ad   :  { %4672 = vmatmul.mubr.bf16.vlgmr.msra.gmra.mrb[44].mxu0 %v4439_v60  ;;  %4712 = vmatmul.mubr.bf16.vlgmr.msra.gmra.mrb[60].mxu1 %v4441_v21 }
 0x5ae   :  { %4809 = vmatprep.mubr.bf16.mxu0 %v8196_v15  ;;  %4850 = vmatprep.mubr.bf16.mxu1 %v8196_v15  ;;  %v5801_v15 = vld [vmem:[%s8099_s17 + $0x24] ss:$16 sps:$4 sm:$0xff]  }
 0x5af   :  { %4778 = vmatpush1.bf16.msra.mxu0 %v5793_v9  ;;  %4819 = vmatpush1.bf16.msra.mxu1 %v5796_v17 }
 0x5b0   :  { %4779 = vmatprep.subr.bf16.mxu0 %v5801_v15  ;;  %4820 = vmatprep.subr.bf16.mxu1 %v5804_v18 }
 0x5b3   :  { %4780 = vmatpush1.bf16.msra.mxu0 %v5799_v24  ;;  %4821 = vmatpush1.bf16.msra.mxu1 %v5802_v38 }
 0x660   :  { %v3925_v4 = vpop.f32.mrb[40].mxu0  ;;  %v3966_v43 = vpop.f32.mrb[56].mxu1 }
 0x661   :  { %v3926_v1 = vadd.f32 %v3925_v4, %v7860_v49  ;;  %v3967_v55 = vadd.f32 %v3966_v43, %v7860_v49  ;;  %v3927_v56 = vpop.f32.mrb[41].mxu0  ;;  %v3968_v48 = vpop.f32.mrb[57].mxu1 }
 0x662   :  { %v3928_v3 = vadd.f32 %v3927_v56, %v7860_v49  ;;  %v3969_v5 = vadd.f32 %v3968_v48, %v7860_v49  ;;  %v3929_v11 = vpop.f32.mrb[42].mxu0  ;;  %v3970_v58 = vpop.f32.mrb[58].mxu1 }
 0x663   :  { %v4903_v19 = vrot.slane %v3926_v1, 2  ;;  %v4905_v54 = vrot.slane %v3967_v55, 2  ;;  %v3930_v2 = vpop.f32.mrb[43].mxu0  ;;  %v3971_v31 = vpop.f32.mrb[59].mxu1 }
 0x664   :  { %v4904_v14 = vrot.slane %v3928_v3, 2  ;;  %v4906_v42 = vrot.slane %v3969_v5, 2 }
 0x665   :  { %4911 = vst [vmem:[%s8098_s19 + $0x20] sm:$0xc0] %v4903_v19  ;;  %4913 = vst [vmem:[%s8098_s19 + $0x30] sm:$0xc0] %v4905_v54 }
 0x666   :  { %4912 = vst [vmem:[%s8098_s19 + $0x28] sm:$0xc0] %v4904_v14  ;;  %4914 = vst [vmem:[%s8098_s19 + $0x38] sm:$0xc0] %v4906_v42 }
 0x680   :  { %v5376_v49 = vpop.f32.mrb[44].mxu0  ;;  %v5398_v39 = vpop.f32.mrb[60].mxu1 }
 0x681   :  { %v5377_v23 = vpop.f32.mrb[45].mxu0  ;;  %v5399_v29 = vpop.f32.mrb[61].mxu1 }
 0x682   :  { %v5378_v41 = vadd.f32 %v5377_v23, %v5376_v49  ;;  %v5400_v8 = vadd.f32 %v5399_v29, %v5398_v39  ;;  %v5379_v47 = vpop.f32.mrb[46].mxu0  ;;  %v5401_v40 = vpop.f32.mrb[62].mxu1 }
 0x683   :  { %v5380_v22 = vpop.f32.mrb[47].mxu0  ;;  %v5402_v33 = vpop.f32.mrb[63].mxu1 }
 0x684   :  { %v4714_v52 = vadd.f32 %v5400_v8, %v5378_v41 }
 0x686   :  { %v4719_v30 = vpack.c.bf16 %v4714_v52, %v4714_v52 }
 0x688   :  { %5300 = vmatmul.mubr.msk.bf16.vlgmr.msra.gmra.mrb[48].mxu0 %vm88_vm1, %v4719_v30  ;;  %5301 = vmatmul.mubr.msk.bf16.vlgmr.msra.gmra.mrb[64].mxu1 %vm88_vm1, %v4719_v30 }
 0x75b   :  { %v4811_v34 = vpop.f32.mrb[48].mxu0  ;;  %v4852_v35 = vpop.f32.mrb[64].mxu1 }
 0x75c   :  { %v4812_v6 = vadd.f32 %v4811_v34, %v7910_v7  ;;  %v4853_v44 = vadd.f32 %v4852_v35, %v7910_v7  ;;  %v4813_v28 = vpop.f32.mrb[49].mxu0  ;;  %v4854_v62 = vpop.f32.mrb[65].mxu1 }
 0x75d   :  { %v4814_v16 = vadd.f32 %v4813_v28, %v7910_v7  ;;  %v4855_v32 = vadd.f32 %v4854_v62, %v7910_v7  ;;  %v4815_v26 = vpop.f32.mrb[50].mxu0  ;;  %v4856_v59 = vpop.f32.mrb[66].mxu1 }
 0x75e   :  { %v4887_v63 = vrot.slane %v4812_v6, 4  ;;  %v4889_v46 = vrot.slane %v4853_v44, 4  ;;  %v4816_v20 = vpop.f32.mrb[51].mxu0  ;;  %v4857_v36 = vpop.f32.mrb[67].mxu1 }
 0x75f   :  { %v4888_v0 = vrot.slane %v4814_v16, 4  ;;  %v4890_v13 = vrot.slane %v4855_v32, 4 }
 0x760   :  { %4895 = vst [vmem:[%s8098_s19 + $0x20] sm:$0x30] %v4887_v63  ;;  %4897 = vst [vmem:[%s8098_s19 + $0x30] sm:$0x30] %v4889_v46 }
 0x761   :  { %4896 = vst [vmem:[%s8098_s19 + $0x28] sm:$0x30] %v4888_v0  ;;  %4898 = vst [vmem:[%s8098_s19 + $0x38] sm:$0x30] %v4890_v13 }

</bundles_post_ra>
